<compile_context>
chip_gen: v6e
topology: v6e:2x2x1
jax: 0.10.0
libtpu: 0.0.40
codegen_flags: <defaults>
</compile_context>

<pallas_src>
import jax
import jax.numpy as jnp
import numpy as np
from jax.experimental import pallas as pl
from jax.experimental.pallas import tpu as pltpu


def _lrba_kernel(x1_ref, x2_ref, w1t_ref, w2t_ref, wv_ref, bp_ref,
                 repr_ref, alpha_ref,
                 p2_s, m_s, l_s, acc_s):
    n = pl.program_id(1)
    tn = x1_ref.shape[1]          # static N-tile size

    # ---- per-batch-element init (first pixel tile) ----
    @pl.when(n == 0)
    def _():
        # Label projection, computed once per batch element (bf16 MXU, f32 acc).
        p2_s[...] = jnp.dot(x2_ref[0], w2t_ref[...],
                            preferred_element_type=jnp.float32)       # (L, A)
        m_s[...] = jnp.full_like(m_s, -jnp.inf)
        l_s[...] = jnp.zeros_like(l_s)
        acc_s[...] = jnp.zeros_like(acc_s)

    x1 = x1_ref[0]                                                     # (TN, D1) bf16
    p1 = jnp.dot(x1, w1t_ref[...],
                 preferred_element_type=jnp.float32)                   # (TN, A)

    # Low-rank bilinear interaction + folded hidden/target projection.
    h = jnp.tanh(p1[None, :, :] * p2_s[...][:, None, :])               # (L, TN, A)
    t = jnp.sum(h * wv_ref[...][None, :, :], axis=-1) + bp_ref[0]      # (L, TN)

    # Stash raw logits for this pixel tile; normalized on the last tile.
    col = pl.multiple_of(n * tn, tn)
    alpha_ref[0, :, pl.ds(col, tn)] = t

    # ---- online-softmax running stats + (L, D1) accumulator for alpha@x1 ----
    m_old = m_s[...]                                                   # (L, 1)
    m_new = jnp.maximum(m_old, jnp.max(t, axis=-1, keepdims=True))     # (L, 1)
    corr = jnp.exp(m_old - m_new)                                      # 0 on tile 0
    e = jnp.exp(t - m_new)                                             # (L, TN)
    l_s[...] = corr * l_s[...] + jnp.sum(e, axis=-1, keepdims=True)
    acc_s[...] = corr * acc_s[...] + jnp.dot(
        e.astype(jnp.bfloat16), x1, preferred_element_type=jnp.float32)
    m_s[...] = m_new

    # ---- finalize on the last pixel tile ----
    @pl.when(n == pl.num_programs(1) - 1)
    def _():
        inv_l = 1.0 / l_s[...]                                         # (L, 1)
        alpha_ref[0] = jnp.exp(alpha_ref[0] - m_s[...]) * inv_l        # (L, N)
        repr_ref[0] = (acc_s[...] * inv_l).astype(repr_ref.dtype)      # (L, D1)


def low_rank_bilinear_attention(x1, x2, w1, w2, wh, bh, wt, bt, *, tn=128):
    """x1: (B, N, dim1), x2: (B, L, dim2). PyTorch Linear layout (out, in).

    Returns (label_repr (B, L, dim1), alpha (B, L, N)).
    """
    B, N, D1 = x1.shape
    _, L, D2 = x2.shape
    A = w1.shape[0]

    if N % tn != 0:
        tn = N                              # single-tile fallback
    assert N % tn == 0
    assert tn == N or tn % 128 == 0, "pixel tile must be lane aligned"
    nt = N // tn

    hi = jax.lax.Precision.HIGHEST
    # bf16 MXU operands, pre-transposed so the kernel never takes .T of a tile.
    x1_bf = x1.astype(jnp.bfloat16)
    x2_bf = x2.astype(jnp.bfloat16)
    w1t = jnp.transpose(w1).astype(jnp.bfloat16)                       # (D1, A)
    w2t = jnp.transpose(w2).astype(jnp.bfloat16)                       # (D2, A)
    # Fold hidden_linear + target_linear:  wv = Wh^T wt,  bp = bh.wt + bt.
    wt_vec = wt.reshape(A).astype(jnp.float32)
    wv = jnp.dot(jnp.transpose(wh).astype(jnp.float32), wt_vec,
                 precision=hi).reshape(1, A)                           # (1, A)
    bp = (jnp.dot(bh.astype(jnp.float32), wt_vec, precision=hi)
          + jnp.asarray(bt, jnp.float32)).reshape(1)                   # (1,)

    grid_spec = pltpu.PrefetchScalarGridSpec(
        num_scalar_prefetch=0,
        grid=(B, nt),
        in_specs=[
            pl.BlockSpec((1, tn, D1), lambda b, n: (b, n, 0)),   # x1 tile
            pl.BlockSpec((1, L, D2), lambda b, n: (b, 0, 0)),    # x2 (per batch)
            pl.BlockSpec((D1, A), lambda b, n: (0, 0)),          # w1t (invariant)
            pl.BlockSpec((D2, A), lambda b, n: (0, 0)),          # w2t (invariant)
            pl.BlockSpec((1, A), lambda b, n: (0, 0)),           # folded wv
            pl.BlockSpec(memory_space=pltpu.MemorySpace.SMEM),   # folded bias
        ],
        out_specs=[
            pl.BlockSpec((1, L, D1), lambda b, n: (b, 0, 0)),    # label_repr
            pl.BlockSpec((1, L, N), lambda b, n: (b, 0, 0)),     # alpha (resident)
        ],
        scratch_shapes=[
            pltpu.VMEM((L, A), jnp.float32),    # p2 = x2 @ w2t
            pltpu.VMEM((L, 1), jnp.float32),    # running max
            pltpu.VMEM((L, 1), jnp.float32),    # running sum
            pltpu.VMEM((L, D1), jnp.float32),   # alpha @ x1 accumulator
        ],
    )

    out_shape = (
        jax.ShapeDtypeStruct((B, L, D1), jnp.float32),
        jax.ShapeDtypeStruct((B, L, N), jnp.float32),
    )

    return pl.pallas_call(
        _lrba_kernel,
        out_shape=out_shape,
        grid_spec=grid_spec,
        compiler_params=pltpu.CompilerParams(
            dimension_semantics=("parallel", "arbitrary")),
    )(x1_bf, x2_bf, w1t, w2t, wv, bp)


def reference(x1, x2, w1, w2, wh, bh, wt, bt):
    # Unfolded math, mirrors the PyTorch module exactly (full f32 precision).
    hi = jax.lax.Precision.HIGHEST
    p1 = jnp.einsum('bnd,ad->bna', x1, w1, precision=hi)       # (B, N, A)
    p2 = jnp.einsum('bld,ad->bla', x2, w2, precision=hi)       # (B, L, A)
    h = jnp.tanh(p1[:, None, :, :] * p2[:, :, None, :])        # (B, L, N, A)
    hid = jnp.einsum('blna,oa->blno', h, wh, precision=hi) + bh
    t = jnp.einsum('blna,a->bln', hid, wt, precision=hi) + bt  # (B, L, N)
    alpha = jax.nn.softmax(t, axis=-1)
    label_repr = jnp.einsum('bln,bnd->bld', alpha, x1, precision=hi)
    return label_repr, alpha


if __name__ == "__main__":
    # Small shapes consistent with the module; N spans two tiles to exercise
    # the online-softmax path, and N/D1 are lane-dense multiples of 128.
    B, N, L = 2, 256, 8            # batch, num_pixels, num_labels
    DIM1, DIM2, ATT = 128, 64, 128

    key = jax.random.PRNGKey(0)
    ks = jax.random.split(key, 8)

    def bf16_round(a):
        # Pre-round bf16 MXU operands so kernel and reference see the same data.
        return a.astype(jnp.bfloat16).astype(jnp.float32)

    x1 = bf16_round(jax.random.normal(ks[0], (B, N, DIM1), jnp.float32))
    x2 = bf16_round(jax.random.normal(ks[1], (B, L, DIM2), jnp.float32))
    w1 = bf16_round(jax.random.normal(ks[2], (ATT, DIM1), jnp.float32) * 0.1)
    w2 = bf16_round(jax.random.normal(ks[3], (ATT, DIM2), jnp.float32) * 0.1)
    wh = jax.random.normal(ks[4], (ATT, ATT), jnp.float32) * 0.05
    bh = jax.random.normal(ks[5], (ATT,), jnp.float32) * 0.05
    wt = jax.random.normal(ks[6], (ATT,), jnp.float32) * 0.1
    bt = jax.random.normal(ks[7], (), jnp.float32) * 0.1

    label_repr, alpha = low_rank_bilinear_attention(
        x1, x2, w1, w2, wh, bh, wt, bt, tn=128)
    jax.block_until_ready((label_repr, alpha))

    ref_repr, ref_alpha = reference(x1, x2, w1, w2, wh, bh, wt, bt)
    jax.block_until_ready((ref_repr, ref_alpha))

    assert label_repr.shape == (B, L, DIM1)
    assert alpha.shape == (B, L, N)
    # alpha never touches the bf16 rounding of the repr matmul -> tight check.
    np.testing.assert_allclose(np.asarray(alpha), np.asarray(ref_alpha),
                               rtol=1e-3, atol=1e-6)
    # label_repr uses bf16 softmax numerators on the MXU -> slightly looser.
    np.testing.assert_allclose(np.asarray(label_repr), np.asarray(ref_repr),
                               rtol=2e-2, atol=3e-3)

    print("KERNEL_OK")
</pallas_src>

<mosaic_0001>
module attributes {stable_mosaic.version = 11 : i64} {
  func.func @_lrba_kernel(%arg0: i32, %arg1: i32, %arg2: memref<1x128x128xbf16, #tpu.memory_space<vmem>>, %arg3: memref<1x8x64xbf16, #tpu.memory_space<vmem>>, %arg4: memref<128x128xbf16, #tpu.memory_space<vmem>>, %arg5: memref<64x128xbf16, #tpu.memory_space<vmem>>, %arg6: memref<1x128xf32, #tpu.memory_space<vmem>>, %arg7: memref<1xf32, #tpu.memory_space<smem>>, %arg8: memref<1x8x128xf32, #tpu.memory_space<vmem>>, %arg9: memref<1x8x256xf32, #tpu.memory_space<vmem>>, %arg10: memref<8x128xf32, #tpu.memory_space<vmem>>, %arg11: memref<8x1xf32, #tpu.memory_space<vmem>>, %arg12: memref<8x1xf32, #tpu.memory_space<vmem>>, %arg13: memref<8x128xf32, #tpu.memory_space<vmem>>) attributes {dimension_semantics = [#tpu.dimension_semantics<parallel>, #tpu.dimension_semantics<arbitrary>], iteration_bounds = array<i64: 2, 2>, scalar_prefetch = 0 : i64, scratch_operands = 4 : i64, tpu.core_type = #tpu.core_type<tc>, window_params = [{transform_indices = @transform_0, window_bounds = array<i64: 1, 128, 128>}, {transform_indices = @transform_1, window_bounds = array<i64: 1, 8, 64>}, {pipeline_mode = #tpu.pipeline_mode<synchronous>, transform_indices = @transform_2, window_bounds = array<i64: 128, 128>}, {pipeline_mode = #tpu.pipeline_mode<synchronous>, transform_indices = @transform_3, window_bounds = array<i64: 64, 128>}, {pipeline_mode = #tpu.pipeline_mode<synchronous>, transform_indices = @transform_4, window_bounds = array<i64: 1, 128>}, {transform_indices = @transform_5, window_bounds = array<i64: 1>}, {transform_indices = @transform_6, window_bounds = array<i64: 1, 8, 128>}, {transform_indices = @transform_7, window_bounds = array<i64: 1, 8, 256>}]} {
    %c0_i32 = arith.constant 0 : i32
    %0 = arith.cmpi eq, %arg1, %c0_i32 : i32
    %1 = arith.extui %0 : i1 to i32
    %c0_i32_0 = arith.constant 0 : i32
    %2 = arith.cmpi ne, %1, %c0_i32_0 : i32
    scf.if %2 {
      %c0_29 = arith.constant 0 : index
      %c0_30 = arith.constant 0 : index
      %c0_31 = arith.constant 0 : index
      %54 = vector.load %arg3[%c0_29, %c0_30, %c0_31] : memref<1x8x64xbf16, #tpu.memory_space<vmem>>, vector<1x8x64xbf16>
      %55 = vector.shape_cast %54 : vector<1x8x64xbf16> to vector<8x64xbf16>
      %c0_32 = arith.constant 0 : index
      %c0_33 = arith.constant 0 : index
      %56 = vector.load %arg5[%c0_32, %c0_33] : memref<64x128xbf16, #tpu.memory_space<vmem>>, vector<64x128xbf16>
      %cst_34 = arith.constant dense<0.000000e+00> : vector<8x128xf32>
      %57 = tpu.matmul %55, %56, %cst_34 {dimension_numbers = #tpu.dot_dimension_numbers<[1], [0], [0], [1], [0, 0, 1, 1], [], []>} : vector<8x64xbf16>, vector<64x128xbf16>, vector<8x128xf32> -> vector<8x128xf32>
      %c0_35 = arith.constant 0 : index
      %c0_36 = arith.constant 0 : index
      %58 = vector.load %arg10[%c0_35, %c0_36] : memref<8x128xf32, #tpu.memory_space<vmem>>, vector<8x128xf32>
      tpu.vector_store %arg10[%c0_35, %c0_36], %57 {strides = array<i32>} : memref<8x128xf32, #tpu.memory_space<vmem>>, vector<8x128xf32>,
      %cst_37 = arith.constant 0xFF800000 : f32
      %59 = vector.broadcast %cst_37 : f32 to vector<8x1xf32>
      %c0_38 = arith.constant 0 : index
      %c0_39 = arith.constant 0 : index
      %60 = vector.load %arg11[%c0_38, %c0_39] : memref<8x1xf32, #tpu.memory_space<vmem>>, vector<8x1xf32>
      tpu.vector_store %arg11[%c0_38, %c0_39], %59 {strides = array<i32>} : memref<8x1xf32, #tpu.memory_space<vmem>>, vector<8x1xf32>,
      %cst_40 = arith.constant 0.000000e+00 : f32
      %61 = vector.broadcast %cst_40 : f32 to vector<8x1xf32>
      %c0_41 = arith.constant 0 : index
      %c0_42 = arith.constant 0 : index
      %62 = vector.load %arg12[%c0_41, %c0_42] : memref<8x1xf32, #tpu.memory_space<vmem>>, vector<8x1xf32>
      tpu.vector_store %arg12[%c0_41, %c0_42], %61 {strides = array<i32>} : memref<8x1xf32, #tpu.memory_space<vmem>>, vector<8x1xf32>,
      %cst_43 = arith.constant 0.000000e+00 : f32
      %63 = vector.broadcast %cst_43 : f32 to vector<8x128xf32>
      %c0_44 = arith.constant 0 : index
      %c0_45 = arith.constant 0 : index
      %64 = vector.load %arg13[%c0_44, %c0_45] : memref<8x128xf32, #tpu.memory_space<vmem>>, vector<8x128xf32>
      tpu.vector_store %arg13[%c0_44, %c0_45], %63 {strides = array<i32>} : memref<8x128xf32, #tpu.memory_space<vmem>>, vector<8x128xf32>,
    } else {
    }
    %c0 = arith.constant 0 : index
    %c0_1 = arith.constant 0 : index
    %c0_2 = arith.constant 0 : index
    %3 = vector.load %arg2[%c0, %c0_1, %c0_2] : memref<1x128x128xbf16, #tpu.memory_space<vmem>>, vector<1x128x128xbf16>
    %4 = vector.shape_cast %3 : vector<1x128x128xbf16> to vector<128x128xbf16>
    %c0_3 = arith.constant 0 : index
    %c0_4 = arith.constant 0 : index
    %5 = vector.load %arg4[%c0_3, %c0_4] : memref<128x128xbf16, #tpu.memory_space<vmem>>, vector<128x128xbf16>
    %cst = arith.constant dense<0.000000e+00> : vector<128x128xf32>
    %6 = tpu.matmul %4, %5, %cst {dimension_numbers = #tpu.dot_dimension_numbers<[1], [0], [0], [1], [0, 0, 1, 1], [], []>} : vector<128x128xbf16>, vector<128x128xbf16>, vector<128x128xf32> -> vector<128x128xf32>
    %7 = vector.shape_cast %6 : vector<128x128xf32> to vector<1x128x128xf32>
    %c0_5 = arith.constant 0 : index
    %c0_6 = arith.constant 0 : index
    %8 = vector.load %arg10[%c0_5, %c0_6] : memref<8x128xf32, #tpu.memory_space<vmem>>, vector<8x128xf32>
    %9 = vector.shape_cast %8 : vector<8x128xf32> to vector<8x1x128xf32>
    %10 = vector.broadcast %7 : vector<1x128x128xf32> to vector<8x128x128xf32>
    %11 = vector.broadcast %9 : vector<8x1x128xf32> to vector<8x128x128xf32>
    %12 = arith.mulf %10, %11 : vector<8x128x128xf32>
    %13 = math.tanh %12 : vector<8x128x128xf32>
    %c0_7 = arith.constant 0 : index
    %c0_8 = arith.constant 0 : index
    %14 = vector.load %arg6[%c0_7, %c0_8] : memref<1x128xf32, #tpu.memory_space<vmem>>, vector<1x128xf32>
    %15 = vector.shape_cast %14 : vector<1x128xf32> to vector<1x1x128xf32>
    %16 = vector.broadcast %15 : vector<1x1x128xf32> to vector<8x128x128xf32>
    %17 = arith.mulf %13, %16 : vector<8x128x128xf32>
    %cst_9 = arith.constant dense<0.000000e+00> : vector<8x128xf32>
    %18 = vector.multi_reduction <add>, %17, %cst_9 [2] : vector<8x128x128xf32> to vector<8x128xf32>
    %c0_10 = arith.constant 0 : index
    %19 = memref.load %arg7[%c0_10] : memref<1xf32, #tpu.memory_space<smem>>
    %20 = vector.broadcast %19 : f32 to vector<8x128xf32>
    %21 = arith.addf %18, %20 : vector<8x128xf32>
    %c128_i32 = arith.constant 128 : i32
    %22 = arith.muli %arg1, %c128_i32 : i32
    %23 = tpu.assume_multiple %22, 128 : i32
    %c0_11 = arith.constant 0 : index
    %c0_12 = arith.constant 0 : index
    %24 = arith.index_cast %23 : i32 to index
    %25 = vector.load %arg9[%c0_11, %c0_12, %24] : memref<1x8x256xf32, #tpu.memory_space<vmem>>, vector<1x8x128xf32>
    %26 = vector.shape_cast %25 : vector<1x8x128xf32> to vector<8x128xf32>
    %27 = vector.shape_cast %21 : vector<8x128xf32> to vector<1x8x128xf32>
    tpu.vector_store %arg9[%c0_11, %c0_12, %24], %27 {strides = array<i32>} : memref<1x8x256xf32, #tpu.memory_space<vmem>>, vector<1x8x128xf32>,
    %c0_13 = arith.constant 0 : index
    %c0_14 = arith.constant 0 : index
    %28 = vector.load %arg11[%c0_13, %c0_14] : memref<8x1xf32, #tpu.memory_space<vmem>>, vector<8x1xf32>
    %cst_15 = arith.constant dense<0xFF800000> : vector<8xf32>
    %29 = vector.multi_reduction <maximumf>, %21, %cst_15 [1] : vector<8x128xf32> to vector<8xf32>
    %30 = vector.shape_cast %29 : vector<8xf32> to vector<8x1xf32>
    %31 = arith.maximumf %28, %30 : vector<8x1xf32>
    %32 = arith.subf %28, %31 : vector<8x1xf32>
    %33 = math.exp %32 : vector<8x1xf32>
    %34 = vector.broadcast %31 : vector<8x1xf32> to vector<8x128xf32>
    %35 = arith.subf %21, %34 : vector<8x128xf32>
    %36 = math.exp %35 : vector<8x128xf32>
    %c0_16 = arith.constant 0 : index
    %c0_17 = arith.constant 0 : index
    %37 = vector.load %arg12[%c0_16, %c0_17] : memref<8x1xf32, #tpu.memory_space<vmem>>, vector<8x1xf32>
    %38 = arith.mulf %33, %37 : vector<8x1xf32>
    %cst_18 = arith.constant dense<0.000000e+00> : vector<8xf32>
    %39 = vector.multi_reduction <add>, %36, %cst_18 [1] : vector<8x128xf32> to vector<8xf32>
    %40 = vector.shape_cast %39 : vector<8xf32> to vector<8x1xf32>
    %41 = arith.addf %38, %40 : vector<8x1xf32>
    %c0_19 = arith.constant 0 : index
    %c0_20 = arith.constant 0 : index
    %42 = vector.load %arg12[%c0_19, %c0_20] : memref<8x1xf32, #tpu.memory_space<vmem>>, vector<8x1xf32>
    tpu.vector_store %arg12[%c0_19, %c0_20], %41 {strides = array<i32>} : memref<8x1xf32, #tpu.memory_space<vmem>>, vector<8x1xf32>,
    %c0_21 = arith.constant 0 : index
    %c0_22 = arith.constant 0 : index
    %43 = vector.load %arg13[%c0_21, %c0_22] : memref<8x128xf32, #tpu.memory_space<vmem>>, vector<8x128xf32>
    %44 = vector.broadcast %33 : vector<8x1xf32> to vector<8x128xf32>
    %45 = arith.mulf %44, %43 : vector<8x128xf32>
    %46 = arith.truncf %36 : vector<8x128xf32> to vector<8x128xbf16>
    %cst_23 = arith.constant dense<0.000000e+00> : vector<8x128xf32>
    %47 = tpu.matmul %46, %4, %cst_23 {dimension_numbers = #tpu.dot_dimension_numbers<[1], [0], [0], [1], [0, 0, 1, 1], [], []>} : vector<8x128xbf16>, vector<128x128xbf16>, vector<8x128xf32> -> vector<8x128xf32>
    %48 = arith.addf %45, %47 : vector<8x128xf32>
    %c0_24 = arith.constant 0 : index
    %c0_25 = arith.constant 0 : index
    %49 = vector.load %arg13[%c0_24, %c0_25] : memref<8x128xf32, #tpu.memory_space<vmem>>, vector<8x128xf32>
    tpu.vector_store %arg13[%c0_24, %c0_25], %48 {strides = array<i32>} : memref<8x128xf32, #tpu.memory_space<vmem>>, vector<8x128xf32>,
    %c0_26 = arith.constant 0 : index
    %c0_27 = arith.constant 0 : index
    %50 = vector.load %arg11[%c0_26, %c0_27] : memref<8x1xf32, #tpu.memory_space<vmem>>, vector<8x1xf32>
    tpu.vector_store %arg11[%c0_26, %c0_27], %31 {strides = array<i32>} : memref<8x1xf32, #tpu.memory_space<vmem>>, vector<8x1xf32>,
    %c1_i32 = arith.constant 1 : i32
    %51 = arith.cmpi eq, %arg1, %c1_i32 : i32
    %52 = arith.extui %51 : i1 to i32
    %c0_i32_28 = arith.constant 0 : i32
    %53 = arith.cmpi ne, %52, %c0_i32_28 : i32
    scf.if %53 {
      %c0_29 = arith.constant 0 : index
      %c0_30 = arith.constant 0 : index
      %54 = vector.load %arg12[%c0_29, %c0_30] : memref<8x1xf32, #tpu.memory_space<vmem>>, vector<8x1xf32>
      %cst_31 = arith.constant 1.000000e+00 : f32
      %55 = vector.broadcast %cst_31 : f32 to vector<8x1xf32>
      %56 = arith.divf %55, %54 : vector<8x1xf32>
      %c0_32 = arith.constant 0 : index
      %c0_33 = arith.constant 0 : index
      %c0_34 = arith.constant 0 : index
      %57 = vector.load %arg9[%c0_32, %c0_33, %c0_34] : memref<1x8x256xf32, #tpu.memory_space<vmem>>, vector<1x8x256xf32>
      %58 = vector.shape_cast %57 : vector<1x8x256xf32> to vector<8x256xf32>
      %c0_35 = arith.constant 0 : index
      %c0_36 = arith.constant 0 : index
      %59 = vector.load %arg11[%c0_35, %c0_36] : memref<8x1xf32, #tpu.memory_space<vmem>>, vector<8x1xf32>
      %60 = vector.broadcast %59 : vector<8x1xf32> to vector<8x256xf32>
      %61 = arith.subf %58, %60 : vector<8x256xf32>
      %62 = math.exp %61 : vector<8x256xf32>
      %63 = vector.broadcast %56 : vector<8x1xf32> to vector<8x256xf32>
      %64 = arith.mulf %62, %63 : vector<8x256xf32>
      %c0_37 = arith.constant 0 : index
      %c0_38 = arith.constant 0 : index
      %c0_39 = arith.constant 0 : index
      %65 = vector.load %arg9[%c0_37, %c0_38, %c0_39] : memref<1x8x256xf32, #tpu.memory_space<vmem>>, vector<1x8x256xf32>
      %66 = vector.shape_cast %65 : vector<1x8x256xf32> to vector<8x256xf32>
      %67 = vector.shape_cast %64 : vector<8x256xf32> to vector<1x8x256xf32>
      tpu.vector_store %arg9[%c0_37, %c0_38, %c0_39], %67 {strides = array<i32>} : memref<1x8x256xf32, #tpu.memory_space<vmem>>, vector<1x8x256xf32>,
      %c0_40 = arith.constant 0 : index
      %c0_41 = arith.constant 0 : index
      %68 = vector.load %arg13[%c0_40, %c0_41] : memref<8x128xf32, #tpu.memory_space<vmem>>, vector<8x128xf32>
      %69 = vector.broadcast %56 : vector<8x1xf32> to vector<8x128xf32>
      %70 = arith.mulf %68, %69 : vector<8x128xf32>
      %c0_42 = arith.constant 0 : index
      %c0_43 = arith.constant 0 : index
      %c0_44 = arith.constant 0 : index
      %71 = vector.load %arg8[%c0_42, %c0_43, %c0_44] : memref<1x8x128xf32, #tpu.memory_space<vmem>>, vector<1x8x128xf32>
      %72 = vector.shape_cast %71 : vector<1x8x128xf32> to vector<8x128xf32>
      %73 = vector.shape_cast %70 : vector<8x128xf32> to vector<1x8x128xf32>
      tpu.vector_store %arg8[%c0_42, %c0_43, %c0_44], %73 {strides = array<i32>} : memref<1x8x128xf32, #tpu.memory_space<vmem>>, vector<1x8x128xf32>,
    } else {
    }
    return
  }
  func.func @transform_0(%arg0: i32, %arg1: i32) -> (i32, i32, i32) {
    %c0_i32 = arith.constant 0 : i32
    %c0_i32_0 = arith.constant 0 : i32
    return %arg0, %arg1, %c0_i32 : i32, i32, i32
  }
  func.func @transform_1(%arg0: i32, %arg1: i32) -> (i32, i32, i32) {
    %c0_i32 = arith.constant 0 : i32
    %c0_i32_0 = arith.constant 0 : i32
    %c0_i32_1 = arith.constant 0 : i32
    return %arg0, %c0_i32, %c0_i32_0 : i32, i32, i32
  }
  func.func @transform_2(%arg0: i32, %arg1: i32) -> (i32, i32) {
    %c0_i32 = arith.constant 0 : i32
    %c0_i32_0 = arith.constant 0 : i32
    %c0_i32_1 = arith.constant 0 : i32
    return %c0_i32, %c0_i32_0 : i32, i32
  }
  func.func @transform_3(%arg0: i32, %arg1: i32) -> (i32, i32) {
    %c0_i32 = arith.constant 0 : i32
    %c0_i32_0 = arith.constant 0 : i32
    %c0_i32_1 = arith.constant 0 : i32
    return %c0_i32, %c0_i32_0 : i32, i32
  }
  func.func @transform_4(%arg0: i32, %arg1: i32) -> (i32, i32) {
    %c0_i32 = arith.constant 0 : i32
    %c0_i32_0 = arith.constant 0 : i32
    %c0_i32_1 = arith.constant 0 : i32
    return %c0_i32, %c0_i32_0 : i32, i32
  }
  func.func @transform_5(%arg0: i32, %arg1: i32) -> i32 {
    %c0_i32 = arith.constant 0 : i32
    %c0_i32_0 = arith.constant 0 : i32
    return %c0_i32 : i32
  }
  func.func @transform_6(%arg0: i32, %arg1: i32) -> (i32, i32, i32) {
    %c0_i32 = arith.constant 0 : i32
    %c0_i32_0 = arith.constant 0 : i32
    %c0_i32_1 = arith.constant 0 : i32
    return %arg0, %c0_i32, %c0_i32_0 : i32, i32, i32
  }
  func.func @transform_7(%arg0: i32, %arg1: i32) -> (i32, i32, i32) {
    %c0_i32 = arith.constant 0 : i32
    %c0_i32_0 = arith.constant 0 : i32
    %c0_i32_1 = arith.constant 0 : i32
    return %arg0, %c0_i32, %c0_i32_0 : i32, i32, i32
  }
}

</mosaic_0001>

<bundles_post_ra>
// kernel: tpu_custom_call.1
= control target key start
LH: loop header
LB: loop body
LE: loop exit
PB: predicated region body
PF: predicated region fallthrough
CT: control target
= control target key end

     0   :  { %s11031_s0 = inlined_call_operand.hbm [shape: bf16[2,256,128], index: 0, kind: input, shape index: {}]   ;;  %s11032_s1 = inlined_call_operand.hbm [shape: bf16[2,8,64], index: 1, kind: input, shape index: {}]   ;;  %s11033_s2 = inlined_call_operand.hbm [shape: bf16[128,128], index: 2, kind: input, shape index: {}]   ;;  %s11034_s3 = inlined_call_operand.hbm [shape: bf16[64,128], index: 3, kind: input, shape index: {}]   ;;  %s11035_s4 = inlined_call_operand.vmem [shape: f32[1,128], index: 4, kind: input, shape index: {}]   ;;  %s11036_s5 = inlined_call_operand.<no memory space> [shape: f32[1], index: 5, kind: input, shape index: {}]   ;;  %s11037_s6 = inlined_call_operand.hbm [shape: f32[2,8,128], index: 6, kind: output, shape index: {0}]   ;;  %s11038_s7 = inlined_call_operand.hbm [shape: f32[2,8,256], index: 7, kind: output, shape index: {1}]  }
   0x1   :  { %11258 = sst [smem:[#allocation212_spill]] %s11031_s0 }
   0x2   :  { %11259 = sst [smem:[#allocation213_spill]] %s11032_s1 }
   0x3   :  { %11260 = sst [smem:[#allocation214_spill]] %s11033_s2 }
   0x4   :  { %11261 = sst [smem:[#allocation215_spill]] %s11034_s3 }
   0x5   :  { %11262 = sst [smem:[#allocation216_spill]] %s11035_s4 }
   0x6   :  { %11263 = sst [smem:[#allocation217_spill]] %s11037_s6 }
   0x7   :  { %11264 = sst [smem:[#allocation218_spill]] %s11038_s7 }
   0x8   :  { %13 = sst [smem:[#allocation6]] %s11036_s5 }
   0x9   :  { %14 = vsyncpa [#allocation8], 0 }
   0xa   :  { %16 = vsyncpa [#allocation8 + $0x1], 0 }
   0xb   :  { %17 = vsyncpa [#allocation11], 0 }
   0xc   :  { %19 = vsyncpa [#allocation11 + $0x1], 0 }
   0xd   :  { %20 = vsyncpa [#allocation14], 0 }
   0xe   :  { %21 = vsyncpa [#allocation9], 0 }
   0xf   :  { %23 = vsyncpa [#allocation9 + $0x1], 0 }
  0x10   :  { %24 = vsyncpa [#allocation17], 0 }
  0x11   :  { %26 = vsyncpa [#allocation17 + $0x1], 0  ;;  %s6710_s26 = smov 0   ;;  %s6712_s27 = smov 0  }
  0x12   :  { %s6714_s28 = smov 0   ;;  %s6716_s29 = smov 0  }
  0x13   :  { %s6718_s30 = smov 0   ;;  %s6720_s5 = smov 0  }
  0x14   :  { %s6722_s8 = smov 0   ;;  %s6724_s9 = smov 0  }
  0x15   :  { %s6726_s10 = smov 0   ;;  %s6728_s11 = smov 0  }
  0x16   :  { %s6730_s12 = smov 0  }
  0x17 LB: > { %11265 = sst [smem:[#allocation24_spill]] %s6637_s9  ;;  %s6764_s13 = sadd.s32 4294967295, %s6649_s12   ;;  %s6649_s12 = sphi %s6730_s12, %s32_s12   ;;  %s6645_s11 = sphi %s6728_s11, %s12185_s11   ;;  %s6641_s10 = sphi %s6726_s10, %s12184_s10   ;;  %s6637_s9 = sphi %s6724_s9, %s12183_s9   ;;  %s6633_s8 = sphi %s6722_s8, %s12182_s8   ;;  %s6629_s5 = sphi %s6720_s5, %s12181_s5   ;;  %s6625_s30 = sphi %s6718_s30, %s12180_s30   ;;  %s6621_s29 = sphi %s6716_s29, %s12179_s29   ;;  %s6617_s28 = sphi %s6714_s28, %s12178_s28   ;;  %s6613_s27 = sphi %s6712_s27, %s12177_s27   ;;  %s6609_s26 = sphi %s6710_s26, %s12176_s26  }
  0x18   : > { %p66_p0 = scmp.ne.s32.totalorder %s6625_s30, %s6621_s29  ;;  %p11048_p1 = scmp.eq.s32.totalorder %s6764_s13, 0 }
  0x19   : > { %p5538_p3 = scmp.ge.s32.totalorder %s6649_s12, 1  ;;  %p239_p4 = scmp.lt.s32.totalorder %s6649_s12, 5 }
  0x1a   : > { %p6773_p5 = por %p11048_p1, %p66_p0  ;;  %s6651_s16 = smov [#allocation12]  }
  0x1b   : > { %p6777_p6 = pnand %p5538_p3, %p239_p4  ;;  %s251_s17 = sshll.u32 %s6651_s16, 4  ;;  %s252_s17 = int_to_ptr.vmem [resolvable:$true] %s251_s17 }
  0x1c   : > { %s6652_s19 = smov [#allocation13]   ;;  %s6390_s21 = scalar_lea.vmem %s252_s17, 1024 }
  0x1d   : > { %p5699_p7 = pneg %p6777_p6  ;;  %s264_s20 = sshll.u32 %s6652_s19, 4  ;;  %s265_s20 = int_to_ptr.vmem [resolvable:$true] %s264_s20 }
  0x1e   : > { %p6391_p10 = scmp.ne.s32.totalorder %s252_s17, %s6390_s21  ;;  %p6398_p13 = scmp.lt.s32.totalorder %s252_s17, %s252_s17 }
  0x1f   : > { %p6785_p8 = pnand %p5699_p7, %p11048_p1  ;;  %p6399_p0 = scmp.lt.s32.totalorder %s6390_s21, %s6390_s21 }
  0x21   : > { %p6381_p9 = pneg %p6785_p8  ;;  %p6400_p3 = por %p6399_p0, %p6398_p13 }
  0x23   : > { %p6393_p11 = pnand %p6391_p10, %p6381_p9 }
  0x25   : > { %p6394_p12 = pneg %p6393_p11 }
  0x27   : > { %p6401_p4 = pnand %p6400_p3, %p6394_p12 }
  0x29   : > { %6404 = shalt.err (!%p6401_p4)
}
  0x2a   : > { %s11039_s22 = smov 64   ;;  %s11040_s23 = smov 4  }
  0x2b   : > { %s11269_s2 = sld [smem:[#allocation214_spill]]  ;;  %s6416_s29 = scalar_lea.vmem %s265_s20, 512 }
  0x2c   : > { %p6417_p7 = scmp.ne.s32.totalorder %s265_s20, %s6416_s29  ;;  %p6424_p12 = scmp.lt.s32.totalorder %s265_s20, %s265_s20 }
  0x2d   : > { %p6425_p13 = scmp.lt.s32.totalorder %s6416_s29, %s6416_s29 }
  0x2e   : > { %p6419_p10 = pnand %p6417_p7, %p6381_p9 }
  0x2f   : > { %p6426_p0 = por %p6425_p13, %p6424_p12 }
  0x30   : > { %p6420_p11 = pneg %p6419_p10 }
  0x31   : > { %5702 = dma.hbm_to_vmem [thread:$0]  (!%p6785_p8), %s11269_s2, 1024, %s252_s17, [#allocation11], %s11039_s22, %s11039_s22, %s11040_s23  }
  0x32   : > { %p6427_p3 = pnand %p6426_p0, %p6420_p11 }
  0x34   : > { %6430 = shalt.err (!%p6427_p3)
}
  0x35   : > { %s11270_s3 = sld [smem:[#allocation215_spill]]  ;;  %s41_s17 = sadd.s32 1, %s6641_s10 }
  0x36   : > { %p42_p9 = scmp.ge.s32.totalorder %s41_s17, 2  ;;  %s44_s18 = sadd.s32 1, %s6645_s11 }
  0x37   : > { %s53_s21 = sadd.s32 1, %s6629_s5  ;;  %p60_p4 = scmp.ne.s32.totalorder %s6629_s5, %s6625_s30 }
  0x38   : > { %s12187_s17 = smov (%p42_p9, %s41_s17), 0  ;;  %s12189_s18 = smov (!%p42_p9, %s44_s18), %s6645_s11 }
  0x39   : > { %11271 = sst [smem:[#allocation25_spill]] %s12187_s17  ;;  %s49_s24 = ssub.s32 %s6641_s10, %s12187_s17 }
  0x3a   : > { %p61_p7 = scmp.eq.s32.totalorder %s6649_s12, 0  ;;  %p46_p10 = scmp.ge.s32.totalorder %s12189_s18, 2 }
  0x3b   : > { %5705 = dma.hbm_to_vmem [thread:$0]  (!%p6785_p8), %s11270_s3, 512, %s265_s20, [#allocation14], %s11039_s22, %s11039_s22, %s11040_s23  }
  0x3c   : > { %p11047_p11 = scmp.lt.s32.totalorder %s6649_s12, 4  ;;  %p6827_p12 = por %p61_p7, %p60_p4 }
  0x3d   : > { %s284_s25 = sand.u32 1, %s6629_s5   ;;  %s12191_s18 = smov (%p46_p10, %s12189_s18), 0 }
  0x3e   : > { %11273 = sst [smem:[#allocation26_spill]] %s12191_s18  ;;  %s5542_s29 = sshll.u32 %s284_s25, 6 }
  0x3f   : > { %s6836_s16 = ssub.s32 %s6645_s11, %s12191_s18  ;;  %s5543_s22 = sshll.u32 %s6641_s10, 4 }
  0x40   : > { %s50_s19 = sor.u32 %s49_s24, %s6836_s16  ;;  %p77_p8 = scmp.eq.s32.totalorder %s6836_s16, 0 }
  0x41   : > { %p51_p13 = scmp.eq.s32.totalorder %s50_s19, 0  ;;  %s5544_s23 = sshll.u32 %s6645_s11, 5 }
  0x42   : > { %s288_s2 = scalar_lea.vmem [#allocation7], %s5542_s29  ;;  %s294_s7 = sadd.s32 %s5544_s23, %s5543_s22 }
  0x43   : > { %s297_s3 = sshll.u32 %s288_s2, 4  ;;  %s5545_s6 = sshll.u32 %s294_s7, 6  ;;  %s298_s3 = int_to_ptr.vmem [resolvable:$true] %s297_s3 }
  0x44   : > { %s6843_s17 = scalar_select %p51_p13, %s6629_s5, %s53_s21  }
  0x45   : > { %p6849_p0 = pnand %p11047_p11, %p6827_p12  ;;  %s11275_s0 = sld [smem:[#allocation212_spill]] }
  0x46   : > { %s285_s19 = scalar_lea.sflag [#allocation8], %s284_s25  ;;  %s6444_s2 = scalar_lea.vmem %s298_s3, 1024 }
  0x47   : > { %p6433_p3 = pneg %p6849_p0  ;;  %p6445_p9 = scmp.ne.s32.totalorder %s298_s3, %s6444_s2 }
  0x48   : > { %s6655_s22 = smov [#allocation7]  }
  0x49   : > { %p6447_p4 = pnand %p6445_p9, %p6433_p3  ;;  %s6449_s7 = sshll.u32 %s6655_s22, 4  ;;  %s6450_s7 = int_to_ptr.vmem [resolvable:$false] %s6449_s7 }
  0x4a   : > { %s6451_s23 = scalar_lea.vmem %s6450_s7, 2048  ;;  %p6452_p12 = scmp.lt.s32.totalorder %s298_s3, %s6450_s7 }
  0x4b   : > { %s296_s24 = scalar_lea.hbm %s11275_s0, %s5545_s6  ;;  %p6448_p10 = pneg %p6447_p4 }
  0x4c   : > { %p6453_p13 = scmp.lt.s32.totalorder %s6451_s23, %s6444_s2 }
  0x4e   : > { %p6454_p11 = por %p6453_p13, %p6452_p12 }
  0x50   : > { %p6455_p2 = pnand %p6454_p11, %p6448_p10 }
  0x52   : > { %6458 = shalt.err (!%p6455_p2)
}
  0x53   : > { %s11276_s4 = smov 4   ;;  %s11277_s6 = smov 64  }
  0x54   : > { %5709 = dma.hbm_to_vmem [thread:$0]  (!%p6849_p0), %s296_s24, 1024, %s298_s3, %s285_s19, %s11277_s6, %s11277_s6, %s11276_s4  }
  0x55   : > { %s5537_s18 = sadd.s32 4294967294, %s6649_s12   ;;  %s79_s9 = sadd.s32 1, %s6617_s28 }
  0x56   : > { %s6868_s21 = scalar_select %p77_p8, %s6617_s28, %s79_s9  }
  0x57   : > { %p86_p2 = scmp.ne.s32.totalorder %s6617_s28, %s6613_s27  ;;  %p92_p11 = scmp.ne.s32.totalorder %s6613_s27, %s6609_s26 }
  0x58   : > { %p206_p3 = scmp.eq.s32.totalorder %s5537_s18, 3  ;;  %s307_s20 = sand.u32 1, %s6649_s12  }
  0x59   : > { %p88_p9 = por %p86_p2, %p61_p7  ;;  %p6879_p4 = por %p92_p11, %p11048_p1 }
  0x5a   : > { %p11279_p10 = scmp.eq.s32.totalorder %s6764_s13, 3  ;;  %p6889_p0 = por %p206_p3, %p92_p11 }
  0x5b   : > { %s309_s16 = sand.u32 1, %s6617_s28   ;;  %s5547_s19 = sshll.u32 %s6645_s11, 6 }
  0x5c   : > { %p6885_p12 = por %p11279_p10, %p86_p2  ;;  %s5546_s24 = sshll.u32 %s309_s16, 2 }
  0x5d   : > { %s11281_s29 = scalar_select %p6889_p0, 1, 0 }
  0x5e   : > { %s11282_s1 = sld [smem:[#allocation213_spill]]  ;;  %s311_s23 = scalar_lea.vmem [#allocation10], %s5546_s24 }
  0x5f   : > { %s318_s4 = sshll.u32 %s311_s23, 4  ;;  %p11283_p7 = scmp.lt.s32.totalorder %s6649_s12, 4  ;;  %s319_s4 = int_to_ptr.vmem [resolvable:$true] %s318_s4 }
  0x60   : > { %s308_s18 = scalar_lea.sflag [#allocation11], %s307_s20  ;;  %s6472_s9 = scalar_lea.vmem %s319_s4, 64 }
  0x61   : > { %p6900_p8 = pnand %p11283_p7, %p88_p9  ;;  %p6473_p2 = scmp.ne.s32.totalorder %s319_s4, %s6472_s9 }
  0x62   : > { %s6656_s16 = smov [#allocation10]  }
  0x63   : > { %p6461_p13 = pneg %p6900_p8  ;;  %s6477_s0 = sshll.u32 %s6656_s16, 4  ;;  %s6478_s0 = int_to_ptr.vmem [resolvable:$false] %s6477_s0 }
  0x64   : > { %s316_s7 = scalar_lea.hbm %s11282_s1, %s5547_s19  ;;  %s6479_s19 = scalar_lea.vmem %s6478_s0, 128 }
  0x65   : > { %p6475_p11 = pnand %p6473_p2, %p6461_p13  ;;  %p6480_p10 = scmp.lt.s32.totalorder %s319_s4, %s6478_s0 }
  0x66   : > { %p6481_p1 = scmp.lt.s32.totalorder %s6479_s19, %s6472_s9 }
  0x67   : > { %p6476_p3 = pneg %p6475_p11 }
  0x68   : > { %p6482_p0 = por %p6481_p1, %p6480_p10 }
  0x6a   : > { %p6483_p9 = pnand %p6482_p0, %p6476_p3 }
  0x6c   : > { %6486 = shalt.err (!%p6483_p9)
}
  0x6d   : > { %5712 = dma.hbm_to_vmem [thread:$0]  (!%p6900_p8), %s316_s7, 64, %s319_s4, %s308_s18  }
  0x6e   : > { %327 = sbr.rel (%p6777_p6) target bundleno = 2379 (0x94b), region = 44 }
  0x73   : > { %s329_s20 = sand.u32 1, %s6625_s30  }
  0x74   : > { %s5549_s24 = sshll.u32 %s329_s20, 6  ;;  %s330_s2 = scalar_lea.sflag [#allocation8], %s329_s20 }
  0x75   : > { %s6911_s22 = scalar_lea.vmem [#allocation7], %s5549_s24 }
  0x76   : > { %6584 = dma.done.wait (%p6773_p5), %s330_s2, 1024  }
  0x77   : > { %6586 = vsyncadd (%p6773_p5), %s330_s2, 4294966272  ;;  %s338_s0 = sand.u32 1, %s6764_s13   ;;  %s6919_s7 = sand.u32 1, %s6613_s27  }
  0x78   : > { %s5550_s15 = sshll.u32 %s6919_s7, 2  ;;  %s339_s23 = scalar_lea.sflag [#allocation11], %s338_s0 }
  0x79   : > { %s6922_s4 = scalar_lea.vmem [#allocation10], %s5550_s15 }
  0x7a   : > { %6588 = dma.done.wait (%p6879_p4), %s339_s23, 64  }
  0x7b   : > { %6590 = vsyncadd (%p6879_p4), %s339_s23, 4294967232  ;;  %p11285_p1 = scmp.eq.s32.totalorder %s6764_s13, 0 }
  0x7d   : > { %6592 = dma.done.wait (%p11285_p1), [#allocation11], 1024   ;;  %p11286_p5 = pmov %p11285_p1 }
  0x7e   : > { %p11287_p6 = pmov %p11285_p1 }
  0x7f   : > { %6594 = vsyncadd (%p11286_p5), [#allocation11], 4294966272 }
  0x80   : > { %6596 = dma.done.wait (%p11287_p6), [#allocation14], 512   ;;  %p11288_p0 = pmov %p11285_p1 }
  0x81   : > { %s5553_s14 = sshll.u32 %s6919_s7, 3  ;;  %s5554_s6 = sshll.u32 %s6919_s7, 4 }
  0x82   : > { %6598 = vsyncadd (%p11288_p0), [#allocation14], 4294966784  ;;  %s6938_s18 = scalar_lea.vmem [#allocation15], %s5553_s14  ;;  %s6940_s25 = scalar_lea.vmem [#allocation16], %s5554_s6 }
  0x83   : > { %p5555_p4 = scmp.ne.s32.totalorder %s6633_s8, 0 }
  0x85   : > { %396 = sbr.rel (%p5555_p4) target bundleno = 354 (0x162), region = 64 }
  0x8a   : > { %vm475_vm0 = vcmask 7168   ;;  %v5826_v0 = vld [vmem:[#allocation13 + $0x18] sm:$0xff]   ;;  %v6657_v1 = vmov 0.0   ;;  %v6658_v2 = vmov -inf   ;;  %v5827_v3 = vld [vmem:[#allocation13 + $0x10] sm:$0xff]   ;;  %vm6659_vm1 = vmmov 0  }
  0x8b   : > { %5619 = vmatprep.subr.bf16.mxu0 %v6657_v1  ;;  %476 = vst.msk [vmem:[#allocation3] sm:$0xff] %vm475_vm0, %v6658_v2  ;;  %477 = vst.msk [vmem:[#allocation4] sm:$0xff] %vm475_vm0, %v6657_v1  ;;  %5627 = vmatprep.mubr.msk.bf16.mxu0 %vm6659_vm1, %v6657_v1  ;;  %v5828_v4 = vld [vmem:[#allocation13 + $0x8] sm:$0xff]   ;;  %v5829_v5 = vld [vmem:[#allocation13] sm:$0xff]   ;;  %vm430_vm2 = vcmask 523264  }
  0x8c   : > { %478 = vst [vmem:[#allocation5] sm:$0xff] %v6657_v1  ;;  %5620 = vmatpush3.bf16.msra.mxu0 %v5826_v0  ;;  %v397_v6 = vld [vmem:[%s6922_s4] sm:$0xf] }
  0x8d   : > { %5621 = vmatprep.subr.bf16.mxu0 %v6657_v1 }
  0x90   : > { %5622 = vmatpush3.bf16.msra.mxu0 %v5827_v3 }
  0x91   : > { %5623 = vmatprep.subr.bf16.mxu0 %v6657_v1 }
  0x94   : > { %5624 = vmatpush3.bf16.msra.mxu0 %v5828_v4 }
  0x95   : > { %5625 = vmatprep.subr.bf16.mxu0 %v6657_v1 }
  0x98   : > { %5626 = vmatpush3.bf16.msra.mxu0 %v5829_v5 }
  0x9b   : > { %5628 = vmatmul.mubr.msk.bf16.vlgmr.msra.gmra.mxu0 %vm430_vm2, %v397_v6 }
 0x15b   : > { %v468_v7 = vpop.f32.mrf.mxu0 }
 0x15c   : > { %474 = vst [vmem:[#allocation2] sm:$0xff] %v468_v7 }
 0x15d   : > { %v5629_v8 = vpop.f32.mrf.mxu0 }
 0x15f   : > { %v471_v9 = vpop.f32.mrf.mxu0 }
 0x161   : > { %v5630_v10 = vpop.f32.mrf.mxu0 }
 0x162 PF: > { %v5832_v11 = vld [vmem:[#allocation12 + $0x38] sm:$0xff]   ;;  %v5833_v12 = vld [vmem:[#allocation12 + $0x30] sm:$0xff]   ;;  %v5834_v13 = vld [vmem:[#allocation12 + $0x28] sm:$0xff]   ;;  %v6660_v27 = vmov 1966171168   ;;  %v11049_v29 = vlaneseq  ;;  %s11291_s16 = sld [smem:[#allocation216_spill]] }
 0x163   : > { %5631 = vmatprep.subr.bf16.mxu0 %v5832_v11  ;;  %v5835_v14 = vld [vmem:[#allocation12 + $0x20] sm:$0xff]   ;;  %v5840_v15 = vld [vmem:[%s6911_s22] sm:$0xff]   ;;  %v5837_v17 = vld [vmem:[#allocation12 + $0x10] sm:$0xff]   ;;  %v708_v28 = vunpack.c.l.s4 %v6660_v27  ;;  %s1442_s24 = sld [smem:[#allocation6]]  ;;  %vm1712_vm3 = vcmask 130112   ;;  %vm1719_vm4 = vcmask 195712  }
 0x164   : > { %5632 = vmatpush3.bf16.msra.mxu0 %v5832_v11  ;;  %5647 = vmatprep.mubr.bf16.mxu0 %v5840_v15  ;;  %v5836_v16 = vld [vmem:[#allocation12 + $0x18] sm:$0xff]   ;;  %v5838_v18 = vld [vmem:[#allocation12 + $0x8] sm:$0xff]   ;;  %v5839_v19 = vld [vmem:[#allocation12] sm:$0xff]   ;;  %v6953_v31 = vshrl.u32 %v11049_v29, 7  ;;  %vm1726_vm5 = vcmask 261312   ;;  %vm1733_vm6 = vcmask 326912  }
 0x165   : > { %5633 = vmatprep.subr.bf16.mxu0 %v5833_v12  ;;  %v5841_v20 = vld [vmem:[%s6911_s22 + $0x8] sm:$0xff]   ;;  %v5842_v21 = vld [vmem:[%s6911_s22 + $0x10] sm:$0xff]   ;;  %v5843_v22 = vld [vmem:[%s6911_s22 + $0x18] sm:$0xff]   ;;  %v709_v30 = vunpack.c.0.s8 %v708_v28  ;;  %vm1740_vm7 = vcmask 392512   ;;  %vm11172_vm8 = vcmask 458112   ;;  %vm11169_vm9 = vcmask 523712  }
 0x166   : > { %v5844_v23 = vld [vmem:[%s6911_s22 + $0x20] sm:$0xff]   ;;  %v5845_v24 = vld [vmem:[%s6911_s22 + $0x28] sm:$0xff]   ;;  %v5846_v25 = vld [vmem:[%s6911_s22 + $0x30] sm:$0xff]   ;;  %11289 = vst [vmem:[#allocation27_spill] sm:$0xff] %v6953_v31  ;;  %v6957_v38 = vsub.s32 0, %v6953_v31  ;;  %vm11168_vm10 = vcmask 589312  }
 0x167   : > { %v5847_v26 = vld [vmem:[%s6911_s22 + $0x38] sm:$0xff]   ;;  %v712_v32 = vsub.s32 %v709_v30, %v6953_v31  ;;  %v704_v33 = vld [vmem:[#allocation2] sm:$0xff]  ;;  %vm11167_vm11 = vcmask 654912   ;;  %vm11165_vm12 = vcmask 720512   ;;  %vm1782_vm13 = vcmask 786112   ;;  %s5578_s2 = sshll.u32 %s6633_s8, 7 }
 0x168   : > { %5634 = vmatpush3.bf16.msra.mxu0 %v5833_v12  ;;  %11290 = vst [vmem:[#allocation28_spill] sm:$0xff] %v6957_v38  ;;  %v706_v40 = vcombine.high %v704_v33, %v704_v33  ;;  %v6994_v3 = vld [vmem:[%s11291_s16] ss:$0 sm:$0xff]  ;;  %vm1789_vm14 = vcmask 851712   ;;  %vm1796_vm15 = vcmask 917312   ;;  %vm1803_vm0 = vcmask 982912  }
 0x169   : > { %5635 = vmatprep.subr.bf16.mxu0 %v5834_v13  ;;  %v713_v34 = vrot.slane %v704_v33, %v712_v32  ;;  %vm1810_vm1 = vcmask 1048512   ;;  %vm11175_vm2 = vcmask 1041409   ;;  %s2380_s0 = sshra.s32 %s5578_s2, 7  ;;  %p5580_p7 = scmp.ne.s32.totalorder %s6633_s8, 1 }
 0x16a   : > { %v720_v45 = vrot.slane %v706_v40, %v712_v32  ;;  %s5579_s15 = sshll.u32 %s2380_s0, 3 }
 0x16b   : > { %v721_v35 = vcombine.high %v713_v34, %v713_v34  ;;  %v729_v36 = vrot.slane %v713_v34, %v712_v32  ;;  %s2383_s23 = scalar_lea.vmem %s6940_s25, %s5579_s15 [#allocation16] }
 0x16c   : > { %5636 = vmatpush3.bf16.msra.mxu0 %v5834_v13  ;;  %v736_v52 = vrot.slane %v720_v45, %v712_v32  ;;  %v722_v53 = vcombine.high %v720_v45, %v720_v45 }
 0x16d   : > { %5637 = vmatprep.subr.bf16.mxu0 %v5835_v14  ;;  %v743_v37 = vrot.slane %v721_v35, %v712_v32  ;;  %v751_v39 = vcombine.high %v729_v36, %v729_v36  ;;  %v6963_v42 = vrot.slane %v729_v36, %v6957_v38 }
 0x16e   : > { %v6979_v57 = vrot.slane %v736_v52, %v6957_v38  ;;  %v750_v59 = vrot.slane %v722_v53, %v712_v32  ;;  %v752_v62 = vcombine.high %v736_v52, %v736_v52 }
 0x16f   : > { %v6960_v41 = vrot.slane %v743_v37, %v6957_v38  ;;  %v6966_v43 = vrot.slane %v751_v39, %v6957_v38  ;;  %v753_v44 = vcombine.high %v743_v37, %v743_v37 }
 0x170   : > { %5638 = vmatpush3.bf16.msra.mxu0 %v5835_v14  ;;  %v6984_v61 = vrot.slane %v750_v59, %v6957_v38  ;;  %v6989_v1 = vrot.slane %v752_v62, %v6957_v38  ;;  %v754_v2 = vcombine.high %v750_v59, %v750_v59 }
 0x171   : > { %5639 = vmatprep.subr.bf16.mxu0 %v5836_v16  ;;  %v6972_v50 = vrot.slane %v753_v44, %v6957_v38 }
 0x172   : > { %v7000_v9 = vrot.slane %v754_v2, %v6957_v38 }
 0x174   : > { %5640 = vmatpush3.bf16.msra.mxu0 %v5836_v16 }
 0x175   : > { %5641 = vmatprep.subr.bf16.mxu0 %v5837_v17 }
 0x178   : > { %5642 = vmatpush3.bf16.msra.mxu0 %v5837_v17 }
 0x179   : > { %5643 = vmatprep.subr.bf16.mxu0 %v5838_v18 }
 0x17c   : > { %5644 = vmatpush3.bf16.msra.mxu0 %v5838_v18 }
 0x17d   : > { %5645 = vmatprep.subr.bf16.mxu0 %v5839_v19 }
 0x180   : > { %5646 = vmatpush3.bf16.msra.mxu0 %v5839_v19 }
 0x183   : > { %5648 = vmatmul.mubr.bf16.vlgmr.msra.gmra.mxu0 %v5841_v20 }
 0x184   : > { %5651 = vmatprep.mubr.bf16.mxu0 %v5842_v21 }
 0x18b   : > { %5652 = vmatmul.mubr.bf16.gmra.mxu0 %v5843_v22 }
 0x18c   : > { %5655 = vmatprep.mubr.bf16.mxu0 %v5844_v23 }
 0x193   : > { %5656 = vmatmul.mubr.bf16.gmra.mxu0 %v5845_v24 }
 0x194   : > { %5659 = vmatprep.mubr.bf16.mxu0 %v5846_v25 }
 0x19b   : > { %5660 = vmatmul.mubr.bf16.gmra.mxu0 %v5847_v26 }
 0x243   : > { %v5649_v46 = vpop.f32.mrf.mxu0 }
 0x244   : > { %v813_v47 = vmul.f32 %v5649_v46, %v6960_v41  ;;  %v797_v48 = vmul.f32 %v5649_v46, %v6963_v42  ;;  %v829_v49 = vmul.f32 %v5649_v46, %v6966_v43  ;;  %v845_v56 = vmul.f32 %v5649_v46, %v6972_v50 }
 0x245   : > { %v6974_v51 = vpop.f32.mrf.mxu0  ;;  %v861_v60 = vmul.f32 %v5649_v46, %v6979_v57  ;;  %v877_v0 = vmul.f32 %v5649_v46, %v6984_v61  ;;  %v893_v8 = vmul.f32 %v5649_v46, %v6989_v1  ;;  %v909_v16 = vmul.f32 %v5649_v46, %v7000_v9 }
 0x246   : > { %5849 = vtanh.f32 %v813_v47  ;;  %v795_v21 = vmul.f32 %v6963_v42, %v6974_v51  ;;  %v811_v27 = vmul.f32 %v6960_v41, %v6974_v51  ;;  %v827_v36 = vmul.f32 %v6966_v43, %v6974_v51 }
 0x247   : > { %v5650_v54 = vpop.f32.mrf.mxu0  ;;  %5851 = vtanh.f32 %v797_v48  ;;  %v843_v46 = vmul.f32 %v6972_v50, %v6974_v51  ;;  %v875_v62 = vmul.f32 %v6984_v61, %v6974_v51 }
 0x248   : > { %5853 = vtanh.f32 %v829_v49  ;;  %v798_v55 = vmul.f32 %v5650_v54, %v6963_v42  ;;  %v814_v58 = vmul.f32 %v5650_v54, %v6960_v41  ;;  %v830_v63 = vmul.f32 %v5650_v54, %v6966_v43 }
 0x249   : > { %v846_v4 = vmul.f32 %v5650_v54, %v6972_v50  ;;  %v862_v12 = vmul.f32 %v5650_v54, %v6979_v57  ;;  %v878_v18 = vmul.f32 %v5650_v54, %v6984_v61  ;;  %v894_v24 = vmul.f32 %v5650_v54, %v6989_v1  ;;  %v7018_v34 = vpop.f32.mrf.mxu0 }
 0x24a   : > { %5855 = vtanh.f32 %v798_v55  ;;  %v910_v32 = vmul.f32 %v5650_v54, %v7000_v9  ;;  %v812_v40 = vmul.f32 %v6960_v41, %v7018_v34  ;;  %v828_v49 = vmul.f32 %v6966_v43, %v7018_v34 }
 0x24b   : > { %5857 = vtanh.f32 %v845_v56  ;;  %v859_v54 = vmul.f32 %v6979_v57, %v6974_v51  ;;  %v860_v2 = vmul.f32 %v6979_v57, %v7018_v34 }
 0x24c   : > { %5859 = vtanh.f32 %v814_v58  ;;  %v844_v58 = vmul.f32 %v6972_v50, %v7018_v34 }
 0x24d   : > { %5861 = vtanh.f32 %v861_v60 }
 0x24e   : > { %5863 = vtanh.f32 %v830_v63 }
 0x24f   : > { %5865 = vtanh.f32 %v877_v0 }
 0x250   : > { %5867 = vtanh.f32 %v846_v4 }
 0x251   : > { %5869 = vtanh.f32 %v893_v8 }
 0x252   : > { %5871 = vtanh.f32 %v862_v12 }
 0x253   : > { %v5850_v5 = vpop.eup %5849  ;;  %5873 = vtanh.f32 %v909_v16 }
 0x254   : > { %v5852_v6 = vpop.eup %5851  ;;  %v1076_v7 = vmul.f32 %v5850_v5, %v6994_v3  ;;  %5875 = vtanh.f32 %v878_v18 }
 0x255   : > { %v5854_v10 = vpop.eup %5853  ;;  %v1060_v11 = vmul.f32 %v5852_v6, %v6994_v3  ;;  %5877 = vtanh.f32 %v795_v21  ;;  %v891_v6 = vmul.f32 %v6989_v1, %v6974_v51  ;;  %v796_v21 = vmul.f32 %v6963_v42, %v7018_v34 }
 0x256   : > { %1222 = vadd.xlane.f32.xlu0 %v1076_v7  ;;  %v1092_v14 = vmul.f32 %v5854_v10, %v6994_v3  ;;  %5879 = vtanh.f32 %v894_v24  ;;  %v876_v10 = vmul.f32 %v6984_v61, %v7018_v34 }
 0x257   : > { %v5856_v13 = vpop.eup %5855  ;;  %1190 = vadd.xlane.f32.xlu1 %v1060_v11  ;;  %5881 = vtanh.f32 %v811_v27 }
 0x258   : > { %v1061_v15 = vmul.f32 %v5856_v13, %v6994_v3  ;;  %v5858_v17 = vpop.eup %5857  ;;  %5883 = vtanh.f32 %v910_v32  ;;  %v7051_v13 = vpop.f32.mrf.mxu0 }
 0x259   : > { %v5860_v19 = vpop.eup %5859  ;;  %v1108_v20 = vmul.f32 %v5858_v17, %v6994_v3  ;;  %5885 = vtanh.f32 %v827_v36  ;;  %v892_v17 = vmul.f32 %v6989_v1, %v7018_v34  ;;  %v801_v27 = vmul.f32 %v7051_v13, %v6963_v42 }
 0x25a   : > { %1254 = vadd.xlane.f32.xlu0 %v1092_v14  ;;  %v5862_v22 = vpop.eup %5861  ;;  %v1077_v23 = vmul.f32 %v5860_v19, %v6994_v3  ;;  %5887 = vtanh.f32 %v812_v40  ;;  %v907_v14 = vmul.f32 %v7000_v9, %v6974_v51  ;;  %v7058_v19 = vpop.f32.mrf.mxu0 }
 0x25b   : > { %1192 = vadd.xlane.f32.xlu1 %v1061_v15  ;;  %v5864_v25 = vpop.eup %5863  ;;  %v1124_v26 = vmul.f32 %v5862_v22, %v6994_v3  ;;  %5889 = vtanh.f32 %v843_v46 }
 0x25c   : > { %v5866_v28 = vpop.eup %5865  ;;  %v1093_v30 = vmul.f32 %v5864_v25, %v6994_v3  ;;  %5891 = vtanh.f32 %v828_v49  ;;  %v7066_v25 = vpop.f32.mrf.mxu0 }
 0x25d   : > { %v5868_v33 = vpop.eup %5867  ;;  %v1140_v35 = vmul.f32 %v5866_v28, %v6994_v3  ;;  %5893 = vtanh.f32 %v859_v54  ;;  %v802_v32 = vmul.f32 %v7066_v25, %v6963_v42 }
 0x25e   : > { %1286 = vadd.xlane.f32.xlu0 %v1108_v20  ;;  %v5870_v37 = vpop.eup %5869  ;;  %v1109_v39 = vmul.f32 %v5868_v33, %v6994_v3  ;;  %5895 = vtanh.f32 %v844_v58 }
 0x25f   : > { %1224 = vadd.xlane.f32.xlu1 %v1077_v23  ;;  %v5872_v44 = vpop.eup %5871  ;;  %v1156_v45 = vmul.f32 %v5870_v37, %v6994_v3  ;;  %5897 = vtanh.f32 %v875_v62  ;;  %v908_v23 = vmul.f32 %v7000_v9, %v7018_v34 }
 0x260   : > { %v5874_v47 = vpop.eup %5873  ;;  %v1125_v48 = vmul.f32 %v5872_v44, %v6994_v3  ;;  %5899 = vtanh.f32 %v860_v2 }
 0x261   : > { %v5876_v52 = vpop.eup %5875  ;;  %v1172_v53 = vmul.f32 %v5874_v47, %v6994_v3  ;;  %5901 = vtanh.f32 %v891_v6 }
 0x262   : > { %1318 = vadd.xlane.f32.xlu0 %v1124_v26  ;;  %v5878_v55 = vpop.eup %5877  ;;  %v1141_v56 = vmul.f32 %v5876_v52, %v6994_v3  ;;  %5903 = vtanh.f32 %v876_v10 }
 0x263   : > { %1256 = vadd.xlane.f32.xlu1 %v1093_v30  ;;  %v5880_v59 = vpop.eup %5879  ;;  %v1058_v60 = vmul.f32 %v5878_v55, %v6994_v3  ;;  %5905 = vtanh.f32 %v907_v14 }
 0x264   : > { %v5882_v63 = vpop.eup %5881  ;;  %v1157_v0 = vmul.f32 %v5880_v59, %v6994_v3  ;;  %5907 = vtanh.f32 %v892_v17 }
 0x265   : > { %v5884_v4 = vpop.eup %5883  ;;  %v1074_v5 = vmul.f32 %v5882_v63, %v6994_v3  ;;  %5909 = vtanh.f32 %v796_v21 }
 0x266   : > { %1350 = vadd.xlane.f32.xlu0 %v1140_v35  ;;  %v5886_v7 = vpop.eup %5885  ;;  %v1173_v8 = vmul.f32 %v5884_v4, %v6994_v3  ;;  %5911 = vtanh.f32 %v908_v23  ;;  %v817_v35 = vmul.f32 %v7051_v13, %v6960_v41 }
 0x267   : > { %1288 = vadd.xlane.f32.xlu1 %v1109_v39  ;;  %v5888_v11 = vpop.eup %5887  ;;  %v1090_v12 = vmul.f32 %v5886_v7, %v6994_v3  ;;  %5913 = vtanh.f32 %v801_v27  ;;  %v818_v39 = vmul.f32 %v7066_v25, %v6960_v41  ;;  %v799_v27 = vmul.f32 %v6963_v42, %v7058_v19 }
 0x268   : > { %v5890_v15 = vpop.eup %5889  ;;  %v1075_v16 = vmul.f32 %v5888_v11, %v6994_v3  ;;  %5915 = vtanh.f32 %v802_v32 }
 0x269   : > { %v5892_v18 = vpop.eup %5891  ;;  %v1106_v20 = vmul.f32 %v5890_v15, %v6994_v3  ;;  %5917 = vtanh.f32 %v817_v35 }
 0x26a   : > { %1382 = vadd.xlane.f32.xlu0 %v1156_v45  ;;  %v5894_v22 = vpop.eup %5893  ;;  %v1091_v51 = vmul.f32 %v5892_v18, %v6994_v3  ;;  %v833_v45 = vmul.f32 %v7051_v13, %v6966_v43  ;;  %5919 = vtanh.f32 %v818_v39 }
 0x26b   : > { %1320 = vadd.xlane.f32.xlu1 %v1125_v48  ;;  %v5896_v24 = vpop.eup %5895  ;;  %v1122_v26 = vmul.f32 %v5894_v22, %v6994_v3  ;;  %v834_v48 = vmul.f32 %v7066_v25, %v6966_v43 }
 0x26c   : > { %v5898_v28 = vpop.eup %5897  ;;  %v1107_v30 = vmul.f32 %v5896_v24, %v6994_v3  ;;  %5921 = vtanh.f32 %v833_v45  ;;  %v7116_v24 = vpop.f32.mrf.mxu0 }
 0x26d   : > { %v5900_v33 = vpop.eup %5899  ;;  %v1138_v34 = vmul.f32 %v5898_v28, %v6994_v3  ;;  %5923 = vtanh.f32 %v834_v48 }
 0x26e   : > { %1414 = vadd.xlane.f32.xlu0 %v1172_v53  ;;  %v5902_v36 = vpop.eup %5901  ;;  %v1123_v37 = vmul.f32 %v5900_v33, %v6994_v3  ;;  %v849_v53 = vmul.f32 %v7051_v13, %v6972_v50  ;;  %v815_v33 = vmul.f32 %v6960_v41, %v7058_v19 }
 0x26f   : > { %1352 = vadd.xlane.f32.xlu1 %v1141_v56  ;;  %v5904_v40 = vpop.eup %5903  ;;  %v1154_v44 = vmul.f32 %v5902_v36, %v6994_v3  ;;  %v850_v56 = vmul.f32 %v7066_v25, %v6972_v50  ;;  %v816_v36 = vmul.f32 %v6960_v41, %v7116_v24 }
 0x270   : > { %v5906_v46 = vpop.eup %5905  ;;  %v1139_v47 = vmul.f32 %v5904_v40, %v6994_v3  ;;  %5925 = vtanh.f32 %v849_v53  ;;  %v831_v40 = vmul.f32 %v6966_v43, %v7058_v19 }
 0x271   : > { %v5908_v49 = vpop.eup %5907  ;;  %v1170_v52 = vmul.f32 %v5906_v46, %v6994_v3  ;;  %5927 = vtanh.f32 %v850_v56  ;;  %v832_v46 = vmul.f32 %v6966_v43, %v7116_v24 }
 0x272   : > { %1186 = vadd.xlane.f32.xlu0 %v1058_v60  ;;  %v5910_v54 = vpop.eup %5909  ;;  %v1155_v55 = vmul.f32 %v5908_v49, %v6994_v3  ;;  %v865_v60 = vmul.f32 %v7051_v13, %v6979_v57  ;;  %v847_v49 = vmul.f32 %v6972_v50, %v7058_v19 }
 0x273   : > { %1384 = vadd.xlane.f32.xlu1 %v1157_v0  ;;  %v5912_v58 = vpop.eup %5911  ;;  %v1059_v59 = vmul.f32 %v5910_v54, %v6994_v3  ;;  %v866_v0 = vmul.f32 %v7066_v25, %v6979_v57  ;;  %v848_v54 = vmul.f32 %v6972_v50, %v7116_v24 }
 0x274   : > { %v5914_v62 = vpop.eup %5913  ;;  %v1171_v63 = vmul.f32 %v5912_v58, %v6994_v3  ;;  %5929 = vtanh.f32 %v865_v60  ;;  %v863_v58 = vmul.f32 %v6979_v57, %v7058_v19 }
 0x275   : > { %v5916_v2 = vpop.eup %5915  ;;  %v1064_v4 = vmul.f32 %v5914_v62, %v6994_v3  ;;  %5931 = vtanh.f32 %v866_v0  ;;  %v864_v62 = vmul.f32 %v6979_v57, %v7116_v24 }
 0x276   : > { %1218 = vadd.xlane.f32.xlu0 %v1074_v5  ;;  %v881_v5 = vmul.f32 %v7051_v13, %v6984_v61  ;;  %v5918_v6 = vpop.eup %5917  ;;  %v1065_v7 = vmul.f32 %v5916_v2, %v6994_v3  ;;  %v879_v2 = vmul.f32 %v6984_v61, %v7058_v19 }
 0x277   : > { %1416 = vadd.xlane.f32.xlu1 %v1173_v8  ;;  %v882_v8 = vmul.f32 %v7066_v25, %v6984_v61  ;;  %v5920_v10 = vpop.eup %5919  ;;  %v1080_v11 = vmul.f32 %v5918_v6, %v6994_v3  ;;  %v880_v6 = vmul.f32 %v6984_v61, %v7116_v24 }
 0x278   : > { %5933 = vtanh.f32 %v881_v5  ;;  %v1081_v15 = vmul.f32 %v5920_v10, %v6994_v3  ;;  %v7155_v10 = vpop.f32.mrf.mxu0 }
 0x279   : > { %v5922_v14 = vpop.eup %5921  ;;  %5935 = vtanh.f32 %v882_v8 }
 0x27a   : > { %1250 = vadd.xlane.f32.xlu0 %v1090_v12  ;;  %v897_v12 = vmul.f32 %v7051_v13, %v6989_v1  ;;  %v5924_v17 = vpop.eup %5923  ;;  %v1096_v18 = vmul.f32 %v5922_v14, %v6994_v3 }
 0x27b   : > { %1220 = vadd.xlane.f32.xlu1 %v1075_v16  ;;  %v898_v16 = vmul.f32 %v7066_v25, %v6989_v1  ;;  %v1097_v22 = vmul.f32 %v5924_v17, %v6994_v3  ;;  %v7162_v17 = vpop.f32.mrf.mxu0 }
 0x27c   : > { %5937 = vtanh.f32 %v897_v12 }
 0x27d   : > { %v5926_v21 = vpop.eup %5925  ;;  %5939 = vtanh.f32 %v898_v16 }
 0x27e   : > { %1282 = vadd.xlane.f32.xlu0 %v1106_v20  ;;  %v913_v20 = vmul.f32 %v7051_v13, %v7000_v9  ;;  %v5928_v23 = vpop.eup %5927 }
 0x27f   : > { %1252 = vadd.xlane.f32.xlu1 %v1091_v51  ;;  %v914_v51 = vmul.f32 %v7066_v25, %v7000_v9  ;;  %v1113_v13 = vmul.f32 %v5928_v23, %v6994_v3 }
 0x280   : > { %5941 = vtanh.f32 %v913_v20  ;;  %v911_v20 = vmul.f32 %v7000_v9, %v7058_v19 }
 0x281   : > { %v5930_v28 = vpop.eup %5929  ;;  %5943 = vtanh.f32 %v914_v51  ;;  %v912_v51 = vmul.f32 %v7000_v9, %v7116_v24 }
 0x282   : > { %1314 = vadd.xlane.f32.xlu0 %v1122_v26  ;;  %v1112_v26 = vmul.f32 %v5926_v21, %v6994_v3  ;;  %v5932_v32 = vpop.eup %5931  ;;  %v1128_v25 = vmul.f32 %v5930_v28, %v6994_v3  ;;  %5945 = vtanh.f32 %v799_v27  ;;  %v805_v28 = vmul.f32 %v7155_v10, %v6963_v42 }
 0x283   : > { %1284 = vadd.xlane.f32.xlu1 %v1107_v30  ;;  %v800_v30 = vmul.f32 %v6963_v42, %v7116_v24  ;;  %v1129_v35 = vmul.f32 %v5932_v32, %v6994_v3 }
 0x285   : > { %5947 = vtanh.f32 %v800_v30 }
 0x286   : > { %1346 = vadd.xlane.f32.xlu0 %v1138_v34  ;;  %v5934_v34 = vpop.eup %5933  ;;  %5949 = vtanh.f32 %v815_v33 }
 0x287   : > { %1316 = vadd.xlane.f32.xlu1 %v1123_v37  ;;  %v5936_v37 = vpop.eup %5935  ;;  %v1144_v39 = vmul.f32 %v5934_v34, %v6994_v3  ;;  %5951 = vtanh.f32 %v816_v36 }
 0x288   : > { %v1145_v45 = vmul.f32 %v5936_v37, %v6994_v3  ;;  %5953 = vtanh.f32 %v831_v40 }
 0x289   : > { %5955 = vtanh.f32 %v832_v46 }
 0x28a   : > { %1378 = vadd.xlane.f32.xlu0 %v1154_v44  ;;  %v5938_v44 = vpop.eup %5937  ;;  %5957 = vtanh.f32 %v847_v49 }
 0x28b   : > { %1348 = vadd.xlane.f32.xlu1 %v1139_v47  ;;  %v5940_v47 = vpop.eup %5939  ;;  %v1160_v48 = vmul.f32 %v5938_v44, %v6994_v3  ;;  %5959 = vtanh.f32 %v848_v54 }
 0x28c   : > { %v1161_v53 = vmul.f32 %v5940_v47, %v6994_v3  ;;  %5961 = vtanh.f32 %v863_v58 }
 0x28d   : > { %5963 = vtanh.f32 %v864_v62 }
 0x28e   : > { %1410 = vadd.xlane.f32.xlu0 %v1170_v52  ;;  %v5942_v52 = vpop.eup %5941  ;;  %5965 = vtanh.f32 %v879_v2 }
 0x28f   : > { %1380 = vadd.xlane.f32.xlu1 %v1155_v55  ;;  %v5944_v55 = vpop.eup %5943  ;;  %v1176_v56 = vmul.f32 %v5942_v52, %v6994_v3  ;;  %5967 = vtanh.f32 %v880_v6 }
 0x290   : > { %v1177_v60 = vmul.f32 %v5944_v55, %v6994_v3 }
 0x292   : > { %1188 = vadd.xlane.f32.xlu0 %v1059_v59  ;;  %v5946_v59 = vpop.eup %5945 }
 0x293   : > { %1412 = vadd.xlane.f32.xlu1 %v1171_v63  ;;  %v5948_v63 = vpop.eup %5947  ;;  %v1062_v0 = vmul.f32 %v5946_v59, %v6994_v3 }
 0x294   : > { %v1063_v5 = vmul.f32 %v5948_v63, %v6994_v3 }
 0x296   : > { %1198 = vadd.xlane.f32.xlu0 %v1064_v4  ;;  %v5950_v4 = vpop.eup %5949 }
 0x297   : > { %1200 = vadd.xlane.f32.xlu1 %v1065_v7  ;;  %v5952_v7 = vpop.eup %5951  ;;  %v1078_v8 = vmul.f32 %v5950_v4, %v6994_v3 }
 0x298   : > { %v5954_v12 = vpop.eup %5953  ;;  %v1079_v14 = vmul.f32 %v5952_v7, %v6994_v3 }
 0x299   : > { %v5956_v16 = vpop.eup %5955 }
 0x29a   : > { %1230 = vadd.xlane.f32.xlu0 %v1080_v11  ;;  %v895_v11 = vmul.f32 %v6989_v1, %v7058_v19  ;;  %v5958_v21 = vpop.eup %5957 }
 0x29b   : > { %1232 = vadd.xlane.f32.xlu1 %v1081_v15  ;;  %v896_v15 = vmul.f32 %v6989_v1, %v7116_v24  ;;  %v5960_v23 = vpop.eup %5959  ;;  %v1110_v27 = vmul.f32 %v5958_v21, %v6994_v3 }
 0x29c   : > { %5969 = vtanh.f32 %v895_v11  ;;  %v1111_v19 = vmul.f32 %v5960_v23, %v6994_v3 }
 0x29d   : > { %5971 = vtanh.f32 %v896_v15 }
 0x29e   : > { %1262 = vadd.xlane.f32.xlu0 %v1096_v18  ;;  %v1094_v18 = vmul.f32 %v5954_v12, %v6994_v3  ;;  %5973 = vtanh.f32 %v911_v20 }
 0x29f   : > { %1264 = vadd.xlane.f32.xlu1 %v1097_v22  ;;  %v1095_v22 = vmul.f32 %v5956_v16, %v6994_v3  ;;  %5975 = vtanh.f32 %v912_v51 }
 0x2a0   : > { %5977 = vtanh.f32 %v805_v28 }
 0x2a2   : > { %1294 = vadd.xlane.f32.xlu0 %v1112_v26  ;;  %v7170_v26 = vpop.f32.mrf.mxu0 }
 0x2a3   : > { %1296 = vadd.xlane.f32.xlu1 %v1113_v13  ;;  %v5962_v13 = vpop.eup %5961  ;;  %v806_v30 = vmul.f32 %v7170_v26, %v6963_v42 }
 0x2a4   : > { %v5964_v32 = vpop.eup %5963  ;;  %v1126_v24 = vmul.f32 %v5962_v13, %v6994_v3  ;;  %v7220_v23 = vpop.f32.mrf.mxu0 }
 0x2a5   : > { %v5966_v33 = vpop.eup %5965  ;;  %v1127_v34 = vmul.f32 %v5964_v32, %v6994_v3  ;;  %5979 = vtanh.f32 %v806_v30 }
 0x2a6   : > { %1326 = vadd.xlane.f32.xlu0 %v1128_v25  ;;  %v821_v25 = vmul.f32 %v7155_v10, %v6960_v41  ;;  %v5968_v36 = vpop.eup %5967  ;;  %v1142_v37 = vmul.f32 %v5966_v33, %v6994_v3 }
 0x2a7   : > { %1328 = vadd.xlane.f32.xlu1 %v1129_v35  ;;  %v822_v35 = vmul.f32 %v7170_v26, %v6960_v41  ;;  %v1143_v44 = vmul.f32 %v5968_v36, %v6994_v3 }
 0x2a8   : > { %5981 = vtanh.f32 %v821_v25 }
 0x2a9   : > { %v5970_v40 = vpop.eup %5969  ;;  %5983 = vtanh.f32 %v822_v35 }
 0x2aa   : > { %1358 = vadd.xlane.f32.xlu0 %v1144_v39  ;;  %v837_v39 = vmul.f32 %v7155_v10, %v6966_v43  ;;  %v5972_v46 = vpop.eup %5971  ;;  %v1158_v47 = vmul.f32 %v5970_v40, %v6994_v3 }
 0x2ab   : > { %1360 = vadd.xlane.f32.xlu1 %v1145_v45  ;;  %v838_v45 = vmul.f32 %v7170_v26, %v6966_v43  ;;  %v5974_v49 = vpop.eup %5973  ;;  %v1159_v52 = vmul.f32 %v5972_v46, %v6994_v3  ;;  %v835_v46 = vmul.f32 %v6966_v43, %v7162_v17 }
 0x2ac   : > { %5985 = vtanh.f32 %v837_v39  ;;  %v5976_v54 = vpop.eup %5975  ;;  %v1174_v55 = vmul.f32 %v5974_v49, %v6994_v3  ;;  %v836_v49 = vmul.f32 %v6966_v43, %v7220_v23 }
 0x2ad   : > { %5987 = vtanh.f32 %v838_v45  ;;  %v5978_v58 = vpop.eup %5977  ;;  %v1175_v59 = vmul.f32 %v5976_v54, %v6994_v3 }
 0x2ae   : > { %1390 = vadd.xlane.f32.xlu0 %v1160_v48  ;;  %v853_v48 = vmul.f32 %v7155_v10, %v6972_v50  ;;  %v1068_v63 = vmul.f32 %v5978_v58, %v6994_v3 }
 0x2af   : > { %1392 = vadd.xlane.f32.xlu1 %v1161_v53  ;;  %v854_v53 = vmul.f32 %v7170_v26, %v6972_v50 }
 0x2b0   : > { %5989 = vtanh.f32 %v853_v48 }
 0x2b1   : > { %5991 = vtanh.f32 %v854_v53 }
 0x2b2   : > { %1422 = vadd.xlane.f32.xlu0 %v1176_v56  ;;  %v869_v56 = vmul.f32 %v7155_v10, %v6979_v57  ;;  %v5980_v62 = vpop.eup %5979 }
 0x2b3   : > { %1424 = vadd.xlane.f32.xlu1 %v1177_v60  ;;  %v870_v60 = vmul.f32 %v7170_v26, %v6979_v57  ;;  %v1069_v4 = vmul.f32 %v5980_v62, %v6994_v3 }
 0x2b4   : > { %5993 = vtanh.f32 %v869_v56  ;;  %v851_v56 = vmul.f32 %v6972_v50, %v7162_v17 }
 0x2b5   : > { %v5982_v2 = vpop.eup %5981  ;;  %5995 = vtanh.f32 %v870_v60  ;;  %v852_v60 = vmul.f32 %v6972_v50, %v7220_v23 }
 0x2b6   : > { %1194 = vadd.xlane.f32.xlu0 %v1062_v0  ;;  %v885_v0 = vmul.f32 %v7155_v10, %v6984_v61  ;;  %v5984_v6 = vpop.eup %5983  ;;  %v1084_v7 = vmul.f32 %v5982_v2, %v6994_v3 }
 0x2b7   : > { %1196 = vadd.xlane.f32.xlu1 %v1063_v5  ;;  %v886_v5 = vmul.f32 %v7170_v26, %v6984_v61  ;;  %v1085_v12 = vmul.f32 %v5984_v6, %v6994_v3 }
 0x2b8   : > { %5997 = vtanh.f32 %v885_v0 }
 0x2b9   : > { %v5986_v11 = vpop.eup %5985  ;;  %5999 = vtanh.f32 %v886_v5 }
 0x2ba   : > { %1226 = vadd.xlane.f32.xlu0 %v1078_v8  ;;  %v901_v8 = vmul.f32 %v7155_v10, %v6989_v1  ;;  %v5988_v15 = vpop.eup %5987  ;;  %v1100_v16 = vmul.f32 %v5986_v11, %v6994_v3 }
 0x2bb   : > { %1228 = vadd.xlane.f32.xlu1 %v1079_v14  ;;  %v902_v14 = vmul.f32 %v7170_v26, %v6989_v1  ;;  %v1101_v21 = vmul.f32 %v5988_v15, %v6994_v3  ;;  %v883_v15 = vmul.f32 %v6984_v61, %v7162_v17 }
 0x2bc   : > { %6001 = vtanh.f32 %v901_v8 }
 0x2bd   : > { %v5990_v20 = vpop.eup %5989  ;;  %6003 = vtanh.f32 %v902_v14 }
 0x2be   : > { %1258 = vadd.xlane.f32.xlu0 %v1094_v18  ;;  %v917_v18 = vmul.f32 %v7155_v10, %v7000_v9  ;;  %v5992_v51 = vpop.eup %5991  ;;  %v1116_v13 = vmul.f32 %v5990_v20, %v6994_v3  ;;  %v803_v10 = vmul.f32 %v6963_v42, %v7162_v17  ;;  %v884_v20 = vmul.f32 %v6984_v61, %v7220_v23 }
 0x2bf   : > { %1260 = vadd.xlane.f32.xlu1 %v1095_v22  ;;  %v918_v22 = vmul.f32 %v7170_v26, %v7000_v9  ;;  %v1117_v30 = vmul.f32 %v5992_v51, %v6994_v3  ;;  %v804_v26 = vmul.f32 %v6963_v42, %v7220_v23 }
 0x2c0   : > { %6005 = vtanh.f32 %v917_v18 }
 0x2c1   : > { %6007 = vtanh.f32 %v918_v22 }
 0x2c2   : > { %1290 = vadd.xlane.f32.xlu0 %v1110_v27  ;;  %6009 = vtanh.f32 %v803_v10  ;;  %v7287_v10 = vpop.f32.mrf.mxu0 }
 0x2c3   : > { %1292 = vadd.xlane.f32.xlu1 %v1111_v19  ;;  %v5994_v19 = vpop.eup %5993  ;;  %6011 = vtanh.f32 %v804_v26 }
 0x2c4   : > { %v5996_v32 = vpop.eup %5995  ;;  %v1132_v33 = vmul.f32 %v5994_v19, %v6994_v3  ;;  %v899_v19 = vmul.f32 %v6989_v1, %v7162_v17 }
 0x2c5   : > { %v5998_v35 = vpop.eup %5997  ;;  %v1133_v36 = vmul.f32 %v5996_v32, %v6994_v3  ;;  %v900_v32 = vmul.f32 %v6989_v1, %v7220_v23 }
 0x2c6   : > { %1322 = vadd.xlane.f32.xlu0 %v1126_v24  ;;  %v6000_v39 = vpop.eup %5999  ;;  %v1148_v45 = vmul.f32 %v5998_v35, %v6994_v3 }
 0x2c7   : > { %1324 = vadd.xlane.f32.xlu1 %v1127_v34  ;;  %v819_v34 = vmul.f32 %v6960_v41, %v7162_v17  ;;  %v1149_v48 = vmul.f32 %v6000_v39, %v6994_v3  ;;  %v915_v39 = vmul.f32 %v7000_v9, %v7162_v17 }
 0x2c9   : > { %6013 = vtanh.f32 %v819_v34 }
 0x2ca   : > { %1354 = vadd.xlane.f32.xlu0 %v1142_v37  ;;  %v820_v37 = vmul.f32 %v6960_v41, %v7220_v23 }
 0x2cb   : > { %1356 = vadd.xlane.f32.xlu1 %v1143_v44 }
 0x2cc   : > { %6015 = vtanh.f32 %v820_v37 }
 0x2cd   : > { %6017 = vtanh.f32 %v835_v46 }
 0x2ce   : > { %1386 = vadd.xlane.f32.xlu0 %v1158_v47  ;;  %v6002_v47 = vpop.eup %6001  ;;  %6019 = vtanh.f32 %v836_v49 }
 0x2cf   : > { %1388 = vadd.xlane.f32.xlu1 %v1159_v52  ;;  %v6004_v52 = vpop.eup %6003  ;;  %6021 = vtanh.f32 %v851_v56 }
 0x2d0   : > { %v6006_v58 = vpop.eup %6005  ;;  %6023 = vtanh.f32 %v852_v60 }
 0x2d1   : > { %v6008_v62 = vpop.eup %6007  ;;  %v1180_v2 = vmul.f32 %v6006_v58, %v6994_v3 }
 0x2d2   : > { %1418 = vadd.xlane.f32.xlu0 %v1174_v55  ;;  %v1164_v55 = vmul.f32 %v6002_v47, %v6994_v3  ;;  %v6010_v5 = vpop.eup %6009  ;;  %v1181_v6 = vmul.f32 %v6008_v62, %v6994_v3  ;;  %v916_v47 = vmul.f32 %v7000_v9, %v7220_v23 }
 0x2d3   : > { %1420 = vadd.xlane.f32.xlu1 %v1175_v59  ;;  %v1165_v59 = vmul.f32 %v6004_v52, %v6994_v3  ;;  %v6012_v8 = vpop.eup %6011  ;;  %v1066_v14 = vmul.f32 %v6010_v5, %v6994_v3  ;;  %v825_v5 = vmul.f32 %v7287_v10, %v6960_v41 }
 0x2d4   : > { %v1067_v18 = vmul.f32 %v6012_v8, %v6994_v3 }
 0x2d6   : > { %1206 = vadd.xlane.f32.xlu0 %v1068_v63 }
 0x2d7   : > { %1208 = vadd.xlane.f32.xlu1 %v1069_v4  ;;  %v867_v4 = vmul.f32 %v6979_v57, %v7162_v17  ;;  %v809_v17 = vmul.f32 %v7287_v10, %v6963_v42 }
 0x2d9   : > { %6025 = vtanh.f32 %v867_v4 }
 0x2da   : > { %1238 = vadd.xlane.f32.xlu0 %v1084_v7  ;;  %v868_v7 = vmul.f32 %v6979_v57, %v7220_v23 }
 0x2db   : > { %1240 = vadd.xlane.f32.xlu1 %v1085_v12 }
 0x2dc   : > { %6027 = vtanh.f32 %v868_v7 }
 0x2dd   : > { %6029 = vtanh.f32 %v883_v15 }
 0x2de   : > { %1270 = vadd.xlane.f32.xlu0 %v1100_v16  ;;  %v6014_v16 = vpop.eup %6013  ;;  %6031 = vtanh.f32 %v884_v20  ;;  %v841_v20 = vmul.f32 %v7287_v10, %v6966_v43 }
 0x2df   : > { %1272 = vadd.xlane.f32.xlu1 %v1101_v21  ;;  %v7222_v27 = vpop.xlane.xlu0 %1222  ;;  %v6016_v21 = vpop.eup %6015  ;;  %6033 = vtanh.f32 %v899_v19 }
 0x2e0   : > { %v7224_v28 = vpop.xlane.xlu1 %1190  ;;  %v1083_v26 = vmul.f32 %v6016_v21, %v6994_v3  ;;  %6035 = vtanh.f32 %v900_v32 }
 0x2e1   : > { %6037 = vtanh.f32 %v915_v39 }
 0x2e2   : > { %1302 = vadd.xlane.f32.xlu0 %v1116_v13  ;;  %v1082_v13 = vmul.f32 %v6014_v16, %v6994_v3  ;;  %6039 = vtanh.f32 %v916_v47 }
 0x2e3   : > { %1304 = vadd.xlane.f32.xlu1 %v1117_v30  ;;  %v7232_v24 = vpop.xlane.xlu0 %1254  ;;  %v6018_v30 = vpop.eup %6017  ;;  %6041 = vtanh.f32 %v809_v17  ;;  %v7355_v17 = vld [vmem:[%s11291_s16] ss:$0 sm:$0xff] }
 0x2e4   : > { %v7234_v25 = vpop.xlane.xlu1 %1192  ;;  %v1098_v37 = vmul.f32 %v6018_v30, %v6994_v3 }
 0x2e6   : > { %1334 = vadd.xlane.f32.xlu0 %v1132_v33  ;;  %v6020_v33 = vpop.eup %6019 }
 0x2e7   : > { %1336 = vadd.xlane.f32.xlu1 %v1133_v36  ;;  %v7242_v40 = vpop.xlane.xlu0 %1286  ;;  %v7298_v36 = vpop.f32.mrf.mxu0  ;;  %v1099_v46 = vmul.f32 %v6020_v33, %v6994_v3 }
 0x2e8   : > { %v7244_v44 = vpop.xlane.xlu1 %1224 }
 0x2e9   : > { %v7308_v52 = vpop.f32.mrf.mxu0 }
 0x2ea   : > { %1366 = vadd.xlane.f32.xlu0 %v1148_v45  ;;  %v6022_v45 = vpop.eup %6021  ;;  %v810_v23 = vmul.f32 %v7308_v52, %v6963_v42  ;;  %v826_v8 = vmul.f32 %v7308_v52, %v6960_v41  ;;  %v842_v19 = vmul.f32 %v7308_v52, %v6966_v43 }
 0x2eb   : > { %1368 = vadd.xlane.f32.xlu1 %v1149_v48  ;;  %v7252_v53 = vpop.xlane.xlu0 %1318  ;;  %v6024_v48 = vpop.eup %6023  ;;  %v1114_v56 = vmul.f32 %v6022_v45, %v6994_v3 }
 0x2ec   : > { %v7254_v54 = vpop.xlane.xlu1 %1256  ;;  %v6026_v58 = vpop.eup %6025  ;;  %6043 = vtanh.f32 %v810_v23 }
 0x2ed   : > { %v6028_v60 = vpop.eup %6027  ;;  %v1130_v4 = vmul.f32 %v6026_v58, %v6994_v3  ;;  %6045 = vtanh.f32 %v825_v5 }
 0x2ee   : > { %1398 = vadd.xlane.f32.xlu0 %v1164_v55  ;;  %v1131_v7 = vmul.f32 %v6028_v60, %v6994_v3  ;;  %6047 = vtanh.f32 %v826_v8  ;;  %v874_v60 = vmul.f32 %v7308_v52, %v6979_v57  ;;  %v889_v8 = vmul.f32 %v7287_v10, %v6984_v61 }
 0x2ef   : > { %1400 = vadd.xlane.f32.xlu1 %v1165_v59  ;;  %v7262_v63 = vpop.xlane.xlu0 %1350  ;;  %v1115_v59 = vmul.f32 %v6024_v48, %v6994_v3  ;;  %6049 = vtanh.f32 %v841_v20  ;;  %v890_v20 = vmul.f32 %v7308_v52, %v6984_v61 }
 0x2f0   : > { %v7264_v0 = vpop.xlane.xlu1 %1288  ;;  %6051 = vtanh.f32 %v842_v19 }
 0x2f2   : > { %1430 = vadd.xlane.f32.xlu0 %v1180_v2 }
 0x2f3   : > { %1432 = vadd.xlane.f32.xlu1 %v1181_v6  ;;  %v7272_v11 = vpop.xlane.xlu0 %1382  ;;  %v6030_v6 = vpop.eup %6029 }
 0x2f4   : > { %v7274_v12 = vpop.xlane.xlu1 %1320 }
 0x2f6   : > { %1202 = vadd.xlane.f32.xlu0 %v1066_v14  ;;  %v6032_v14 = vpop.eup %6031 }
 0x2f7   : > { %1204 = vadd.xlane.f32.xlu1 %v1067_v18  ;;  %v7282_v22 = vpop.xlane.xlu0 %1414  ;;  %v1146_v18 = vmul.f32 %v6030_v6, %v6994_v3  ;;  %v6034_v21 = vpop.eup %6033 }
 0x2f8   : > { %v7284_v51 = vpop.xlane.xlu1 %1352  ;;  %v6036_v30 = vpop.eup %6035  ;;  %v1162_v33 = vmul.f32 %v6034_v21, %v6994_v3 }
 0x2f9   : > { %v6038_v39 = vpop.eup %6037  ;;  %v1163_v45 = vmul.f32 %v6036_v30, %v6994_v3 }
 0x2fa   : > { %1234 = vadd.xlane.f32.xlu0 %v1082_v13  ;;  %v1147_v13 = vmul.f32 %v6032_v14, %v6994_v3  ;;  %v6040_v47 = vpop.eup %6039  ;;  %v1178_v58 = vmul.f32 %v7355_v17, %v6038_v39  ;;  %v873_v3 = vmul.f32 %v7287_v10, %v6979_v57 }
 0x2fb   : > { %1236 = vadd.xlane.f32.xlu1 %v1083_v26  ;;  %v7294_v34 = vpop.xlane.xlu0 %1186  ;;  %v1179_v23 = vmul.f32 %v7355_v17, %v6040_v47 }
 0x2fc   : > { %v7296_v35 = vpop.xlane.xlu1 %1384 }
 0x2fe   : > { %1266 = vadd.xlane.f32.xlu0 %v1098_v37  ;;  %v857_v37 = vmul.f32 %v7287_v10, %v6972_v50 }
 0x2ff   : > { %1268 = vadd.xlane.f32.xlu1 %v1099_v46  ;;  %v7306_v49 = vpop.xlane.xlu0 %1218  ;;  %v858_v46 = vmul.f32 %v7308_v52, %v6972_v50 }
 0x300   : > { %v7310_v55 = vpop.xlane.xlu1 %1416  ;;  %6053 = vtanh.f32 %v857_v37 }
 0x301   : > { %6055 = vtanh.f32 %v858_v46 }
 0x302   : > { %1298 = vadd.xlane.f32.xlu0 %v1114_v56  ;;  %6057 = vtanh.f32 %v873_v3 }
 0x303   : > { %1300 = vadd.xlane.f32.xlu1 %v1115_v59  ;;  %v7318_v62 = vpop.xlane.xlu0 %1250  ;;  %v6042_v59 = vpop.eup %6041  ;;  %6059 = vtanh.f32 %v874_v60 }
 0x304   : > { %v7320_v2 = vpop.xlane.xlu1 %1220  ;;  %6061 = vtanh.f32 %v889_v8  ;;  %v7393_v8 = vpop.f32.mrf.mxu0 }
 0x305   : > { %6063 = vtanh.f32 %v890_v20 }
 0x306   : > { %1330 = vadd.xlane.f32.xlu0 %v1130_v4  ;;  %v6044_v4 = vpop.eup %6043 }
 0x307   : > { %1332 = vadd.xlane.f32.xlu1 %v1131_v7  ;;  %v7328_v15 = vpop.xlane.xlu0 %1282  ;;  %v1072_v7 = vmul.f32 %v7355_v17, %v6042_v59  ;;  %v6046_v14 = vpop.eup %6045  ;;  %v921_v59 = vmul.f32 %v7287_v10, %v7000_v9 }
 0x308   : > { %v7330_v16 = vpop.xlane.xlu1 %1252  ;;  %v6048_v21 = vpop.eup %6047  ;;  %v1088_v30 = vmul.f32 %v7355_v17, %v6046_v14 }
 0x309   : > { %v6050_v37 = vpop.eup %6049  ;;  %v1089_v39 = vmul.f32 %v7355_v17, %v6048_v21 }
 0x30a   : > { %1362 = vadd.xlane.f32.xlu0 %v1146_v18  ;;  %v1073_v18 = vmul.f32 %v7355_v17, %v6044_v4  ;;  %v6052_v46 = vpop.eup %6051  ;;  %v1104_v3 = vmul.f32 %v7355_v17, %v6050_v37  ;;  %v922_v4 = vmul.f32 %v7308_v52, %v7000_v9 }
 0x30b   : > { %1364 = vadd.xlane.f32.xlu1 %v1147_v13  ;;  %v7338_v26 = vpop.xlane.xlu0 %1314  ;;  %v1105_v60 = vmul.f32 %v7355_v17, %v6052_v46  ;;  %v823_v46 = vmul.f32 %v6960_v41, %v7298_v36 }
 0x30c   : > { %v7340_v32 = vpop.xlane.xlu1 %1284 }
 0x30e   : > { %1394 = vadd.xlane.f32.xlu0 %v1162_v33  ;;  %v905_v33 = vmul.f32 %v7287_v10, %v6989_v1  ;;  %v807_v10 = vmul.f32 %v6963_v42, %v7298_v36 }
 0x30f   : > { %1396 = vadd.xlane.f32.xlu1 %v1163_v45  ;;  %v7348_v48 = vpop.xlane.xlu0 %1346  ;;  %v906_v45 = vmul.f32 %v7308_v52, %v6989_v1 }
 0x310   : > { %v7350_v56 = vpop.xlane.xlu1 %1316  ;;  %6065 = vtanh.f32 %v905_v33 }
 0x311   : > { %6067 = vtanh.f32 %v906_v45 }
 0x312   : > { %1426 = vadd.xlane.f32.xlu0 %v1178_v58  ;;  %6069 = vtanh.f32 %v921_v59 }
 0x313   : > { %1428 = vadd.xlane.f32.xlu1 %v1179_v23  ;;  %v7363_v5 = vpop.xlane.xlu0 %1378  ;;  %v6054_v23 = vpop.eup %6053  ;;  %6071 = vtanh.f32 %v922_v4 }
 0x314   : > { %v7365_v6 = vpop.xlane.xlu1 %1348  ;;  %v1120_v20 = vmul.f32 %v7355_v17, %v6054_v23  ;;  %6073 = vtanh.f32 %v807_v10 }
 0x316   : > { %1214 = vadd.xlane.f32.xlu0 %v1072_v7  ;;  %v6056_v7 = vpop.eup %6055 }
 0x317   : > { %1216 = vadd.xlane.f32.xlu1 %v1073_v18  ;;  %v7373_v13 = vpop.xlane.xlu0 %1410  ;;  %v6058_v21 = vpop.eup %6057  ;;  %v1121_v52 = vmul.f32 %v7355_v17, %v6056_v7 }
 0x318   : > { %v7375_v19 = vpop.xlane.xlu1 %1380  ;;  %v6060_v33 = vpop.eup %6059  ;;  %v1136_v45 = vmul.f32 %v7355_v17, %v6058_v21 }
 0x319   : > { %v1137_v59 = vmul.f32 %v7355_v17, %v6060_v33 }
 0x31a   : > { %1246 = vadd.xlane.f32.xlu0 %v1088_v30  ;;  %v808_v30 = vmul.f32 %v6963_v42, %v7393_v8  ;;  %v824_v42 = vmul.f32 %v6960_v41, %v7393_v8  ;;  %v840_v41 = vmul.f32 %v6966_v43, %v7393_v8 }
 0x31b   : > { %1248 = vadd.xlane.f32.xlu1 %v1089_v39  ;;  %v7383_v47 = vpop.xlane.xlu0 %1188 }
 0x31c   : > { %v7385_v58 = vpop.xlane.xlu1 %1412  ;;  %6075 = vtanh.f32 %v808_v30 }
 0x31d   : > { %6077 = vtanh.f32 %v823_v46  ;;  %v855_v46 = vmul.f32 %v6972_v50, %v7298_v36 }
 0x31e   : > { %1278 = vadd.xlane.f32.xlu0 %v1104_v3  ;;  %v6062_v3 = vpop.eup %6061  ;;  %6079 = vtanh.f32 %v824_v42 }
 0x31f   : > { %1280 = vadd.xlane.f32.xlu1 %v1105_v60  ;;  %v7395_v14 = vpop.xlane.xlu0 %1198  ;;  %v6064_v23 = vpop.eup %6063  ;;  %v1152_v7 = vmul.f32 %v7355_v17, %v6062_v3 }
 0x320   : > { %v7397_v18 = vpop.xlane.xlu1 %1200  ;;  %v6066_v10 = vpop.eup %6065  ;;  %v1153_v21 = vmul.f32 %v7355_v17, %v6064_v23 }
 0x321   : > { %v6068_v30 = vpop.eup %6067 }
 0x322   : > { %1310 = vadd.xlane.f32.xlu0 %v1120_v20  ;;  %v839_v20 = vmul.f32 %v6966_v43, %v7298_v36  ;;  %v6070_v3 = vpop.eup %6069  ;;  %v856_v43 = vmul.f32 %v6972_v50, %v7393_v8  ;;  %v1169_v42 = vmul.f32 %v7355_v17, %v6068_v30  ;;  %v872_v50 = vmul.f32 %v6979_v57, %v7393_v8 }
 0x323   : > { %1312 = vadd.xlane.f32.xlu1 %v1121_v52  ;;  %v7405_v37 = vpop.xlane.xlu0 %1230 }
 0x324   : > { %v7407_v39 = vpop.xlane.xlu1 %1232  ;;  %6081 = vtanh.f32 %v839_v20  ;;  %v871_v20 = vmul.f32 %v6979_v57, %v7298_v36  ;;  %v888_v57 = vmul.f32 %v6984_v61, %v7393_v8 }
 0x325   : > { %6083 = vtanh.f32 %v840_v41 }
 0x326   : > { %1342 = vadd.xlane.f32.xlu0 %v1136_v45  ;;  %v1168_v45 = vmul.f32 %v7355_v17, %v6066_v10  ;;  %v1184_v10 = vmul.f32 %v7355_v17, %v6070_v3  ;;  %6085 = vtanh.f32 %v855_v46  ;;  %v887_v46 = vmul.f32 %v6984_v61, %v7298_v36 }
 0x327   : > { %1344 = vadd.xlane.f32.xlu1 %v1137_v59  ;;  %v7415_v60 = vpop.xlane.xlu0 %1262  ;;  %v6072_v59 = vpop.eup %6071  ;;  %6087 = vtanh.f32 %v856_v43  ;;  %v904_v61 = vmul.f32 %v6989_v1, %v7393_v8 }
 0x328   : > { %v7417_v4 = vpop.xlane.xlu1 %1264  ;;  %v1185_v41 = vmul.f32 %v7355_v17, %v6072_v59  ;;  %6089 = vtanh.f32 %v871_v20  ;;  %v903_v20 = vmul.f32 %v6989_v1, %v7298_v36  ;;  %v920_v1 = vmul.f32 %v7000_v9, %v7393_v8 }
 0x329   : > { %6091 = vtanh.f32 %v872_v50 }
 0x32a   : > { %1374 = vadd.xlane.f32.xlu0 %v1152_v7  ;;  %6093 = vtanh.f32 %v887_v46  ;;  %v919_v46 = vmul.f32 %v7000_v9, %v7298_v36 }
 0x32b   : > { %1376 = vadd.xlane.f32.xlu1 %v1153_v21  ;;  %v7425_v52 = vpop.xlane.xlu0 %1294  ;;  %v6074_v21 = vpop.eup %6073  ;;  %6095 = vtanh.f32 %v888_v57 }
 0x32c   : > { %v7427_v33 = vpop.xlane.xlu1 %1296  ;;  %v6076_v30 = vpop.eup %6075  ;;  %v1070_v3 = vmul.f32 %v7355_v17, %v6074_v21  ;;  %6097 = vtanh.f32 %v903_v20 }
 0x32d   : > { %v6078_v29 = vpop.eup %6077  ;;  %v1071_v43 = vmul.f32 %v7355_v17, %v6076_v30  ;;  %6099 = vtanh.f32 %v904_v61 }
 0x32e   : > { %1406 = vadd.xlane.f32.xlu0 %v1168_v45  ;;  %v6080_v59 = vpop.eup %6079  ;;  %v1086_v21 = vmul.f32 %v7355_v17, %v6078_v29  ;;  %6101 = vtanh.f32 %v919_v46 }
 0x32f   : > { %1408 = vadd.xlane.f32.xlu1 %v1169_v42  ;;  %v7435_v23 = vpop.xlane.xlu0 %1326  ;;  %v1087_v50 = vmul.f32 %v7355_v17, %v6080_v59  ;;  %6103 = vtanh.f32 %v920_v1 }
 0x330   : > { %v7437_v7 = vpop.xlane.xlu1 %1328 }
 0x331   : > { %v6082_v38 = vpop.eup %6081 }
 0x332   : > { %1438 = vadd.xlane.f32.xlu0 %v1184_v10  ;;  %v6084_v30 = vpop.eup %6083  ;;  %v1102_v29 = vmul.f32 %v7355_v17, %v6082_v38 }
 0x333   : > { %1440 = vadd.xlane.f32.xlu1 %v1185_v41  ;;  %v7445_v45 = vpop.xlane.xlu0 %1358  ;;  %v1103_v57 = vmul.f32 %v7355_v17, %v6084_v30 }
 0x334   : > { %v7447_v42 = vpop.xlane.xlu1 %1360 }
 0x336   : > { %1210 = vadd.xlane.f32.xlu0 %v1070_v3 }
 0x337   : > { %1212 = vadd.xlane.f32.xlu1 %v1071_v43  ;;  %v7455_v10 = vpop.xlane.xlu0 %1390 }
 0x338   : > { %11292 = vst [vmem:[#allocation29_spill] sm:$0xff] %v7455_v10  ;;  %v7457_v41 = vpop.xlane.xlu1 %1392 }
 0x339   : > { %11293 = vst [vmem:[#allocation30_spill] sm:$0xff] %v7457_v41  ;;  %v6086_v41 = vpop.eup %6085 }
 0x33a   : > { %1242 = vadd.xlane.f32.xlu0 %v1086_v21  ;;  %v6088_v59 = vpop.eup %6087  ;;  %v1118_v38 = vmul.f32 %v7355_v17, %v6086_v41 }
 0x33b   : > { %1244 = vadd.xlane.f32.xlu1 %v1087_v50  ;;  %v7465_v3 = vpop.xlane.xlu0 %1422  ;;  %v6090_v20 = vpop.eup %6089  ;;  %v1119_v36 = vmul.f32 %v7355_v17, %v6088_v59 }
 0x33c   : > { %11294 = vst [vmem:[#allocation31_spill] sm:$0xff] %v7465_v3  ;;  %v7467_v43 = vpop.xlane.xlu1 %1424  ;;  %v1134_v61 = vmul.f32 %v7355_v17, %v6090_v20 }
 0x33d   : > { %11295 = vst [vmem:[#allocation32_spill] sm:$0xff] %v7467_v43  ;;  %v6092_v43 = vpop.eup %6091 }
 0x33e   : > { %1274 = vadd.xlane.f32.xlu0 %v1102_v29  ;;  %v6094_v30 = vpop.eup %6093  ;;  %v1135_v29 = vmul.f32 %v7355_v17, %v6092_v43 }
 0x33f   : > { %1276 = vadd.xlane.f32.xlu1 %v1103_v57  ;;  %v7475_v21 = vpop.xlane.xlu0 %1194  ;;  %v6096_v57 = vpop.eup %6095  ;;  %v1150_v1 = vmul.f32 %v7355_v17, %v6094_v30 }
 0x340   : > { %v7477_v50 = vpop.xlane.xlu1 %1196  ;;  %v6098_v59 = vpop.eup %6097 }
 0x341   : > { %11296 = vst [vmem:[#allocation33_spill] sm:$0xff] %v7477_v50  ;;  %v1166_v43 = vmul.f32 %v7355_v17, %v6098_v59 }
 0x342   : > { %1306 = vadd.xlane.f32.xlu0 %v1118_v38  ;;  %v1151_v38 = vmul.f32 %v7355_v17, %v6096_v57 }
 0x343   : > { %1308 = vadd.xlane.f32.xlu1 %v1119_v36  ;;  %v7481_v9 = vpop.xlane.xlu0 %1226  ;;  %v6100_v36 = vpop.eup %6099 }
 0x344   : > { %v7483_v8 = vpop.xlane.xlu1 %1228 }
 0x345   : > { %11297 = vst [vmem:[#allocation34_spill] sm:$0xff] %v7483_v8 }
 0x346   : > { %1338 = vadd.xlane.f32.xlu0 %v1134_v61  ;;  %v6102_v61 = vpop.eup %6101 }
 0x347   : > { %1340 = vadd.xlane.f32.xlu1 %v1135_v29  ;;  %v7487_v41 = vpop.xlane.xlu0 %1258  ;;  %v1167_v29 = vmul.f32 %v7355_v17, %v6100_v36  ;;  %v6104_v8 = vpop.eup %6103  ;;  %v1182_v57 = vmul.f32 %v7355_v17, %v6102_v61 }
 0x348   : > { %11298 = vst [vmem:[#allocation35_spill] sm:$0xff] %v7487_v41  ;;  %v7489_v46 = vpop.xlane.xlu1 %1260 }
 0x349   : > { %11299 = vst [vmem:[#allocation36_spill] sm:$0xff] %v7489_v46 }
 0x34a   : > { %1370 = vadd.xlane.f32.xlu0 %v1150_v1  ;;  %v1183_v1 = vmul.f32 %v7355_v17, %v6104_v8 }
 0x34b   : > { %1372 = vadd.xlane.f32.xlu1 %v1151_v38  ;;  %v7493_v3 = vpop.xlane.xlu0 %1290 }
 0x34c   : > { %11300 = vst [vmem:[#allocation37_spill] sm:$0xff] %v7493_v3  ;;  %v7495_v20 = vpop.xlane.xlu1 %1292 }
 0x34d   : > { %11301 = vst [vmem:[#allocation38_spill] sm:$0xff] %v7495_v20 }
 0x34e   : > { %1402 = vadd.xlane.f32.xlu0 %v1166_v43 }
 0x34f   : > { %1404 = vadd.xlane.f32.xlu1 %v1167_v29  ;;  %v7499_v46 = vpop.xlane.xlu0 %1322 }
 0x350   : > { %11302 = vst [vmem:[#allocation39_spill] sm:$0xff] %v7499_v46  ;;  %v7501_v30 = vpop.xlane.xlu1 %1324 }
 0x351   : > { %11303 = vst [vmem:[#allocation40_spill] sm:$0xff] %v7501_v30 }
 0x352   : > { %1434 = vadd.xlane.f32.xlu0 %v1182_v57 }
 0x353   : > { %1436 = vadd.xlane.f32.xlu1 %v1183_v1  ;;  %v7505_v38 = vpop.xlane.xlu0 %1354 }
 0x354   : > { %11304 = vst [vmem:[#allocation41_spill] sm:$0xff] %v7505_v38  ;;  %v7507_v20 = vpop.xlane.xlu1 %1356 }
 0x355   : > { %11305 = vst [vmem:[#allocation42_spill] sm:$0xff] %v7507_v20 }
 0x357   : > { %v7509_v59 = vpop.xlane.xlu0 %1386 }
 0x358   : > { %11306 = vst [vmem:[#allocation43_spill] sm:$0xff] %v7509_v59  ;;  %v7511_v36 = vpop.xlane.xlu1 %1388 }
 0x359   : > { %11307 = vst [vmem:[#allocation44_spill] sm:$0xff] %v7511_v36 }
 0x35b   : > { %v7513_v43 = vpop.xlane.xlu0 %1418 }
 0x35c   : > { %11308 = vst [vmem:[#allocation45_spill] sm:$0xff] %v7513_v43  ;;  %v7515_v29 = vpop.xlane.xlu1 %1420 }
 0x35d   : > { %11309 = vst [vmem:[#allocation46_spill] sm:$0xff] %v7515_v29 }
 0x35f   : > { %v7517_v46 = vpop.xlane.xlu0 %1206 }
 0x360   : > { %11310 = vst [vmem:[#allocation47_spill] sm:$0xff] %v7517_v46  ;;  %v7519_v30 = vpop.xlane.xlu1 %1208 }
 0x361   : > { %11311 = vst [vmem:[#allocation48_spill] sm:$0xff] %v7519_v30 }
 0x363   : > { %v7521_v61 = vpop.xlane.xlu0 %1238 }
 0x364   : > { %11312 = vst [vmem:[#allocation49_spill] sm:$0xff] %v7521_v61  ;;  %v7523_v17 = vpop.xlane.xlu1 %1240  ;;  %v11322_v61 = vlaneseq }
 0x365   : > { %11313 = vst [vmem:[#allocation50_spill] sm:$0xff] %v7523_v17 }
 0x366   : > { %v7542_v29 = vand.u32 127, %v11322_v61 }
 0x367   : > { %v7525_v8 = vpop.xlane.xlu0 %1270 }
 0x368   : > { %11314 = vst [vmem:[#allocation51_spill] sm:$0xff] %v7525_v8  ;;  %v7527_v57 = vpop.xlane.xlu1 %1272  ;;  %v1735_v61 = vadd.s32 4294967256, %v7542_v29  ;;  %v7577_v41 = vsub.s32 %v7542_v29, %v6953_v31 }
 0x369   : > { %11315 = vst [vmem:[#allocation52_spill] sm:$0xff] %v7527_v57  ;;  %v7550_v57 = vstv %s1442_s24 }
 0x36a   : > { %v7566_v38 = vadd.f32 %v7550_v57, %v7222_v27  ;;  %v7573_v50 = vadd.f32 %v7550_v57, %v7224_v28  ;;  %11331 = vst [vmem:[#allocation67_spill] sm:$0xff] %v7577_v41  ;;  %v1770_v28 = vadd.s32 4294967216, %v7542_v29 }
 0x36b   : > { %v7529_v1 = vpop.xlane.xlu0 %1302 }
 0x36c   : > { %11316 = vst [vmem:[#allocation53_spill] sm:$0xff] %v7529_v1  ;;  %v7531_v20 = vpop.xlane.xlu1 %1304  ;;  %v1714_v1 = vadd.s32 4294967280, %v7542_v29  ;;  %11328 = vst [vmem:[#allocation64_spill] sm:$0xff] %v7566_v38 }
 0x36d   : > { %11317 = vst [vmem:[#allocation54_spill] sm:$0xff] %v7531_v20  ;;  %v1721_v20 = vadd.s32 4294967272, %v7542_v29  ;;  %11330 = vst [vmem:[#allocation66_spill] sm:$0xff] %v7573_v50 }
 0x36f   : > { %v7533_v36 = vpop.xlane.xlu0 %1334  ;;  %v7569_v3 = vsub.s32 %v1721_v20, %v6953_v31 }
 0x370   : > { %11318 = vst [vmem:[#allocation55_spill] sm:$0xff] %v7533_v36  ;;  %v7535_v43 = vpop.xlane.xlu1 %1336  ;;  %v1742_v36 = vadd.s32 4294967248, %v7542_v29 }
 0x371   : > { %11319 = vst [vmem:[#allocation56_spill] sm:$0xff] %v7535_v43  ;;  %v1707_v43 = vadd.s32 4294967288, %v7542_v29  ;;  %11329 = vst [vmem:[#allocation65_spill] sm:$0xff] %v7569_v3 }
 0x373   : > { %v7537_v46 = vpop.xlane.xlu0 %1366 }
 0x374   : > { %11320 = vst [vmem:[#allocation57_spill] sm:$0xff] %v7537_v46  ;;  %v7539_v30 = vpop.xlane.xlu1 %1368  ;;  %v1749_v46 = vadd.s32 4294967240, %v7542_v29 }
 0x375   : > { %11321 = vst [vmem:[#allocation58_spill] sm:$0xff] %v7539_v30  ;;  %v1728_v30 = vadd.s32 4294967264, %v7542_v29 }
 0x376   : > { %v7586_v27 = vsub.s32 %v1749_v46, %v6953_v31  ;;  %v7607_v46 = vadd.f32 %v7550_v57, %v7242_v40 }
 0x377   : > { %v7544_v17 = vpop.xlane.xlu0 %1398  ;;  %v7589_v20 = vsub.s32 %v1728_v30, %v6953_v31  ;;  %v1777_v30 = vadd.s32 4294967208, %v7542_v29 }
 0x378   : > { %11323 = vst [vmem:[#allocation59_spill] sm:$0xff] %v7544_v17  ;;  %v7546_v8 = vpop.xlane.xlu1 %1400  ;;  %11334 = vst [vmem:[#allocation70_spill] sm:$0xff] %v7586_v27 }
 0x379   : > { %11324 = vst [vmem:[#allocation60_spill] sm:$0xff] %v7546_v8  ;;  %v7562_v8 = vsub.s32 %v1714_v1, %v6953_v31  ;;  %v7583_v1 = vsub.s32 %v1742_v36, %v6953_v31  ;;  %11335 = vst [vmem:[#allocation71_spill] sm:$0xff] %v7589_v20  ;;  %v7603_v36 = vadd.f32 %v7550_v57, %v7234_v25 }
 0x37a   : > { %11340 = vst [vmem:[#allocation76_spill] sm:$0xff] %v7607_v46  ;;  %v7624_v25 = vadd.f32 %v7550_v57, %v7254_v54  ;;  %v7646_v54 = vadd.f32 %v7550_v57, %v7282_v22  ;;  %v7664_v20 = vsub.s32 %v1777_v30, %v6953_v31  ;;  %v7696_v30 = vadd.f32 %v7550_v57, %v7330_v16 }
 0x37b   : > { %v7557_v59 = vpop.xlane.xlu0 %1430  ;;  %11327 = vst [vmem:[#allocation63_spill] sm:$0xff] %v7562_v8  ;;  %11333 = vst [vmem:[#allocation69_spill] sm:$0xff] %v7583_v1 }
 0x37c   : > { %11325 = vst [vmem:[#allocation61_spill] sm:$0xff] %v7557_v59  ;;  %v7559_v17 = vpop.xlane.xlu1 %1432  ;;  %v7592_v59 = vsub.s32 %v1735_v61, %v6953_v31  ;;  %11339 = vst [vmem:[#allocation75_spill] sm:$0xff] %v7603_v36 }
 0x37d   : > { %11326 = vst [vmem:[#allocation62_spill] sm:$0xff] %v7559_v17  ;;  %v7580_v17 = vsub.s32 %v1707_v43, %v6953_v31  ;;  %v7599_v43 = vadd.f32 %v7550_v57, %v7232_v24  ;;  %v7620_v24 = vadd.f32 %v7550_v57, %v7252_v53  ;;  %11344 = vst [vmem:[#allocation80_spill] sm:$0xff] %v7624_v25 }
 0x37e   : > { %11336 = vst [vmem:[#allocation72_spill] sm:$0xff] %v7592_v59  ;;  %v7634_v59 = vadd.f32 %v7550_v57, %v7264_v0  ;;  %v7642_v53 = vadd.f32 %v7550_v57, %v7274_v12  ;;  %11349 = vst [vmem:[#allocation85_spill] sm:$0xff] %v7646_v54  ;;  %v7653_v0 = vsub.s32 %v1770_v28, %v6953_v31 }
 0x37f   : > { %11332 = vst [vmem:[#allocation68_spill] sm:$0xff] %v7580_v17  ;;  %v7595_v10 = vpop.xlane.xlu0 %1202  ;;  %11338 = vst [vmem:[#allocation74_spill] sm:$0xff] %v7599_v43  ;;  %v7676_v12 = vadd.f32 %v7550_v57, %v7294_v34  ;;  %v7686_v28 = vadd.f32 %v7550_v57, %v7320_v2  ;;  %v7702_v2 = vadd.f32 %v7550_v57, %v7296_v35 }
 0x380   : > { %11337 = vst [vmem:[#allocation73_spill] sm:$0xff] %v7595_v10  ;;  %v7610_v61 = vpop.xlane.xlu1 %1204  ;;  %v7616_v10 = vadd.f32 %v7550_v57, %v7244_v44  ;;  %11343 = vst [vmem:[#allocation79_spill] sm:$0xff] %v7620_v24  ;;  %v7638_v44 = vadd.f32 %v7550_v57, %v7272_v11  ;;  %v7706_v11 = vadd.f32 %v7550_v57, %v7306_v49 }
 0x381   : > { %11341 = vst [vmem:[#allocation77_spill] sm:$0xff] %v7610_v61  ;;  %v7630_v61 = vadd.f32 %v7550_v57, %v7262_v63  ;;  %11346 = vst [vmem:[#allocation82_spill] sm:$0xff] %v7634_v59  ;;  %v7650_v63 = vadd.f32 %v7550_v57, %v7284_v51  ;;  %v7710_v34 = vadd.f32 %v7550_v57, %v7340_v32 }
 0x382   : > { %11342 = vst [vmem:[#allocation78_spill] sm:$0xff] %v7616_v10  ;;  %11347 = vst [vmem:[#allocation83_spill] sm:$0xff] %v7638_v44  ;;  %v7722_v35 = vadd.f32 %v7550_v57, %v7318_v62  ;;  %v7726_v49 = vadd.f32 %v7550_v57, %v7365_v6  ;;  %v7730_v32 = vadd.f32 %v7550_v57, %v7375_v19 }
 0x383   : > { %11345 = vst [vmem:[#allocation81_spill] sm:$0xff] %v7630_v61  ;;  %11348 = vst [vmem:[#allocation84_spill] sm:$0xff] %v7642_v53  ;;  %v7655_v40 = vpop.xlane.xlu0 %1234  ;;  %v7744_v62 = vadd.f32 %v7550_v57, %v7383_v47  ;;  %v1898_v6 = vrot.slane %v7696_v30, %v7580_v17  ;;  %v7750_v19 = vadd.f32 %v7550_v57, %v7348_v48 }
 0x384   : > { %11350 = vst [vmem:[#allocation86_spill] sm:$0xff] %v7650_v63  ;;  %11351 = vst [vmem:[#allocation87_spill] sm:$0xff] %v7653_v0  ;;  %v7666_v51 = vpop.xlane.xlu1 %1236  ;;  %v1815_v47 = vrot.slane %v7706_v11, %v7577_v41 }
 0x385   : > { %11352 = vst [vmem:[#allocation88_spill] sm:$0xff] %v7655_v40  ;;  %11353 = vst [vmem:[#allocation89_spill] sm:$0xff] %v7664_v20  ;;  %v7714_v40 = vadd.f32 %v7550_v57, %v7350_v56  ;;  %v1819_v56 = vrot.slane %v7686_v28, %v7580_v17 }
 0x386   : > { %11354 = vst [vmem:[#allocation90_spill] sm:$0xff] %v7666_v51  ;;  %11355 = vst [vmem:[#allocation91_spill] sm:$0xff] %v7676_v12  ;;  %v1706_v51 = vrot.slane %v7676_v12, %v7577_v41  ;;  %v7740_v12 = vadd.f32 %v7550_v57, %v7338_v26  ;;  %v7758_v26 = vadd.f32 %v7550_v57, %v7385_v58 }
 0x387   : > { %11356 = vst [vmem:[#allocation92_spill] sm:$0xff] %v7686_v28  ;;  %11357 = vst [vmem:[#allocation93_spill] sm:$0xff] %v7696_v30  ;;  %v7698_v22 = vpop.xlane.xlu0 %1266  ;;  %v1977_v30 = vrot.slane %v7710_v34, %v7580_v17  ;;  %v2056_v48 = vrot.slane %v7714_v40, %v7580_v17  ;;  %v2135_v58 = vrot.slane %v7726_v49, %v7580_v17 }
 0x388   : > { %11358 = vst [vmem:[#allocation94_spill] sm:$0xff] %v7698_v22  ;;  %11359 = vst [vmem:[#allocation95_spill] sm:$0xff] %v7702_v2  ;;  %v7716_v16 = vpop.xlane.xlu1 %1268  ;;  %v1756_v22 = vadd.s32 4294967232, %v7542_v29 }
 0x389   : > { %11360 = vst [vmem:[#allocation96_spill] sm:$0xff] %v7706_v11  ;;  %11361 = vst [vmem:[#allocation97_spill] sm:$0xff] %v7710_v34  ;;  %v2214_v34 = vrot.slane %v7730_v32, %v7580_v17  ;;  %v1820_v11 = vsel %vm1712_vm3, %v1819_v56, %v1815_v47  ;;  %v2293_v56 = vrot.slane %v7758_v26, %v7580_v17 }
 0x38a   : > { %11362 = vst [vmem:[#allocation98_spill] sm:$0xff] %v7714_v40  ;;  %11363 = vst [vmem:[#allocation99_spill] sm:$0xff] %v7716_v16  ;;  %v7736_v16 = vadd.f32 %v7550_v57, %v7328_v15  ;;  %v7754_v15 = vadd.f32 %v7550_v57, %v7363_v5  ;;  %v1894_v5 = vrot.slane %v7722_v35, %v7577_v41 }
 0x38b   : > { %11364 = vst [vmem:[#allocation100_spill] sm:$0xff] %v7722_v35  ;;  %11365 = vst [vmem:[#allocation101_spill] sm:$0xff] %v7726_v49  ;;  %v7760_v28 = vpop.xlane.xlu0 %1298  ;;  %v1711_v35 = vrot.slane %v7744_v62, %v7580_v17 }
 0x38c   : > { %11366 = vst [vmem:[#allocation102_spill] sm:$0xff] %v7730_v32  ;;  %11367 = vst [vmem:[#allocation103_spill] sm:$0xff] %v7736_v16  ;;  %v7769_v20 = vpop.xlane.xlu1 %1300  ;;  %v1973_v40 = vrot.slane %v7736_v16, %v7577_v41  ;;  %v1899_v49 = vsel %vm1712_vm3, %v1898_v6, %v1894_v5  ;;  %v2210_v0 = vrot.slane %v7754_v15, %v7577_v41  ;;  %v1763_v6 = vadd.s32 4294967224, %v7542_v29 }
 0x38d   : > { %11368 = vst [vmem:[#allocation104_spill] sm:$0xff] %v7740_v12  ;;  %11369 = vst [vmem:[#allocation105_spill] sm:$0xff] %v7744_v62  ;;  %v7799_v32 = vadd.f32 %v7550_v57, %v7310_v55  ;;  %v11377_v55 = vrot.slane %v7566_v38, %v7562_v8  ;;  %v11431_v38 = vld [vmem:[#allocation72_spill] sm:$0xff] }
 0x38e   : > { %11370 = vst [vmem:[#allocation106_spill] sm:$0xff] %v7750_v19  ;;  %11371 = vst [vmem:[#allocation107_spill] sm:$0xff] %v7754_v15  ;;  %v2224_v15 = vrot.slane %v7702_v2, %v7569_v3  ;;  %v7822_v2 = vsub.s32 %v1756_v22, %v6953_v31 }
 0x38f   : > { %11372 = vst [vmem:[#allocation108_spill] sm:$0xff] %v7758_v26  ;;  %11373 = vst [vmem:[#allocation109_spill] sm:$0xff] %v7760_v28  ;;  %v7777_v28 = vadd.f32 %v7550_v57, %v7373_v13  ;;  %v2131_v13 = vrot.slane %v7750_v19, %v7577_v41  ;;  %v7795_v47 = vpop.xlane.xlu0 %1330  ;;  %v2215_v26 = vsel %vm1712_vm3, %v2214_v34, %v2210_v0 }
 0x390   : > { %11374 = vst [vmem:[#allocation110_spill] sm:$0xff] %v7769_v20  ;;  %v2052_v20 = vrot.slane %v7740_v12, %v7577_v41  ;;  %11376 = vst [vmem:[#allocation112_spill] sm:$0xff] %v7799_v32  ;;  %v1978_v12 = vsel %vm1712_vm3, %v1977_v30, %v1973_v40  ;;  %v7804_v5 = vpop.xlane.xlu1 %1332  ;;  %v1825_v40 = vsel %vm1719_vm4, %v11377_v55, %v1820_v11 }
 0x391   : > { %11375 = vst [vmem:[#allocation111_spill] sm:$0xff] %v7777_v28  ;;  %v2136_v19 = vsel %vm1712_vm3, %v2135_v58, %v2131_v13  ;;  %v2289_v17 = vrot.slane %v7777_v28, %v7577_v41  ;;  %11379 = vst [vmem:[#allocation113_spill] sm:$0xff] %v7822_v2  ;;  %v11380_v58 = vrot.slane %v7607_v46, %v7562_v8  ;;  %v11414_v28 = vld [vmem:[#allocation33_spill] sm:$0xff] }
 0x392   : > { %v2057_v16 = vsel %vm1712_vm3, %v2056_v48, %v2052_v20  ;;  %v11378_v20 = vrot.slane %v7599_v43, %v7562_v8  ;;  %v1713_v48 = vsel %vm1712_vm3, %v1711_v35, %v1706_v51  ;;  %v11381_v34 = vrot.slane %v7620_v24, %v7562_v8  ;;  %v11422_v24 = vld [vmem:[#allocation37_spill] sm:$0xff] }
 0x393   : > { %v1983_v0 = vsel %vm1719_vm4, %v11380_v58, %v1978_v12  ;;  %v2294_v13 = vsel %vm1712_vm3, %v2293_v56, %v2289_v17  ;;  %v7837_v51 = vpop.xlane.xlu0 %1362  ;;  %v2303_v22 = vrot.slane %v7799_v32, %v7569_v3  ;;  %v11383_v35 = vrot.slane %v7630_v61, %v7562_v8  ;;  %v11416_v32 = vld [vmem:[#allocation34_spill] sm:$0xff]  ;;  %v11427_v43 = vld [vmem:[#allocation41_spill] sm:$0xff] }
 0x394   : > { %v1904_v30 = vsel %vm1719_vm4, %v11378_v20, %v1899_v49  ;;  %v2062_v11 = vsel %vm1719_vm4, %v11381_v34, %v2057_v16  ;;  %v7835_v49 = vadd.f32 %v7550_v57, %v7395_v14  ;;  %v11384_v55 = vrot.slane %v7638_v44, %v7562_v8  ;;  %v7852_v14 = vpop.xlane.xlu1 %1364  ;;  %v11418_v61 = vld [vmem:[#allocation30_spill] sm:$0xff] }
 0x395   : > { %v2141_v12 = vsel %vm1719_vm4, %v11383_v35, %v2136_v19  ;;  %v7850_v17 = vsub.s32 %v1763_v6, %v6953_v31  ;;  %v11386_v56 = vrot.slane %v7573_v50, %v7562_v8  ;;  %v7860_v58 = vadd.f32 %v7550_v57, %v7397_v18 }
 0x396   : > { %11382 = vst [vmem:[#allocation114_spill] sm:$0xff] %v7835_v49  ;;  %v2220_v16 = vsel %vm1719_vm4, %v11384_v55, %v2215_v26  ;;  %v11388_v19 = vrot.slane %v7616_v10, %v7569_v3  ;;  %v11389_v26 = vrot.slane %v7624_v25, %v7569_v3  ;;  %v11390_v35 = vrot.slane %v7646_v54, %v7562_v8  ;;  %v11413_v54 = vld [vmem:[#allocation71_spill] sm:$0xff] }
 0x397   : > { %11385 = vst [vmem:[#allocation115_spill] sm:$0xff] %v7850_v17  ;;  %v1720_v20 = vsel %vm1719_vm4, %v11386_v56, %v1713_v48  ;;  %11387 = vst [vmem:[#allocation116_spill] sm:$0xff] %v7860_v58  ;;  %v11391_v18 = vrot.slane %v7634_v59, %v7569_v3  ;;  %v8010_v41 = vadd.f32 %v7550_v57, %v11416_v32  ;;  %v11425_v59 = vld [vmem:[#allocation39_spill] sm:$0xff] }
 0x398   : > { %v7866_v34 = vsel %vm1726_vm5, %v11388_v19, %v1825_v40  ;;  %v7872_v6 = vsel %vm1726_vm5, %v11389_v26, %v1904_v30  ;;  %v2299_v48 = vsel %vm1719_vm4, %v11390_v35, %v2294_v13  ;;  %v11392_v40 = vrot.slane %v7642_v53, %v7569_v3  ;;  %v7902_v35 = vpop.xlane.xlu0 %1394  ;;  %v11429_v25 = vld [vmem:[#allocation31_spill] sm:$0xff] }
 0x399   : > { %v7882_v55 = vsel %vm1726_vm5, %v11391_v18, %v1983_v0  ;;  %v1798_v30 = vadd.s32 4294967184, %v7542_v29  ;;  %v11393_v13 = vrot.slane %v7650_v63, %v7569_v3  ;;  %v7900_v0 = vsel %vm1726_vm5, %v2224_v15, %v2220_v16  ;;  %v7921_v16 = vpop.xlane.xlu1 %1396  ;;  %11417 = vst [vmem:[#allocation34_spill] sm:$0xff] %v8010_v41  ;;  %v11432_v10 = vld [vmem:[#allocation43_spill] sm:$0xff] }
 0x39a   : > { %v7888_v56 = vsel %vm1726_vm5, %v11392_v40, %v2062_v11  ;;  %v1805_v11 = vadd.s32 4294967176, %v7542_v29  ;;  %v7907_v18 = vadd.f32 %v7550_v57, %v7405_v37  ;;  %v7911_v40 = vadd.f32 %v7550_v57, %v7407_v39 }
 0x39b   : > { %v7897_v26 = vsel %vm1726_vm5, %v11393_v13, %v2141_v12  ;;  %v7915_v19 = vadd.f32 %v7550_v57, %v7415_v60  ;;  %v11397_v15 = vrot.slane %v7603_v36, %v7569_v3  ;;  %v7927_v37 = vadd.f32 %v7550_v57, %v7417_v4  ;;  %v11436_v36 = vld [vmem:[#allocation45_spill] sm:$0xff] }
 0x39c   : > { %11394 = vst [vmem:[#allocation117_spill] sm:$0xff] %v7907_v18  ;;  %11395 = vst [vmem:[#allocation118_spill] sm:$0xff] %v7911_v40  ;;  %v7931_v39 = vadd.f32 %v7550_v57, %v7425_v52  ;;  %v7934_v60 = vsel %vm1726_vm5, %v2303_v22, %v2299_v48  ;;  %v7938_v3 = vadd.f32 %v7550_v57, %v7427_v33  ;;  %v11409_v48 = vld [vmem:[#allocation29_spill] sm:$0xff] }
 0x39d   : > { %11396 = vst [vmem:[#allocation119_spill] sm:$0xff] %v7915_v19  ;;  %v1727_v12 = vsel %vm1726_vm5, %v11397_v15, %v1720_v20  ;;  %11398 = vst [vmem:[#allocation120_spill] sm:$0xff] %v7927_v37  ;;  %v7942_v20 = vadd.f32 %v7550_v57, %v7435_v23  ;;  %v7946_v15 = vadd.f32 %v7550_v57, %v7475_v21  ;;  %v7963_v23 = vpop.xlane.xlu0 %1426 }
 0x39e   : > { %11399 = vst [vmem:[#allocation121_spill] sm:$0xff] %v7931_v39  ;;  %11400 = vst [vmem:[#allocation122_spill] sm:$0xff] %v7938_v3  ;;  %v7949_v4 = vsub.s32 %v1798_v30, %v6953_v31  ;;  %v7953_v52 = vadd.f32 %v7550_v57, %v7437_v7  ;;  %v7957_v22 = vadd.f32 %v7550_v57, %v7445_v45  ;;  %v11411_v7 = vld [vmem:[#allocation35_spill] sm:$0xff] }
 0x39f   : > { %11401 = vst [vmem:[#allocation123_spill] sm:$0xff] %v7942_v20  ;;  %11402 = vst [vmem:[#allocation124_spill] sm:$0xff] %v7946_v15  ;;  %v7961_v33 = vadd.f32 %v7550_v57, %v7481_v9  ;;  %v7966_v21 = vsub.s32 %v1805_v11, %v6953_v31  ;;  %v7976_v45 = vadd.f32 %v7550_v57, %v7447_v42  ;;  %v7978_v9 = vpop.xlane.xlu1 %1428 }
 0x3a0   : > { %11403 = vst [vmem:[#allocation125_spill] sm:$0xff] %v7949_v4  ;;  %11404 = vst [vmem:[#allocation126_spill] sm:$0xff] %v7953_v52  ;;  %v7986_v8 = vadd.f32 %v7550_v57, %v11409_v48  ;;  %v7990_v30 = vadd.f32 %v7550_v57, %v11411_v7  ;;  %v1732_v11 = vrot.slane %v7946_v15, %v11413_v54  ;;  %v11420_v48 = vld [vmem:[#allocation36_spill] sm:$0xff]  ;;  %v11434_v15 = vld [vmem:[#allocation38_spill] sm:$0xff] }
 0x3a1   : > { %11405 = vst [vmem:[#allocation127_spill] sm:$0xff] %v7957_v22  ;;  %11406 = vst [vmem:[#allocation128_spill] sm:$0xff] %v7961_v33  ;;  %v8000_v13 = vadd.f32 %v7550_v57, %v11414_v28  ;;  %v1834_v42 = vrot.slane %v7961_v33, %v11413_v54  ;;  %v8012_v44 = vpop.xlane.xlu0 %1214  ;;  %v8018_v63 = vadd.f32 %v7550_v57, %v11418_v61 }
 0x3a2   : > { %11407 = vst [vmem:[#allocation129_spill] sm:$0xff] %v7966_v21  ;;  %11408 = vst [vmem:[#allocation130_spill] sm:$0xff] %v7976_v45  ;;  %v8022_v7 = vadd.f32 %v7550_v57, %v11420_v48  ;;  %v8026_v53 = vadd.f32 %v7550_v57, %v11422_v24  ;;  %v1913_v28 = vrot.slane %v7990_v30, %v11413_v54 }
 0x3a3   : > { %11410 = vst [vmem:[#allocation29_spill] sm:$0xff] %v7986_v8  ;;  %11412 = vst [vmem:[#allocation35_spill] sm:$0xff] %v7990_v30  ;;  %v8028_v46 = vpop.xlane.xlu1 %1216  ;;  %v8036_v61 = vadd.f32 %v7550_v57, %v11425_v59  ;;  %v8040_v48 = vadd.f32 %v7550_v57, %v11427_v43  ;;  %v8044_v24 = vadd.f32 %v7550_v57, %v11429_v25 }
 0x3a4   : > { %11415 = vst [vmem:[#allocation33_spill] sm:$0xff] %v8000_v13  ;;  %11419 = vst [vmem:[#allocation30_spill] sm:$0xff] %v8018_v63  ;;  %v1734_v33 = vsel %vm1733_vm6, %v1732_v11, %v1727_v12  ;;  %v1739_v32 = vrot.slane %v8000_v13, %v11431_v38  ;;  %v8051_v30 = vadd.f32 %v7550_v57, %v11432_v10 }
 0x3a5   : > { %11421 = vst [vmem:[#allocation36_spill] sm:$0xff] %v8022_v7  ;;  %11423 = vst [vmem:[#allocation37_spill] sm:$0xff] %v8026_v53  ;;  %v1835_v59 = vsel %vm1733_vm6, %v1834_v42, %v7866_v34  ;;  %v1839_v43 = vrot.slane %v8010_v41, %v11431_v38  ;;  %v8059_v25 = vadd.f32 %v7550_v57, %v11434_v15  ;;  %v8065_v11 = vpop.xlane.xlu0 %1246  ;;  %v11439_v34 = vld [vmem:[#allocation40_spill] sm:$0xff]  ;;  %v11441_v41 = vld [vmem:[#allocation42_spill] sm:$0xff] }
 0x3a6   : > { %11424 = vst [vmem:[#allocation131_spill] sm:$0xff] %v8028_v46  ;;  %11426 = vst [vmem:[#allocation39_spill] sm:$0xff] %v8036_v61  ;;  %v8063_v12 = vadd.f32 %v7550_v57, %v11436_v36  ;;  %v1918_v10 = vrot.slane %v8022_v7, %v11431_v38  ;;  %v1992_v13 = vrot.slane %v8026_v53, %v11413_v54  ;;  %v11444_v53 = vld [vmem:[#allocation44_spill] sm:$0xff] }
 0x3a7   : > { %11428 = vst [vmem:[#allocation41_spill] sm:$0xff] %v8040_v48  ;;  %11430 = vst [vmem:[#allocation31_spill] sm:$0xff] %v8044_v24  ;;  %v8073_v42 = vadd.f32 %v7550_v57, %v11439_v34  ;;  %v8077_v15 = vadd.f32 %v7550_v57, %v11441_v41  ;;  %v8079_v50 = vpop.xlane.xlu1 %1248  ;;  %v1914_v36 = vsel %vm1733_vm6, %v1913_v28, %v7872_v6  ;;  %v11446_v34 = vld [vmem:[#allocation32_spill] sm:$0xff]  ;;  %v1784_v28 = vadd.s32 4294967200, %v7542_v29 }
 0x3a8   : > { %11433 = vst [vmem:[#allocation43_spill] sm:$0xff] %v8051_v30  ;;  %11435 = vst [vmem:[#allocation38_spill] sm:$0xff] %v8059_v25  ;;  %v2071_v62 = vrot.slane %v8036_v61, %v11413_v54  ;;  %v2150_v7 = vrot.slane %v8040_v48, %v11413_v54  ;;  %v8089_v21 = vadd.f32 %v7550_v57, %v11444_v53 }
 0x3a9   : > { %11437 = vst [vmem:[#allocation45_spill] sm:$0xff] %v8063_v12  ;;  %11438 = vst [vmem:[#allocation132_spill] sm:$0xff] %v8065_v11  ;;  %v8093_v4 = vadd.f32 %v7550_v57, %v11446_v34  ;;  %v2229_v41 = vrot.slane %v8051_v30, %v11413_v54  ;;  %v1741_v61 = vsel %vm1740_vm7, %v1739_v32, %v1734_v33  ;;  %v8108_v11 = vpop.xlane.xlu0 %1278 }
 0x3aa   : > { %11440 = vst [vmem:[#allocation40_spill] sm:$0xff] %v8073_v42  ;;  %11442 = vst [vmem:[#allocation42_spill] sm:$0xff] %v8077_v15  ;;  %v1840_v48 = vsel %vm1740_vm7, %v1839_v43, %v1835_v59  ;;  %v1997_v53 = vrot.slane %v8059_v25, %v11431_v38  ;;  %v2308_v34 = vrot.slane %v8063_v12, %v11413_v54 }
 0x3ab   : > { %11443 = vst [vmem:[#allocation133_spill] sm:$0xff] %v8079_v50  ;;  %11445 = vst [vmem:[#allocation44_spill] sm:$0xff] %v8089_v21  ;;  %v11448_v50 = vld [vmem:[#allocation46_spill] sm:$0xff]  ;;  %v1919_v30 = vsel %vm1740_vm7, %v1918_v10, %v1914_v36  ;;  %v2076_v46 = vrot.slane %v8073_v42, %v11431_v38  ;;  %v2155_v33 = vrot.slane %v8077_v15, %v11431_v38  ;;  %v8117_v32 = vpop.xlane.xlu1 %1280  ;;  %v1791_v36 = vadd.s32 4294967192, %v7542_v29 }
 0x3ac   : > { %11447 = vst [vmem:[#allocation32_spill] sm:$0xff] %v8093_v4  ;;  %v8099_v6 = vadd.f32 %v7550_v57, %v11448_v50  ;;  %v1993_v50 = vsel %vm1733_vm6, %v1992_v13, %v7882_v55  ;;  %v2072_v59 = vsel %vm1733_vm6, %v2071_v62, %v7888_v56  ;;  %v2151_v43 = vsel %vm1733_vm6, %v2150_v7, %v7897_v26  ;;  %v11489_v42 = vld [vmem:[#allocation58_spill] sm:$0xff] }
 0x3ad   : > { %v2234_v10 = vrot.slane %v8089_v21, %v11431_v38  ;;  %v2244_v55 = vrot.slane %v8018_v63, %v7586_v27  ;;  %v11450_v13 = vrot.slane %v7835_v49, %v7583_v1  ;;  %v2230_v12 = vsel %vm1733_vm6, %v2229_v41, %v7900_v0 }
 0x3ae   : > { %11449 = vst [vmem:[#allocation46_spill] sm:$0xff] %v8099_v6  ;;  %v2313_v62 = vrot.slane %v8099_v6, %v11431_v38  ;;  %v11451_v56 = vrot.slane %v7907_v18, %v7583_v1  ;;  %v11452_v29 = vrot.slane %v7915_v19, %v7583_v1  ;;  %v1998_v63 = vsel %vm1740_vm7, %v1997_v53, %v1993_v50  ;;  %v11470_v6 = vld [vmem:[#allocation54_spill] sm:$0xff] }
 0x3af   : > { %v1748_v54 = vsel %vm11172_vm8, %v11450_v13, %v1741_v61  ;;  %v2309_v61 = vsel %vm1733_vm6, %v2308_v34, %v7934_v60  ;;  %v8147_v13 = vpop.xlane.xlu0 %1310  ;;  %v2318_v0 = vrot.slane %v8044_v24, %v7583_v1  ;;  %v2323_v41 = vrot.slane %v8093_v4, %v7586_v27  ;;  %v8155_v38 = vpop.xlane.xlu1 %1312  ;;  %v11467_v4 = vld [vmem:[#allocation52_spill] sm:$0xff]  ;;  %v11498_v19 = vld [vmem:[#allocation90_spill] sm:$0xff] }
 0x3b0   : > { %v1845_v26 = vsel %vm11172_vm8, %v11451_v56, %v1840_v48  ;;  %v1924_v7 = vsel %vm11172_vm8, %v11452_v29, %v1919_v30  ;;  %v2077_v48 = vsel %vm1740_vm7, %v2076_v46, %v2072_v59  ;;  %v2156_v56 = vsel %vm1740_vm7, %v2155_v33, %v2151_v43  ;;  %v11461_v29 = vld [vmem:[#allocation47_spill] sm:$0xff] }
 0x3b1   : > { %v2235_v30 = vsel %vm1740_vm7, %v2234_v10, %v2230_v12  ;;  %v11453_v53 = vrot.slane %v7860_v58, %v7586_v27  ;;  %v8165_v34 = vsub.s32 %v1784_v28, %v6953_v31  ;;  %v8168_v50 = vsub.s32 %v1791_v36, %v6953_v31 }
 0x3b2   : > { %v11456_v46 = vrot.slane %v7931_v39, %v7583_v1  ;;  %v2314_v59 = vsel %vm1740_vm7, %v2313_v62, %v2309_v61  ;;  %v11457_v12 = vrot.slane %v7911_v40, %v7586_v27  ;;  %v11459_v10 = vrot.slane %v7942_v20, %v7583_v1  ;;  %v11462_v61 = vld [vmem:[#allocation48_spill] sm:$0xff]  ;;  %v11492_v39 = vld [vmem:[#allocation59_spill] sm:$0xff]  ;;  %v11501_v40 = vld [vmem:[#allocation110_spill] sm:$0xff] }
 0x3b3   : > { %v8162_v60 = vsel %vm11169_vm9, %v11453_v53, %v1748_v54  ;;  %11454 = vst [vmem:[#allocation134_spill] sm:$0xff] %v8165_v34  ;;  %11455 = vst [vmem:[#allocation135_spill] sm:$0xff] %v8168_v50  ;;  %v11458_v54 = vrot.slane %v7927_v37, %v7586_v27  ;;  %v8201_v53 = vadd.f32 %v7550_v57, %v11462_v61  ;;  %v8221_v61 = vpop.xlane.xlu1 %1344  ;;  %v11499_v37 = vld [vmem:[#allocation99_spill] sm:$0xff] }
 0x3b4   : > { %v2003_v33 = vsel %vm11172_vm8, %v11456_v46, %v1998_v63  ;;  %v8179_v43 = vsel %vm11169_vm9, %v11457_v12, %v1845_v26  ;;  %v2082_v36 = vsel %vm11172_vm8, %v11459_v10, %v2077_v48  ;;  %v11460_v63 = vrot.slane %v7957_v22, %v7583_v1  ;;  %v11464_v12 = vld [vmem:[#allocation49_spill] sm:$0xff] }
 0x3b5   : > { %v8185_v28 = vsel %vm11169_vm9, %v11458_v54, %v1924_v7  ;;  %v8197_v26 = vadd.f32 %v7550_v57, %v11461_v29  ;;  %v8203_v7 = vpop.xlane.xlu0 %1342  ;;  %v11463_v46 = vrot.slane %v7986_v8, %v7583_v1  ;;  %v8211_v54 = vadd.f32 %v7550_v57, %v11464_v12  ;;  %v11471_v8 = vld [vmem:[#allocation55_spill] sm:$0xff] }
 0x3b6   : > { %v2161_v62 = vsel %vm11172_vm8, %v11460_v63, %v2156_v56  ;;  %v11465_v56 = vld [vmem:[#allocation50_spill] sm:$0xff]  ;;  %v11466_v63 = vld [vmem:[#allocation51_spill] sm:$0xff]  ;;  %v2319_v24 = vsel %vm11172_vm8, %v2318_v0, %v2314_v59  ;;  %v8226_v1 = vadd.f32 %v7550_v57, %v11467_v4  ;;  %v11469_v12 = vrot.slane %v7938_v3, %v7586_v27 }
 0x3b7   : > { %v2240_v48 = vsel %vm11172_vm8, %v11463_v46, %v2235_v30  ;;  %v8215_v10 = vadd.f32 %v7550_v57, %v11465_v56  ;;  %v8219_v29 = vadd.f32 %v7550_v57, %v11466_v63  ;;  %v11468_v30 = vld [vmem:[#allocation53_spill] sm:$0xff]  ;;  %v8238_v63 = vadd.f32 %v7550_v57, %v11470_v6  ;;  %v8274_v22 = vpop.xlane.xlu1 %1376 }
 0x3b8   : > { %v8230_v46 = vadd.f32 %v7550_v57, %v11468_v30  ;;  %v2008_v56 = vsel %vm11169_vm9, %v11469_v12, %v2003_v33  ;;  %v8242_v0 = vadd.f32 %v7550_v57, %v11471_v8  ;;  %v11473_v4 = vrot.slane %v7953_v52, %v7586_v27  ;;  %v11475_v33 = vld [vmem:[#allocation87_spill] sm:$0xff]  ;;  %v11476_v12 = vld [vmem:[#allocation89_spill] sm:$0xff]  ;;  %v11477_v8 = vld [vmem:[#allocation56_spill] sm:$0xff] }
 0x3b9   : > { %v11474_v30 = vrot.slane %v7976_v45, %v7586_v27  ;;  %v8260_v15 = vadd.f32 %v7550_v57, %v11477_v8  ;;  %v2245_v20 = vsel %vm11169_vm9, %v2244_v55, %v2240_v48  ;;  %v8263_v52 = vpop.xlane.xlu0 %1374  ;;  %v11479_v48 = vld [vmem:[#allocation73_spill] sm:$0xff]  ;;  %vm11246_vm8 = vcmask 1046534  }
 0x3ba   : > { %11472 = vst [vmem:[#allocation47_spill] sm:$0xff] %v8242_v0  ;;  %v2087_v59 = vsel %vm11169_vm9, %v11473_v4, %v2082_v36  ;;  %v8282_v36 = vadd.f32 %v7550_v57, %v11479_v48  ;;  %v11483_v4 = vld [vmem:[#allocation94_spill] sm:$0xff]  ;;  %v11485_v55 = vld [vmem:[#allocation109_spill] sm:$0xff] }
 0x3bb   : > { %v8252_v21 = vsel %vm11169_vm9, %v11474_v30, %v2161_v62  ;;  %11478 = vst [vmem:[#allocation48_spill] sm:$0xff] %v8260_v15  ;;  %v8272_v30 = vsel %vm11169_vm9, %v2323_v41, %v2319_v24  ;;  %v11481_v62 = vld [vmem:[#allocation88_spill] sm:$0xff]  ;;  %v8294_v8 = vadd.f32 %v7550_v57, %v11483_v4  ;;  %v8298_v27 = vadd.f32 %v7550_v57, %v11485_v55  ;;  %v11487_v45 = vld [vmem:[#allocation57_spill] sm:$0xff] }
 0x3bc   : > { %11480 = vst [vmem:[#allocation49_spill] sm:$0xff] %v8282_v36  ;;  %v8286_v6 = vadd.f32 %v7550_v57, %v11481_v62  ;;  %v8304_v62 = vadd.f32 %v7550_v57, %v11487_v45  ;;  %v8308_v24 = vadd.f32 %v7550_v57, %v11489_v42  ;;  %v8312_v41 = vadd.f32 %v7550_v57, %v7795_v47  ;;  %v11494_v48 = vld [vmem:[#allocation77_spill] sm:$0xff]  ;;  %v8332_v47 = vpop.xlane.xlu1 %1408 }
 0x3bd   : > { %11484 = vst [vmem:[#allocation51_spill] sm:$0xff] %v8294_v8  ;;  %11486 = vst [vmem:[#allocation52_spill] sm:$0xff] %v8298_v27  ;;  %v8314_v4 = vpop.xlane.xlu0 %1406  ;;  %v8318_v55 = vadd.f32 %v7550_v57, %v11492_v39  ;;  %v8322_v3 = vadd.f32 %v7550_v57, %v11494_v48  ;;  %v8326_v45 = vadd.f32 %v7550_v57, %v7837_v51  ;;  %vm11247_vm9 = vcmask 1045509  }
 0x3be   : > { %11482 = vst [vmem:[#allocation50_spill] sm:$0xff] %v8286_v6  ;;  %11488 = vst [vmem:[#allocation53_spill] sm:$0xff] %v8304_v62  ;;  %v8330_v42 = vadd.f32 %v7550_v57, %v7902_v35  ;;  %v1760_v25 = vrot.slane %v8282_v36, %v7822_v2  ;;  %v1854_v39 = vrot.slane %v8286_v6, %v7822_v2 }
 0x3bf   : > { %11490 = vst [vmem:[#allocation54_spill] sm:$0xff] %v8308_v24  ;;  %11491 = vst [vmem:[#allocation55_spill] sm:$0xff] %v8312_v41  ;;  %v8340_v48 = vadd.f32 %v7550_v57, %v11498_v19  ;;  %v8344_v51 = vadd.f32 %v7550_v57, %v11499_v37  ;;  %v1933_v35 = vrot.slane %v8294_v8, %v7822_v2  ;;  %v11503_v19 = vld [vmem:[#allocation60_spill] sm:$0xff] }
 0x3c0   : > { %11493 = vst [vmem:[#allocation56_spill] sm:$0xff] %v8318_v55  ;;  %11495 = vst [vmem:[#allocation73_spill] sm:$0xff] %v8322_v3  ;;  %v2012_v18 = vrot.slane %v8298_v27, %v7822_v2  ;;  %v8352_v36 = vadd.f32 %v7550_v57, %v11501_v40  ;;  %v8356_v6 = vadd.f32 %v7550_v57, %v7804_v5  ;;  %v8384_v49 = vpop.xlane.xlu1 %1440 }
 0x3c1   : > { %11496 = vst [vmem:[#allocation88_spill] sm:$0xff] %v8326_v45  ;;  %11497 = vst [vmem:[#allocation94_spill] sm:$0xff] %v8330_v42  ;;  %v8360_v58 = vadd.f32 %v7550_v57, %v11503_v19  ;;  %v2091_v37 = vrot.slane %v8312_v41, %v7822_v2  ;;  %v8366_v8 = vadd.f32 %v7550_v57, %v7852_v14  ;;  %v8372_v40 = vpop.xlane.xlu0 %1438 }
 0x3c2   : > { %11500 = vst [vmem:[#allocation109_spill] sm:$0xff] %v8344_v51  ;;  %11502 = vst [vmem:[#allocation57_spill] sm:$0xff] %v8356_v6  ;;  %v8370_v27 = vadd.f32 %v7550_v57, %v7921_v16  ;;  %v1767_v5 = vrot.slane %v8322_v3, %v7850_v17  ;;  %v2170_v19 = vrot.slane %v8326_v45, %v7822_v2 }
 0x3c3   : > { %11504 = vst [vmem:[#allocation58_spill] sm:$0xff] %v8360_v58  ;;  %11505 = vst [vmem:[#allocation59_spill] sm:$0xff] %v8366_v8  ;;  %v2249_v41 = vrot.slane %v8330_v42, %v7822_v2  ;;  %v8382_v14 = vadd.f32 %v7550_v57, %v7963_v23  ;;  %v1762_v16 = vsel %vm11168_vm10, %v1760_v25, %v8162_v60 }
 0x3c4   : > { %11506 = vst [vmem:[#allocation77_spill] sm:$0xff] %v8370_v27  ;;  %11508 = vst [vmem:[#allocation99_spill] sm:$0xff] %v8384_v49  ;;  %v1855_v31 = vsel %vm11168_vm10, %v1854_v39, %v8179_v43  ;;  %v1859_v3 = vrot.slane %v8340_v48, %v7850_v17  ;;  %v1938_v45 = vrot.slane %v8344_v51, %v7850_v17 }
 0x3c5   : > { %11507 = vst [vmem:[#allocation90_spill] sm:$0xff] %v8382_v14  ;;  %v1934_v42 = vsel %vm11168_vm10, %v1933_v35, %v8185_v28  ;;  %v2013_v23 = vsel %vm11168_vm10, %v2012_v18, %v2008_v56  ;;  %v2017_v49 = vrot.slane %v8352_v36, %v7850_v17  ;;  %v2096_v25 = vrot.slane %v8356_v6, %v7850_v17  ;;  %v1211_v28 = vpop.xlane.xlu0 %1210 }
 0x3c6   : > { %v2092_v60 = vsel %vm11168_vm10, %v2091_v37, %v2087_v59  ;;  %v2175_v43 = vrot.slane %v8366_v8, %v7850_v17  ;;  %v2254_v39 = vrot.slane %v8370_v27, %v7850_v17  ;;  %v8408_v51 = vadd.f32 %v7550_v57, %v7978_v9  ;;  %v8416_v37 = vpop.xlane.xlu1 %1212  ;;  %v11510_v8 = vld [vmem:[#allocation61_spill] sm:$0xff] }
 0x3c7   : > { %v1769_v18 = vsel %vm11167_vm11, %v1767_v5, %v1762_v16  ;;  %v2171_v56 = vsel %vm11168_vm10, %v2170_v19, %v8252_v21  ;;  %v2250_v35 = vsel %vm11168_vm10, %v2249_v41, %v2245_v20  ;;  %v2328_v59 = vrot.slane %v8382_v14, %v7822_v2  ;;  %v11512_v21 = vld [vmem:[#allocation62_spill] sm:$0xff] }
 0x3c8   : > { %11509 = vst [vmem:[#allocation110_spill] sm:$0xff] %v8408_v51  ;;  %v2180_v27 = vrot.slane %v8304_v62, %v11475_v33  ;;  %v2185_v9 = vrot.slane %v8308_v24, %v11476_v12  ;;  %v8424_v6 = vadd.f32 %v7550_v57, %v11510_v8  ;;  %v1860_v5 = vsel %vm11167_vm11, %v1859_v3, %v1855_v31 }
 0x3c9   : > { %v8429_v20 = vadd.f32 %v7550_v57, %v11512_v21  ;;  %v1939_v41 = vsel %vm11167_vm11, %v1938_v45, %v1934_v42  ;;  %v2018_v19 = vsel %vm11167_vm11, %v2017_v49, %v2013_v23  ;;  %v2097_v16 = vsel %vm11167_vm11, %v2096_v25, %v2092_v60  ;;  %v1243_v3 = vpop.xlane.xlu0 %1242 }
 0x3ca   : > { %11511 = vst [vmem:[#allocation60_spill] sm:$0xff] %v8424_v6  ;;  %v11514_v2 = vrot.slane %v8197_v26, %v11475_v33  ;;  %v2176_v8 = vsel %vm11167_vm11, %v2175_v43, %v2171_v56  ;;  %v2255_v62 = vsel %vm11167_vm11, %v2254_v39, %v2250_v35  ;;  %v2333_v31 = vrot.slane %v8408_v51, %v7850_v17  ;;  %v1245_v25 = vpop.xlane.xlu1 %1244 }
 0x3cb   : > { %11513 = vst [vmem:[#allocation61_spill] sm:$0xff] %v8429_v20  ;;  %v2259_v45 = vrot.slane %v8318_v55, %v11475_v33  ;;  %v2264_v49 = vrot.slane %v8360_v58, %v11476_v12  ;;  %v11515_v42 = vrot.slane %v8211_v54, %v11475_v33  ;;  %v2338_v60 = vrot.slane %v8424_v6, %v11475_v33 }
 0x3cc   : > { %v1776_v14 = vsel %vm11165_vm12, %v11514_v2, %v1769_v18  ;;  %v2329_v2 = vsel %vm11168_vm10, %v2328_v59, %v8272_v30  ;;  %v11516_v43 = vrot.slane %v8219_v29, %v11475_v33  ;;  %v11517_v18 = vrot.slane %v8230_v46, %v11475_v33 }
 0x3cd   : > { %v1865_v23 = vsel %vm11165_vm12, %v11515_v42, %v1860_v5  ;;  %v11518_v35 = vrot.slane %v8242_v0, %v11475_v33  ;;  %v2181_v59 = vsel %vm11165_vm12, %v2180_v27, %v2176_v8  ;;  %v2260_v21 = vsel %vm11165_vm12, %v2259_v45, %v2255_v62  ;;  %v1275_v8 = vpop.xlane.xlu0 %1274  ;;  %v11522_v45 = vld [vmem:[#allocation132_spill] sm:$0xff] }
 0x3ce   : > { %v1944_v39 = vsel %vm11165_vm12, %v11516_v43, %v1939_v41  ;;  %v2023_v56 = vsel %vm11165_vm12, %v11517_v18, %v2018_v19  ;;  %v11519_v41 = vrot.slane %v8201_v53, %v11476_v12  ;;  %v2334_v19 = vsel %vm11167_vm11, %v2333_v31, %v2329_v2  ;;  %v1277_v2 = vpop.xlane.xlu1 %1276 }
 0x3cf   : > { %v2102_v5 = vsel %vm11165_vm12, %v11518_v35, %v2097_v16  ;;  %v8479_v43 = vadd.f32 %v7550_v57, %v8012_v44  ;;  %v11520_v16 = vld [vmem:[#allocation131_spill] sm:$0xff]  ;;  %v11521_v27 = vrot.slane %v8215_v10, %v11476_v12  ;;  %v11523_v31 = vrot.slane %v8226_v1, %v11476_v12 }
 0x3d0   : > { %v8474_v42 = vsel %vm1782_vm13, %v11519_v41, %v1776_v14  ;;  %v8483_v18 = vadd.f32 %v7550_v57, %v11520_v16  ;;  %v8491_v14 = vadd.f32 %v7550_v57, %v11522_v45  ;;  %v11524_v35 = vrot.slane %v8238_v63, %v11476_v12 }
 0x3d1   : > { %v1870_v62 = vsel %vm1782_vm13, %v11521_v27, %v1865_v23  ;;  %v1949_v44 = vsel %vm1782_vm13, %v11523_v31, %v1944_v39  ;;  %v11525_v16 = vrot.slane %v8260_v15, %v11476_v12  ;;  %v11526_v27 = vld [vmem:[#allocation133_spill] sm:$0xff]  ;;  %v8513_v30 = vadd.f32 %v7550_v57, %v8108_v11 }
 0x3d2   : > { %v2028_v41 = vsel %vm1782_vm13, %v11524_v35, %v2023_v56  ;;  %v8509_v45 = vadd.f32 %v7550_v57, %v11526_v27  ;;  %v8516_v39 = vsel %vm1782_vm13, %v2185_v9, %v2181_v59  ;;  %v8519_v56 = vsel %vm1782_vm13, %v2264_v49, %v2260_v21  ;;  %v11528_v59 = vld [vmem:[#allocation129_spill] sm:$0xff]  ;;  %v1307_v21 = vpop.xlane.xlu0 %1306 }
 0x3d3   : > { %v8505_v23 = vsel %vm1782_vm13, %v11525_v16, %v2102_v5  ;;  %v8522_v31 = vsel %vm11165_vm12, %v2338_v60, %v2334_v19  ;;  %v8526_v5 = vadd.f32 %v7550_v57, %v8117_v32  ;;  %v8530_v35 = vadd.f32 %v7550_v57, %v8147_v13  ;;  %v11527_v16 = vld [vmem:[#allocation125_spill] sm:$0xff] }
 0x3d4   : > { %v8533_v11 = vadd.f32 %v7550_v57, %v1243_v3  ;;  %v8541_v60 = vadd.f32 %v7550_v57, %v8155_v38  ;;  %v8544_v32 = vadd.f32 %v7550_v57, %v1275_v8  ;;  %v8550_v3 = vadd.f32 %v7550_v57, %v8203_v7  ;;  %v1309_v38 = vpop.xlane.xlu1 %1308 }
 0x3d5   : > { %v8553_v19 = vadd.f32 %v7550_v57, %v1211_v28  ;;  %v8556_v27 = vadd.f32 %v7550_v57, %v1307_v21  ;;  %v8564_v9 = vadd.f32 %v7550_v57, %v8221_v61  ;;  %v8567_v7 = vadd.f32 %v7550_v57, %v1245_v25 }
 0x3d6   : > { %11529 = vst [vmem:[#allocation62_spill] sm:$0xff] %v8550_v3  ;;  %v1874_v13 = vrot.slane %v8533_v11, %v8165_v34  ;;  %v8576_v8 = vadd.f32 %v7550_v57, %v1277_v2  ;;  %v8582_v61 = vadd.f32 %v7550_v57, %v8416_v37  ;;  %v1953_v25 = vrot.slane %v8544_v32, %v8165_v34  ;;  %v1339_v21 = vpop.xlane.xlu0 %1338 }
 0x3d7   : > { %11530 = vst [vmem:[#allocation131_spill] sm:$0xff] %v8556_v27  ;;  %v8587_v28 = vadd.f32 %v7550_v57, %v1309_v38  ;;  %v2121_v17 = vrot.slane %v8550_v3, %v11527_v16  ;;  %v1788_v2 = vrot.slane %v8553_v19, %v8165_v34  ;;  %v2032_v49 = vrot.slane %v8556_v27, %v8165_v34 }
 0x3d8   : > { %v8596_v33 = vadd.f32 %v7550_v57, %v1339_v21  ;;  %v1341_v37 = vpop.xlane.xlu1 %1340  ;;  %v8602_v38 = vadd.f32 %v7550_v57, %v8263_v52  ;;  %v1879_v51 = vrot.slane %v8567_v7, %v8168_v50  ;;  %v8611_v58 = vadd.f32 %v7550_v57, %v8274_v22 }
 0x3d9   : > { %v8607_v55 = vadd.f32 %v7550_v57, %v1341_v37  ;;  %v1875_v21 = vsel %vm1789_vm14, %v1874_v13, %v1870_v62  ;;  %v1958_v6 = vrot.slane %v8576_v8, %v8168_v50  ;;  %v8620_v24 = vadd.f32 %v7550_v57, %v8314_v4 }
 0x3da   : > { %11531 = vst [vmem:[#allocation132_spill] sm:$0xff] %v8596_v33  ;;  %11532 = vst [vmem:[#allocation133_spill] sm:$0xff] %v8602_v38  ;;  %v2111_v52 = vrot.slane %v8596_v33, %v8165_v34  ;;  %v1795_v37 = vrot.slane %v8582_v61, %v8168_v50  ;;  %v1954_v22 = vsel %vm1789_vm14, %v1953_v25, %v1949_v44  ;;  %v1371_v62 = vpop.xlane.xlu0 %1370  ;;  %vm2367_vm12 = vcmask 1042434  }
 0x3db   : > { %11533 = vst [vmem:[#allocation136_spill] sm:$0xff] %v8611_v58  ;;  %11534 = vst [vmem:[#allocation137_spill] sm:$0xff] %v8620_v24  ;;  %v2037_v3 = vrot.slane %v8587_v28, %v8168_v50  ;;  %v1790_v13 = vsel %vm1789_vm14, %v1788_v2, %v8474_v42  ;;  %v2033_v27 = vsel %vm1789_vm14, %v2032_v49, %v2028_v41  ;;  %vm11176_vm11 = vcmask 1043459  }
 0x3dc   : > { %v2116_v33 = vrot.slane %v8607_v55, %v8168_v50  ;;  %v8633_v4 = vadd.f32 %v7550_v57, %v1371_v62  ;;  %v1373_v0 = vpop.xlane.xlu1 %1372  ;;  %v8637_v44 = vadd.f32 %v7550_v57, %v8332_v47  ;;  %v1880_v25 = vsel %vm1796_vm15, %v1879_v51, %v1875_v21 }
 0x3dd   : > { %v2112_v15 = vsel %vm1789_vm14, %v2111_v52, %v8505_v23  ;;  %v8643_v42 = vadd.f32 %v7550_v57, %v1373_v0  ;;  %v2200_v41 = vrot.slane %v8602_v38, %v11527_v16  ;;  %v2205_v49 = vrot.slane %v8611_v58, %v11528_v59 }
 0x3de   : > { %11535 = vst [vmem:[#allocation138_spill] sm:$0xff] %v8633_v4  ;;  %11536 = vst [vmem:[#allocation139_spill] sm:$0xff] %v8637_v44  ;;  %v1959_v2 = vsel %vm1796_vm15, %v1958_v6, %v1954_v22  ;;  %v2190_v47 = vrot.slane %v8633_v4, %v8165_v34  ;;  %vm11257_vm10 = vcmask 1044484   ;;  %v2279_v51 = vrot.slane %v8620_v24, %v11527_v16  ;;  %v1403_v52 = vpop.xlane.xlu0 %1402 }
 0x3df   : > { %11537 = vst [vmem:[#allocation140_spill] sm:$0xff] %v8643_v42  ;;  %v1797_v0 = vsel %vm1796_vm15, %v1795_v37, %v1790_v13  ;;  %v2038_v23 = vsel %vm1796_vm15, %v2037_v3, %v2033_v27  ;;  %v2195_v21 = vrot.slane %v8643_v42, %v8168_v50  ;;  %v11538_v6 = vrot.slane %v8491_v14, %v11527_v16 }
 0x3e0   : > { %v2117_v62 = vsel %vm1796_vm15, %v2116_v33, %v2112_v15  ;;  %v2191_v24 = vsel %vm1789_vm14, %v2190_v47, %v8516_v39  ;;  %v8666_v38 = vadd.f32 %v7550_v57, %v1403_v52  ;;  %v1405_v37 = vpop.xlane.xlu1 %1404  ;;  %v2284_v3 = vrot.slane %v8637_v44, %v11528_v59 }
 0x3e1   : > { %v1885_v22 = vsel %vm1803_vm0, %v11538_v6, %v1880_v25  ;;  %v11540_v27 = vrot.slane %v8513_v30, %v11527_v16  ;;  %v2196_v25 = vsel %vm1796_vm15, %v2195_v21, %v2191_v24  ;;  %v8676_v15 = vadd.f32 %v7550_v57, %v1405_v37  ;;  %v11545_v21 = vld [vmem:[#allocation99_spill] sm:$0xff] }
 0x3e2   : > { %11539 = vst [vmem:[#allocation141_spill] sm:$0xff] %v8666_v38  ;;  %v8681_v33 = vadd.f32 %v7550_v57, %v8372_v40  ;;  %v11543_v39 = vrot.slane %v8479_v43, %v11527_v16  ;;  %v11544_v52 = vrot.slane %v8530_v35, %v11527_v16  ;;  %v2269_v24 = vrot.slane %v8666_v38, %v8165_v34 }
 0x3e3   : > { %v1964_v13 = vsel %vm1803_vm0, %v11540_v27, %v1959_v2  ;;  %11541 = vst [vmem:[#allocation142_spill] sm:$0xff] %v8676_v15  ;;  %v8695_v6 = vadd.f32 %v7550_v57, %v11545_v21  ;;  %v11547_v40 = vrot.slane %v8509_v45, %v11528_v59  ;;  %v2122_v27 = vsel %vm1803_vm0, %v2121_v17, %v2117_v62 }
 0x3e4   : > { %11542 = vst [vmem:[#allocation143_spill] sm:$0xff] %v8681_v33  ;;  %v1804_v47 = vsel %vm1803_vm0, %v11543_v39, %v1797_v0  ;;  %v2043_v2 = vsel %vm1803_vm0, %v11544_v52, %v2038_v23  ;;  %v2274_v0 = vrot.slane %v8676_v15, %v8168_v50  ;;  %v1435_v39 = vpop.xlane.xlu0 %1434  ;;  %v11548_v23 = vrot.slane %v8526_v5, %v11528_v59 }
 0x3e5   : > { %11546 = vst [vmem:[#allocation99_spill] sm:$0xff] %v8695_v6  ;;  %v1890_v37 = vsel %vm1810_vm1, %v11547_v40, %v1885_v22  ;;  %v2201_v38 = vsel %vm1803_vm0, %v2200_v41, %v2196_v25  ;;  %v2270_v21 = vsel %vm1789_vm14, %v2269_v24, %v8519_v56  ;;  %v8712_v44 = vadd.f32 %v7550_v57, %v1435_v39  ;;  %v1437_v22 = vpop.xlane.xlu1 %1436 }
 0x3e6   : > { %v1969_v52 = vsel %vm1810_vm1, %v11548_v23, %v1964_v13  ;;  %v11550_v17 = vrot.slane %v8483_v18, %v11528_v59  ;;  %v11551_v40 = vrot.slane %v8541_v60, %v11528_v59  ;;  %v2275_v41 = vsel %vm1796_vm15, %v2274_v0, %v2270_v21 }
 0x3e7   : > { %11549 = vst [vmem:[#allocation144_spill] sm:$0xff] %v8712_v44  ;;  %v8724_v25 = vadd.f32 %v7550_v57, %v1437_v22  ;;  %v2348_v24 = vrot.slane %v8712_v44, %v8165_v34  ;;  %v11553_v39 = vrot.slane %v8564_v9, %v11528_v59  ;;  %v2280_v23 = vsel %vm1803_vm0, %v2279_v51, %v2275_v41 }
 0x3e8   : > { %v1811_v62 = vsel %vm1810_vm1, %v11550_v17, %v1804_v47  ;;  %v2048_v13 = vsel %vm1810_vm1, %v11551_v40, %v2043_v2  ;;  %v11554_v2 = vrot.slane %v8429_v20, %v11476_v12  ;;  %v2206_v0 = vsel %vm1810_vm1, %v2205_v49, %v2201_v38 }
 0x3e9   : > { %11552 = vst [vmem:[#allocation145_spill] sm:$0xff] %v8724_v25  ;;  %v2366_v56 = vsel %vm11175_vm2, %v1890_v37, %v1811_v62  ;;  %v2127_v47 = vsel %vm1810_vm1, %v11553_v39, %v2122_v27  ;;  %v2353_v37 = vrot.slane %v8724_v25, %v8168_v50  ;;  %v2358_v27 = vrot.slane %v8681_v33, %v11527_v16  ;;  %v11582_v25 = vld [vmem:[#allocation100_spill] sm:$0xff] }
 0x3ea   : > { %v2344_v57 = vsel %vm1782_vm13, %v11554_v2, %v8522_v31  ;;  %v2368_v21 = vsel %vm2367_vm12, %v1969_v52, %v2366_v56  ;;  %v2285_v22 = vsel %vm1810_vm1, %v2284_v3, %v2280_v23  ;;  %v2363_v31 = vrot.slane %v8695_v6, %v11528_v59  ;;  %v2385_v56 = vld [vmem:[#allocation3] sm:$0xff] }
 0x3eb   : > { %v2349_v51 = vsel %vm1789_vm14, %v2348_v24, %v2344_v57  ;;  %v2370_v17 = vsel %vm11176_vm11, %v2048_v13, %v2368_v21  ;;  %vm11241_vm2 = vcmask 1047559   ;;  %v6661_v13 = vmov 0   ;;  %v11557_v21 = vld [vmem:[#allocation105_spill] sm:$0xff] }
 0x3ec   : > { %v2354_v62 = vsel %vm1796_vm15, %v2353_v37, %v2349_v51  ;;  %v2372_v40 = vsel %vm11257_vm10, %v2127_v47, %v2370_v17  ;;  %5830 = vset.pattern.permute.xlu1 %v6661_v13  ;;  %5831 = vset.pattern.permute.xlu0 %v6661_v13  ;;  %vm11240_vm11 = vcmask 7168   ;;  %v11556_v37 = vld [vmem:[#allocation28_spill] sm:$0xff]  ;;  %v11558_v51 = vld [vmem:[#allocation91_spill] sm:$0xff]  ;;  %v11559_v17 = vld [vmem:[#allocation66_spill] sm:$0xff]  ;;  %vm12006_vm10 = vcmask 654912  }
 0x3ed   : > { %v2359_v38 = vsel %vm1803_vm0, %v2358_v27, %v2354_v62  ;;  %v2374_v49 = vsel %vm11247_vm9, %v2206_v0, %v2372_v40  ;;  %v11560_v62 = vld [vmem:[#allocation73_spill] sm:$0xff]  ;;  %vm11915_vm9 = vcmask 589312  }
 0x3ee   : > { %v2364_v52 = vsel %vm1810_vm1, %v2363_v31, %v2359_v38  ;;  %v2376_v41 = vsel %vm11246_vm8, %v2285_v22, %v2374_v49  ;;  %vm11914_vm8 = vcmask 720512  }
 0x3ef   : > { %v2378_v3 = vsel %vm11241_vm2, %v2364_v52, %v2376_v41  ;;  %v11561_v41 = vld [vmem:[#allocation75_spill] sm:$0xff]  ;;  %vm11894_vm2 = vcmask 523712  }
 0x3f0   : > { %2386 = vmax.xlane.f32.xlu0 %v2378_v3  ;;  %2384 = vst [vmem:[%s2383_s23] sm:$0xff] %v2378_v3 }
 0x479   : > { %v2387_v24 = vpop.xlane.xlu0 %2386 }
 0x47a   : > { %v2388_v39 = vmax.f32 %v2385_v56, %v2387_v24 }
 0x47c   : > { %v2389_v47 = vsub.f32 %v2385_v56, %v2388_v39  ;;  %5309 = vst.msk [vmem:[#allocation3] sm:$0xff] %vm11240_vm11, %v2388_v39  ;;  %2394 = vperm.xlu1 %5830, %v2388_v39   ;;  %v11562_v39 = vld [vmem:[#allocation124_spill] sm:$0xff]  ;;  %vm11890_vm11 = vcmask 458112  }
 0x47e   : > { %v2390_v23 = vmul.f32 1.442695, %v2389_v47 }
 0x480   : > { %6105 = vpow2.f32 %v2390_v23  ;;  %v11563_v23 = vld [vmem:[#allocation27_spill] sm:$0xff] }
 0x48d   : > { %v8759_v2 = vpop.eup %6105 }
 0x48e   : > { %11555 = vst [vmem:[#allocation146_spill] sm:$0xff] %v8759_v2  ;;  %3982 = vperm.xlu0 %5831, %v8759_v2  }
 0x4f7   : > { %v8762_v57 = vpop.permute.xlu1 %2394 }
 0x4f8   : > { %v8766_v0 = vrot.slane %v8762_v57, %v11556_v37  ;;  %v2402_v37 = vsub.s32 1, %v11563_v23 }
 0x4fa   : > { %v2437_v27 = vsub.f32 %v11557_v21, %v8766_v0  ;;  %v2436_v22 = vsub.f32 %v11558_v51, %v8766_v0  ;;  %v2438_v31 = vsub.f32 %v11559_v17, %v8766_v0  ;;  %v2445_v40 = vsub.f32 %v11560_v62, %v8766_v0 }
 0x4fb   : > { %v2439_v3 = vsub.f32 %v11561_v41, %v8766_v0  ;;  %v2447_v56 = vsub.f32 %v8201_v53, %v8766_v0  ;;  %v2440_v47 = vsub.f32 %v11562_v39, %v8766_v0  ;;  %v2451_v62 = vsub.f32 %v8483_v18, %v8766_v0  ;;  %v11566_v41 = vld [vmem:[#allocation92_spill] sm:$0xff] }
 0x4fc   : > { %v2566_v38 = vmul.f32 1.442695, %v2437_v27  ;;  %v2564_v49 = vmul.f32 1.442695, %v2436_v22  ;;  %v2568_v52 = vmul.f32 1.442695, %v2438_v31  ;;  %v2449_v27 = vsub.f32 %v8582_v61, %v8766_v0 }
 0x4fd   : > { %v2582_v13 = vmul.f32 1.442695, %v2445_v40  ;;  %v2570_v24 = vmul.f32 1.442695, %v2439_v3  ;;  %v2586_v21 = vmul.f32 1.442695, %v2447_v56  ;;  %v8788_v31 = vrot.slane %v8762_v57, %v2402_v37 }
 0x4fe   : > { %6107 = vpow2.f32 %v2566_v38  ;;  %v2572_v51 = vmul.f32 1.442695, %v2440_v47  ;;  %v11564_v22 = vld [vmem:[#allocation33_spill] sm:$0xff]  ;;  %v2590_v53 = vmul.f32 1.442695, %v2449_v27  ;;  %v11565_v38 = vld [vmem:[#allocation114_spill] sm:$0xff] }
 0x4ff   : > { %6109 = vpow2.f32 %v2564_v49  ;;  %v2441_v17 = vsub.f32 %v11564_v22, %v8766_v0  ;;  %v2442_v49 = vsub.f32 %v11565_v38, %v8766_v0  ;;  %v2594_v61 = vmul.f32 1.442695, %v2451_v62  ;;  %v11567_v56 = vld [vmem:[#allocation116_spill] sm:$0xff]  ;;  %v11568_v37 = vld [vmem:[#allocation78_spill] sm:$0xff]  ;;  %v11569_v22 = vld [vmem:[#allocation49_spill] sm:$0xff] }
 0x500   : > { %6111 = vpow2.f32 %v2568_v52  ;;  %v2453_v3 = vsub.f32 %v11566_v41, %v8788_v31  ;;  %v2446_v41 = vsub.f32 %v8197_v26, %v8766_v0 }
 0x501   : > { %6113 = vpow2.f32 %v2582_v13  ;;  %v2574_v40 = vmul.f32 1.442695, %v2441_v17  ;;  %v2576_v18 = vmul.f32 1.442695, %v2442_v49  ;;  %v2444_v17 = vsub.f32 %v11569_v22, %v8766_v0 }
 0x502   : > { %6115 = vpow2.f32 %v2570_v24  ;;  %v2443_v24 = vsub.f32 %v11567_v56, %v8766_v0  ;;  %v2598_v47 = vmul.f32 1.442695, %v2453_v3  ;;  %v11571_v56 = vld [vmem:[#allocation118_spill] sm:$0xff]  ;;  %v2461_v22 = vsub.f32 %v8340_v48, %v8788_v31 }
 0x503   : > { %6117 = vpow2.f32 %v2586_v21  ;;  %v2455_v21 = vsub.f32 %v11568_v37, %v8788_v31  ;;  %v2584_v37 = vmul.f32 1.442695, %v2446_v41 }
 0x504   : > { %6119 = vpow2.f32 %v2572_v51  ;;  %v2578_v51 = vmul.f32 1.442695, %v2443_v24  ;;  %v2459_v24 = vsub.f32 %v11571_v56, %v8788_v31 }
 0x505   : > { %6121 = vpow2.f32 %v2590_v53  ;;  %v2602_v62 = vmul.f32 1.442695, %v2455_v21  ;;  %v2448_v21 = vsub.f32 %v8553_v19, %v8766_v0  ;;  %v2614_v19 = vmul.f32 1.442695, %v2461_v22 }
 0x506   : > { %6123 = vpow2.f32 %v2574_v40  ;;  %v11570_v40 = vld [vmem:[#allocation34_spill] sm:$0xff]  ;;  %v2610_v26 = vmul.f32 1.442695, %v2459_v24 }
 0x507   : > { %6125 = vpow2.f32 %v2594_v61  ;;  %v2457_v38 = vsub.f32 %v11570_v40, %v8788_v31  ;;  %v2580_v61 = vmul.f32 1.442695, %v2444_v17  ;;  %v2450_v40 = vsub.f32 %v8479_v43, %v8766_v0 }
 0x508   : > { %6127 = vpow2.f32 %v2576_v18  ;;  %v2406_v43 = vsub.s32 2, %v11563_v23 }
 0x509   : > { %6129 = vpow2.f32 %v2598_v47  ;;  %v2606_v18 = vmul.f32 1.442695, %v2457_v38  ;;  %v2592_v48 = vmul.f32 1.442695, %v2450_v40 }
 0x50a   : > { %6131 = vpow2.f32 %v2578_v51  ;;  %v8868_v40 = vrot.slane %v8762_v57, %v2406_v43 }
 0x50b   : > { %v8794_v52 = vpop.eup %6107  ;;  %6133 = vpow2.f32 %v2602_v62  ;;  %v2588_v62 = vmul.f32 1.442695, %v2448_v21 }
 0x50c   : > { %v8798_v13 = vpop.eup %6109  ;;  %2954 = vperm.xlu1 %5830, %v8794_v52   ;;  %6135 = vpow2.f32 %v2580_v61  ;;  %v2463_v61 = vsub.f32 %v8215_v10, %v8788_v31  ;;  %v2465_v10 = vsub.f32 %v8567_v7, %v8788_v31  ;;  %v2467_v7 = vsub.f32 %v8509_v45, %v8788_v31 }
 0x50d   : > { %2951 = vperm.xlu0 %5831, %v8798_v13   ;;  %v8804_v39 = vpop.eup %6111  ;;  %6137 = vpow2.f32 %v2606_v18  ;;  %v11572_v18 = vld [vmem:[#allocation96_spill] sm:$0xff]  ;;  %v2479_v44 = vsub.f32 %v8226_v1, %v8868_v40  ;;  %v11583_v1 = vld [vmem:[#allocation74_spill] sm:$0xff] }
 0x50e   : > { %v8808_v27 = vpop.eup %6113  ;;  %6139 = vpow2.f32 %v2584_v37  ;;  %v2452_v56 = vsub.f32 %v11572_v18, %v8788_v31  ;;  %v2618_v0 = vmul.f32 1.442695, %v2463_v61  ;;  %v11574_v18 = vld [vmem:[#allocation128_spill] sm:$0xff]  ;;  %v2626_v43 = vmul.f32 1.442695, %v2467_v7 }
 0x50f   : > { %v8814_v53 = vpop.eup %6115  ;;  %6141 = vpow2.f32 %v2610_v26  ;;  %v11573_v26 = vld [vmem:[#allocation64_spill] sm:$0xff] }
 0x510   : > { %2957 = vperm.xlu1 %5830, %v8804_v39   ;;  %v8818_v49 = vpop.eup %6117  ;;  %6143 = vpow2.f32 %v2588_v62  ;;  %v2596_v21 = vmul.f32 1.442695, %v2452_v56  ;;  %v2454_v22 = vsub.f32 %v11573_v26, %v8788_v31  ;;  %v2456_v56 = vsub.f32 %v11574_v18, %v8788_v31 }
 0x511   : > { %2978 = vperm.xlu0 %5831, %v8808_v27   ;;  %v8824_v3 = vpop.eup %6119  ;;  %6145 = vpow2.f32 %v2614_v19  ;;  %v2622_v19 = vmul.f32 1.442695, %v2465_v10 }
 0x512   : > { %v8828_v47 = vpop.eup %6121  ;;  %6147 = vpow2.f32 %v2592_v48  ;;  %v2600_v48 = vmul.f32 1.442695, %v2454_v22  ;;  %v2604_v45 = vmul.f32 1.442695, %v2456_v56 }
 0x513   : > { %v8834_v51 = vpop.eup %6123  ;;  %6149 = vpow2.f32 %v2618_v0  ;;  %v11575_v0 = vld [vmem:[#allocation93_spill] sm:$0xff] }
 0x514   : > { %2960 = vperm.xlu1 %5830, %v8814_v53   ;;  %v8838_v17 = vpop.eup %6125  ;;  %6151 = vpow2.f32 %v2596_v21  ;;  %v2469_v10 = vsub.f32 %v11575_v0, %v8868_v40  ;;  %v11576_v21 = vld [vmem:[#allocation117_spill] sm:$0xff] }
 0x515   : > { %2984 = vperm.xlu0 %5831, %v8818_v49   ;;  %v8844_v38 = vpop.eup %6127  ;;  %6153 = vpow2.f32 %v2622_v19  ;;  %v2458_v22 = vsub.f32 %v11576_v21, %v8788_v31  ;;  %v11577_v19 = vld [vmem:[#allocation80_spill] sm:$0xff] }
 0x516   : > { %v8848_v41 = vpop.eup %6129  ;;  %6155 = vpow2.f32 %v2600_v48  ;;  %v2630_v18 = vmul.f32 1.442695, %v2469_v10  ;;  %v2471_v7 = vsub.f32 %v11577_v19, %v8868_v40  ;;  %v11578_v48 = vld [vmem:[#allocation50_spill] sm:$0xff] }
 0x517   : > { %v8854_v24 = vpop.eup %6131  ;;  %6157 = vpow2.f32 %v2626_v43  ;;  %v2608_v0 = vmul.f32 1.442695, %v2458_v22  ;;  %v2460_v56 = vsub.f32 %v11578_v48, %v8788_v31  ;;  %v11579_v43 = vld [vmem:[#allocation36_spill] sm:$0xff] }
 0x518   : > { %2963 = vperm.xlu1 %5830, %v8824_v3   ;;  %v8859_v37 = vpop.eup %6133  ;;  %6159 = vpow2.f32 %v2604_v45  ;;  %v2634_v21 = vmul.f32 1.442695, %v2471_v7  ;;  %v2473_v10 = vsub.f32 %v11579_v43, %v8868_v40  ;;  %v2462_v45 = vsub.f32 %v8211_v54, %v8788_v31  ;;  %v11581_v54 = vld [vmem:[#allocation109_spill] sm:$0xff] }
 0x519   : > { %2990 = vperm.xlu0 %5831, %v8828_v47   ;;  %v8865_v62 = vpop.eup %6135  ;;  %6161 = vpow2.f32 %v2630_v18  ;;  %v2612_v19 = vmul.f32 1.442695, %v2460_v56  ;;  %v11580_v18 = vld [vmem:[#allocation120_spill] sm:$0xff]  ;;  %v2464_v43 = vsub.f32 %v8533_v11, %v8788_v31  ;;  %v2477_v56 = vsub.f32 %v11581_v54, %v8868_v40 }
 0x51a   : > { %v8872_v61 = vpop.eup %6137  ;;  %6163 = vpow2.f32 %v2608_v0  ;;  %v2638_v48 = vmul.f32 1.442695, %v2473_v10  ;;  %v2475_v7 = vsub.f32 %v11580_v18, %v8868_v40  ;;  %v2410_v0 = vsub.s32 3, %v11563_v23 }
 0x51b   : > { %v8878_v26 = vpop.eup %6139  ;;  %6165 = vpow2.f32 %v2634_v21  ;;  %v2616_v21 = vmul.f32 1.442695, %v2462_v45  ;;  %v2466_v10 = vsub.f32 %v8491_v14, %v8788_v31  ;;  %v2620_v6 = vmul.f32 1.442695, %v2464_v43 }
 0x51c   : > { %2966 = vperm.xlu1 %5830, %v8834_v51   ;;  %v8882_v2 = vpop.eup %6141  ;;  %6167 = vpow2.f32 %v2612_v19  ;;  %v2642_v33 = vmul.f32 1.442695, %v2475_v7  ;;  %v2468_v54 = vsub.f32 %v11582_v25, %v8868_v40  ;;  %v8933_v19 = vrot.slane %v8762_v57, %v2410_v0 }
 0x51d   : > { %2996 = vperm.xlu0 %5831, %v8838_v17   ;;  %v8888_v59 = vpop.eup %6143  ;;  %6169 = vpow2.f32 %v2638_v48  ;;  %v2646_v14 = vmul.f32 1.442695, %v2477_v56  ;;  %v2481_v31 = vsub.f32 %v8576_v8, %v8868_v40  ;;  %v2624_v45 = vmul.f32 1.442695, %v2466_v10  ;;  %v11584_v8 = vld [vmem:[#allocation35_spill] sm:$0xff] }
 0x51e   : > { %v8892_v16 = vpop.eup %6145  ;;  %6171 = vpow2.f32 %v2616_v21  ;;  %v2470_v48 = vsub.f32 %v11583_v1, %v8868_v40  ;;  %v2650_v43 = vmul.f32 1.442695, %v2479_v44  ;;  %v2483_v25 = vsub.f32 %v8526_v5, %v8868_v40  ;;  %v11585_v1 = vld [vmem:[#allocation97_spill] sm:$0xff]  ;;  %v11586_v5 = vld [vmem:[#allocation119_spill] sm:$0xff] }
 0x51f   : > { %v8898_v50 = vpop.eup %6147  ;;  %6173 = vpow2.f32 %v2642_v33  ;;  %v2628_v56 = vmul.f32 1.442695, %v2468_v54  ;;  %v2472_v21 = vsub.f32 %v11584_v8, %v8868_v40  ;;  %v2654_v10 = vmul.f32 1.442695, %v2481_v31  ;;  %v11587_v54 = vld [vmem:[#allocation82_spill] sm:$0xff] }
 0x520   : > { %2969 = vperm.xlu1 %5830, %v8844_v38   ;;  %v8902_v12 = vpop.eup %6149  ;;  %6175 = vpow2.f32 %v2620_v6  ;;  %v2485_v33 = vsub.f32 %v11585_v1, %v8933_v19  ;;  %v2632_v44 = vmul.f32 1.442695, %v2470_v48  ;;  %v2474_v20 = vsub.f32 %v11586_v5, %v8868_v40 }
 0x521   : > { %3002 = vperm.xlu0 %5831, %v8848_v41   ;;  %v8908_v22 = vpop.eup %6151  ;;  %6177 = vpow2.f32 %v2646_v14  ;;  %v2658_v6 = vmul.f32 1.442695, %v2483_v25  ;;  %v2487_v4 = vsub.f32 %v11587_v54, %v8933_v19  ;;  %v2414_v14 = vsub.s32 4, %v11563_v23 }
 0x522   : > { %v8912_v34 = vpop.eup %6153  ;;  %6179 = vpow2.f32 %v2624_v45  ;;  %v2636_v31 = vmul.f32 1.442695, %v2472_v21  ;;  %v11588_v45 = vld [vmem:[#allocation51_spill] sm:$0xff]  ;;  %v2662_v1 = vmul.f32 1.442695, %v2485_v33  ;;  %v2478_v54 = vsub.f32 %v8219_v29, %v8868_v40  ;;  %v11590_v21 = vld [vmem:[#allocation122_spill] sm:$0xff] }
 0x523   : > { %v8923_v18 = vpop.eup %6155  ;;  %6181 = vpow2.f32 %v2650_v43  ;;  %v2476_v48 = vsub.f32 %v11588_v45, %v8868_v40  ;;  %v11589_v43 = vld [vmem:[#allocation38_spill] sm:$0xff]  ;;  %v2640_v5 = vmul.f32 1.442695, %v2474_v20  ;;  %v2491_v42 = vsub.f32 %v11590_v21, %v8933_v19 }
 0x524   : > { %2972 = vperm.xlu1 %5830, %v8854_v24   ;;  %v8927_v11 = vpop.eup %6157  ;;  %6183 = vpow2.f32 %v2628_v56  ;;  %v2489_v25 = vsub.f32 %v11589_v43, %v8933_v19  ;;  %v2666_v56 = vmul.f32 1.442695, %v2487_v4  ;;  %v2480_v20 = vsub.f32 %v8544_v32, %v8868_v40 }
 0x525   : > { %3008 = vperm.xlu0 %5831, %v8859_v37   ;;  %v8940_v7 = vpop.eup %6159  ;;  %6185 = vpow2.f32 %v2654_v10  ;;  %v8976_v10 = vrot.slane %v8762_v57, %v2414_v14  ;;  %v2644_v33 = vmul.f32 1.442695, %v2476_v48  ;;  %v2482_v4 = vsub.f32 %v8513_v30, %v8868_v40  ;;  %v11591_v14 = vld [vmem:[#allocation103_spill] sm:$0xff]  ;;  %v11592_v48 = vld [vmem:[#allocation76_spill] sm:$0xff] }
 0x526   : > { %v8944_v0 = vpop.eup %6161  ;;  %6187 = vpow2.f32 %v2632_v44  ;;  %v2670_v29 = vmul.f32 1.442695, %v2489_v25  ;;  %v8986_v44 = vpack.c.bf16 %v8794_v52, %v8798_v13  ;;  %v2486_v43 = vsub.f32 %v11592_v48, %v8933_v19  ;;  %v11593_v25 = vld [vmem:[#allocation37_spill] sm:$0xff] }
 0x527   : > { %v8954_v15 = vpop.eup %6163  ;;  %6189 = vpow2.f32 %v2658_v6  ;;  %v2648_v6 = vmul.f32 1.442695, %v2478_v54  ;;  %v2488_v21 = vsub.f32 %v11593_v25, %v8933_v19  ;;  %v2652_v52 = vmul.f32 1.442695, %v2480_v20  ;;  %v11595_v54 = vld [vmem:[#allocation98_spill] sm:$0xff] }
 0x528   : > { %2975 = vperm.xlu1 %5830, %v8865_v62   ;;  %v8958_v8 = vpop.eup %6165  ;;  %6191 = vpow2.f32 %v2636_v31  ;;  %v2484_v31 = vsub.f32 %v11591_v14, %v8933_v19  ;;  %v9001_v13 = vpack.c.bf16 %v8814_v53, %v8804_v39  ;;  %v2664_v20 = vmul.f32 1.442695, %v2486_v43  ;;  %v11596_v39 = vld [vmem:[#allocation121_spill] sm:$0xff] }
 0x529   : > { %3014 = vperm.xlu0 %5831, %v8872_v61   ;;  %v8969_v58 = vpop.eup %6167  ;;  %6193 = vpow2.f32 %v2662_v1  ;;  %v2674_v1 = vmul.f32 1.442695, %v2491_v42  ;;  %v2493_v42 = vsub.f32 %v8352_v36, %v8933_v19  ;;  %v2490_v53 = vsub.f32 %v11596_v39, %v8933_v19 }
 0x52a   : > { %v8973_v45 = vpop.eup %6169  ;;  %6195 = vpow2.f32 %v2640_v5  ;;  %11594 = vst [vmem:[#allocation28_spill] sm:$0xff] %v9001_v13  ;;  %v2656_v5 = vmul.f32 1.442695, %v2482_v4  ;;  %v2668_v25 = vmul.f32 1.442695, %v2488_v21  ;;  %v9020_v36 = vpack.c.bf16 %v8834_v51, %v8824_v3  ;;  %v11599_v51 = vld [vmem:[#allocation79_spill] sm:$0xff] }
 0x52b   : > { %v8992_v32 = vpop.eup %6171  ;;  %6197 = vpow2.f32 %v2666_v56  ;;  %v2501_v56 = vsub.f32 %v11595_v54, %v8976_v10  ;;  %v9029_v43 = vpack.c.bf16 %v8808_v27, %v8865_v62  ;;  %v9042_v54 = vpack.c.bf16 %v8828_v47, %v8888_v59  ;;  %v11601_v62 = vld [vmem:[#allocation40_spill] sm:$0xff] }
 0x52c   : > { %2981 = vperm.xlu1 %5830, %v8878_v26   ;;  %v8996_v30 = vpop.eup %6173  ;;  %6199 = vpow2.f32 %v2644_v33  ;;  %v2660_v33 = vmul.f32 1.442695, %v2484_v31  ;;  %v2672_v27 = vmul.f32 1.442695, %v2490_v53  ;;  %v9061_v53 = vpack.c.bf16 %v8848_v41, %v8908_v22 }
 0x52d   : > { %3020 = vperm.xlu0 %5831, %v8882_v2   ;;  %v9003_v40 = vpop.eup %6175  ;;  %6201 = vpow2.f32 %v2670_v29  ;;  %v11597_v29 = vld [vmem:[#allocation84_spill] sm:$0xff]  ;;  %v2694_v3 = vmul.f32 1.442695, %v2501_v56  ;;  %v11602_v56 = vld [vmem:[#allocation126_spill] sm:$0xff]  ;;  %v2678_v41 = vmul.f32 1.442695, %v2493_v42  ;;  %v9095_v42 = vpack.c.bf16 %v8892_v16, %v8969_v58 }
 0x52e   : > { %v9010_v14 = vpop.eup %6177  ;;  %6203 = vpow2.f32 %v2648_v6  ;;  %v2503_v13 = vsub.f32 %v11597_v29, %v8976_v10  ;;  %v11598_v6 = vld [vmem:[#allocation104_spill] sm:$0xff]  ;;  %v2505_v29 = vsub.f32 %v11601_v62, %v8976_v10  ;;  %v9104_v62 = vpack.c.bf16 %v8902_v12, %v8992_v32 }
 0x52f   : > { %v9014_v48 = vpop.eup %6179  ;;  %6205 = vpow2.f32 %v2674_v1  ;;  %v2500_v31 = vsub.f32 %v11598_v6, %v8976_v10  ;;  %v9033_v1 = vpack.c.bf16 %v8854_v24, %v8844_v38  ;;  %v11600_v38 = vld [vmem:[#allocation52_spill] sm:$0xff] }
 0x530   : > { %2987 = vperm.xlu1 %5830, %v8888_v59   ;;  %v9022_v4 = vpop.eup %6181  ;;  %6207 = vpow2.f32 %v2652_v52  ;;  %v2502_v52 = vsub.f32 %v11599_v51, %v8976_v10  ;;  %v2492_v24 = vsub.f32 %v11600_v38, %v8933_v19  ;;  %v2507_v51 = vsub.f32 %v11602_v56, %v8976_v10  ;;  %v11606_v56 = vld [vmem:[#allocation55_spill] sm:$0xff] }
 0x531   : > { %3026 = vperm.xlu0 %5831, %v8892_v16   ;;  %v9035_v21 = vpop.eup %6183  ;;  %6209 = vpow2.f32 %v2656_v5  ;;  %v2698_v5 = vmul.f32 1.442695, %v2503_v13  ;;  %v9054_v59 = vpack.c.bf16 %v8838_v17, %v8898_v50  ;;  %v9065_v13 = vpack.c.bf16 %v8818_v49, %v8878_v26  ;;  %v11603_v49 = vld [vmem:[#allocation39_spill] sm:$0xff] }
 0x532   : > { %v9044_v39 = vpop.eup %6185  ;;  %6211 = vpow2.f32 %v2660_v33  ;;  %v2692_v33 = vmul.f32 1.442695, %v2500_v31  ;;  %v9070_v17 = vpack.c.bf16 %v8859_v37, %v8923_v18  ;;  %v2504_v26 = vsub.f32 %v11603_v49, %v8976_v10  ;;  %v11604_v37 = vld [vmem:[#allocation123_spill] sm:$0xff] }
 0x533   : > { %v6188_v6 = vpop.eup %6187  ;;  %6213 = vpow2.f32 %v2664_v20 }
 0x534   : > { %2993 = vperm.xlu1 %5830, %v8898_v50   ;;  %v9056_v47 = vpop.eup %6189  ;;  %6215 = vpow2.f32 %v2668_v25  ;;  %v2696_v50 = vmul.f32 1.442695, %v2502_v52  ;;  %v9074_v25 = vpack.c.bf16 %v8872_v61, %v8940_v7  ;;  %v2676_v52 = vmul.f32 1.442695, %v2492_v24 }
 0x535   : > { %3032 = vperm.xlu0 %5831, %v8902_v12   ;;  %v6192_v20 = vpop.eup %6191  ;;  %6217 = vpow2.f32 %v2694_v3  ;;  %v2495_v3 = vsub.f32 %v8238_v63, %v8933_v19  ;;  %v2702_v61 = vmul.f32 1.442695, %v2505_v29  ;;  %v2706_v24 = vmul.f32 1.442695, %v2507_v51 }
 0x536   : > { %v9076_v31 = vpop.eup %6193  ;;  %6219 = vpow2.f32 %v2672_v27  ;;  %v2494_v27 = vsub.f32 %v8230_v46, %v8933_v19  ;;  %v2700_v16 = vmul.f32 1.442695, %v2504_v26  ;;  %v2508_v51 = vsub.f32 %v11606_v56, %v8976_v10 }
 0x537   : > { %6221 = vpow2.f32 %v2698_v5  ;;  %v9120_v12 = vpack.c.bf16 %v8927_v11, %v9014_v48  ;;  %v9137_v49 = vpack.c.bf16 %v8973_v45, %v6192_v20 }
 0x538   : > { %2999 = vperm.xlu1 %5830, %v8908_v22   ;;  %v9080_v22 = vpop.eup %6195  ;;  %6223 = vpow2.f32 %v2692_v33  ;;  %v2682_v33 = vmul.f32 1.442695, %v2495_v3 }
 0x539   : > { %3038 = vperm.xlu0 %5831, %v8912_v34   ;;  %v9086_v38 = vpop.eup %6197  ;;  %6225 = vpow2.f32 %v2696_v50  ;;  %v2680_v50 = vmul.f32 1.442695, %v2494_v27  ;;  %v9145_v3 = vpack.c.bf16 %v8996_v30, %v9080_v22 }
 0x53a   : > { %v9097_v63 = vpop.eup %6199  ;;  %6227 = vpow2.f32 %v2678_v41  ;;  %v9132_v41 = vpack.c.bf16 %v8958_v8, %v6188_v6 }
 0x53b   : > { %v9106_v29 = vpop.eup %6201  ;;  %6229 = vpow2.f32 %v2676_v52 }
 0x53c   : > { %3005 = vperm.xlu1 %5830, %v8923_v18   ;;  %v2506_v18 = vsub.f32 %v11604_v37, %v8976_v10  ;;  %v9114_v5 = vpop.eup %6203  ;;  %6231 = vpow2.f32 %v2702_v61  ;;  %v2499_v61 = vsub.f32 %v8541_v60, %v8933_v19 }
 0x53d   : > { %3044 = vperm.xlu0 %5831, %v8927_v11   ;;  %6233 = vpow2.f32 %v2706_v24 }
 0x53e   : > { %v2704_v46 = vmul.f32 1.442695, %v2506_v18  ;;  %6235 = vpow2.f32 %v2700_v16  ;;  %v9162_v18 = vpack.c.bf16 %v9022_v4, %v9114_v5 }
 0x540   : > { %3011 = vperm.xlu1 %5830, %v8940_v7   ;;  %v9091_v7 = vpack.c.bf16 %v8882_v2, %v8954_v15  ;;  %v9112_v2 = vpack.c.bf16 %v8912_v34, %v9003_v40  ;;  %v9126_v34 = vpack.c.bf16 %v8944_v0, %v9035_v21 }
 0x541   : > { %3050 = vperm.xlu0 %5831, %v8944_v0   ;;  %v2497_v0 = vsub.f32 %v8587_v28, %v8933_v19  ;;  %v11608_v28 = vld [vmem:[#allocation47_spill] sm:$0xff] }
 0x543   : > { %v2686_v24 = vmul.f32 1.442695, %v2497_v0 }
 0x544   : > { %3017 = vperm.xlu1 %5830, %v8954_v15   ;;  %v11605_v15 = vld [vmem:[#allocation57_spill] sm:$0xff] }
 0x545   : > { %3056 = vperm.xlu0 %5831, %v8958_v8  }
 0x548   : > { %3023 = vperm.xlu1 %5830, %v8969_v58   ;;  %v2509_v58 = vsub.f32 %v11605_v15, %v8976_v10  ;;  %v11609_v15 = vld [vmem:[#allocation131_spill] sm:$0xff] }
 0x549   : > { %3062 = vperm.xlu0 %5831, %v8973_v45   ;;  %v9153_v45 = vpack.c.bf16 %v9010_v14, %v9097_v63 }
 0x54c   : > { %3029 = vperm.xlu1 %5830, %v8992_v32   ;;  %v9122_v32 = vpop.eup %6205  ;;  %6237 = vpow2.f32 %v2704_v46 }
 0x54d   : > { %3068 = vperm.xlu0 %5831, %v8996_v30   ;;  %v2510_v30 = vsub.f32 %v11608_v28, %v8976_v10  ;;  %v2515_v28 = vsub.f32 %v8564_v9, %v8976_v10 }
 0x550   : > { %3035 = vperm.xlu1 %5830, %v9003_v40   ;;  %v9128_v40 = vpop.eup %6207  ;;  %6239 = vpow2.f32 %v2682_v33 }
 0x551   : > { %3074 = vperm.xlu0 %5831, %v9010_v14   ;;  %v9134_v11 = vpop.eup %6209  ;;  %6241 = vpow2.f32 %v2680_v50  ;;  %v9170_v14 = vpack.c.bf16 %v9044_v39, %v9128_v40 }
 0x552   : > { %v9139_v26 = vpop.eup %6211 }
 0x553   : > { %v9147_v8 = vpop.eup %6213  ;;  %v9187_v46 = vpack.c.bf16 %v9076_v31, %v9139_v26 }
 0x554   : > { %3041 = vperm.xlu1 %5830, %v9014_v48   ;;  %v2710_v48 = vmul.f32 1.442695, %v2509_v58  ;;  %v9155_v37 = vpop.eup %6215  ;;  %v2496_v58 = vsub.f32 %v11609_v15, %v8933_v19  ;;  %v9196_v50 = vpack.c.bf16 %v9086_v38, %v9147_v8  ;;  %v11611_v15 = vld [vmem:[#allocation62_spill] sm:$0xff] }
 0x555   : > { %3080 = vperm.xlu0 %5831, %v9022_v4   ;;  %v9178_v4 = vpack.c.bf16 %v9056_v47, %v9134_v11 }
 0x556   : > { %6243 = vpow2.f32 %v2710_v48  ;;  %v2690_v48 = vmul.f32 1.442695, %v2499_v61 }
 0x558   : > { %3047 = vperm.xlu1 %5830, %v9035_v21   ;;  %v2708_v21 = vmul.f32 1.442695, %v2508_v51  ;;  %v2712_v51 = vmul.f32 1.442695, %v2510_v30 }
 0x559   : > { %3086 = vperm.xlu0 %5831, %v9044_v39   ;;  %v2513_v39 = vsub.f32 %v8607_v55, %v8976_v10  ;;  %v2498_v55 = vsub.f32 %v8530_v35, %v8933_v19 }
 0x55a   : > { %6245 = vpow2.f32 %v2708_v21  ;;  %v2684_v21 = vmul.f32 1.442695, %v2496_v58  ;;  %v2514_v58 = vsub.f32 %v11611_v15, %v8976_v10 }
 0x55b   : > { %6247 = vpow2.f32 %v2686_v24  ;;  %v2688_v24 = vmul.f32 1.442695, %v2498_v55 }
 0x55c   : > { %3053 = vperm.xlu1 %5830, %v6188_v6   ;;  %v11607_v6 = vld [vmem:[#allocation48_spill] sm:$0xff] }
 0x55d   : > { %3092 = vperm.xlu0 %5831, %v9056_v47   ;;  %v2511_v52 = vsub.f32 %v11607_v6, %v8976_v10  ;;  %v11610_v47 = vld [vmem:[#allocation132_spill] sm:$0xff] }
 0x55e   : > { %v2512_v33 = vsub.f32 %v11610_v47, %v8976_v10 }
 0x55f   : > { %v2714_v60 = vmul.f32 1.442695, %v2511_v52 }
 0x560   : > { %3059 = vperm.xlu1 %5830, %v6192_v20   ;;  %v9164_v20 = vpop.eup %6217  ;;  %v2716_v30 = vmul.f32 1.442695, %v2512_v33  ;;  %v2720_v33 = vmul.f32 1.442695, %v2514_v58 }
 0x561   : > { %3098 = vperm.xlu0 %5831, %v9076_v31   ;;  %v9172_v27 = vpop.eup %6219  ;;  %v9204_v31 = vpack.c.bf16 %v9106_v29, %v9155_v37  ;;  %6249 = vpow2.f32 %v2714_v60 }
 0x562   : > { %v9180_v16 = vpop.eup %6221  ;;  %v9208_v6 = vpack.c.bf16 %v9122_v32, %v9172_v27  ;;  %6251 = vpow2.f32 %v2712_v51  ;;  %v2722_v51 = vmul.f32 1.442695, %v2515_v28 }
 0x563   : > { %v9189_v56 = vpop.eup %6223  ;;  %6253 = vpow2.f32 %v2690_v48 }
 0x564   : > { %3065 = vperm.xlu1 %5830, %v9080_v22   ;;  %v9198_v22 = vpop.eup %6225  ;;  %v9215_v35 = vpack.c.bf16 %v9164_v20, %v9189_v56  ;;  %6255 = vpow2.f32 %v2684_v21 }
 0x565   : > { %3104 = vperm.xlu0 %5831, %v9086_v38   ;;  %v6228_v0 = vpop.eup %6227  ;;  %v2718_v38 = vmul.f32 1.442695, %v2513_v39  ;;  %v9224_v61 = vpack.c.bf16 %v9180_v16, %v9198_v22 }
 0x566   : > { %v9210_v52 = vpop.eup %6229 }
 0x567   : > { %v9217_v19 = vpop.eup %6231  ;;  %6257 = vpow2.f32 %v2718_v38  ;;  %v9234_v9 = vpack.c.bf16 %v6228_v0, %v9210_v52 }
 0x568   : > { %3071 = vperm.xlu1 %5830, %v9097_v63   ;;  %v6234_v63 = vpop.eup %6233  ;;  %6259 = vpow2.f32 %v2716_v30 }
 0x569   : > { %3110 = vperm.xlu0 %5831, %v9106_v29   ;;  %v9228_v60 = vpop.eup %6235  ;;  %6261 = vpow2.f32 %v2688_v24 }
 0x56a   : > { %v9230_v39 = vpop.eup %6237  ;;  %v9239_v10 = vpack.c.bf16 %v9217_v19, %v9228_v60  ;;  %6263 = vpow2.f32 %v2722_v51 }
 0x56b   : > { %v6240_v29 = vpop.eup %6239  ;;  %v9242_v55 = vpack.c.bf16 %v6234_v63, %v9230_v39  ;;  %6265 = vpow2.f32 %v2720_v33 }
 0x56c   : > { %3077 = vperm.xlu1 %5830, %v9114_v5   ;;  %v6242_v47 = vpop.eup %6241 }
 0x56d   : > { %3116 = vperm.xlu0 %5831, %v9122_v32   ;;  %v6244_v48 = vpop.eup %6243  ;;  %v9250_v21 = vpack.c.bf16 %v6240_v29, %v6242_v47 }
 0x56e   : > { %v9244_v5 = vpop.eup %6245 }
 0x56f   : > { %v9248_v32 = vpack.c.bf16 %v6244_v48, %v9244_v5  ;;  %11613 = vst [vmem:[#allocation91_spill] sm:$0xff] %v9250_v21  ;;  %v6248_v38 = vpop.eup %6247 }
 0x570   : > { %3083 = vperm.xlu1 %5830, %v9128_v40   ;;  %v6250_v28 = vpop.eup %6249 }
 0x571   : > { %3122 = vperm.xlu0 %5831, %v6228_v0   ;;  %11612 = vst [vmem:[#allocation105_spill] sm:$0xff] %v9248_v32  ;;  %v9253_v30 = vpop.eup %6251 }
 0x572   : > { %v6254_v24 = vpop.eup %6253  ;;  %v9257_v0 = vpack.c.bf16 %v6250_v28, %v9253_v30 }
 0x573   : > { %v6256_v15 = vpop.eup %6255 }
 0x574   : > { %3089 = vperm.xlu1 %5830, %v9134_v11   ;;  %v6258_v40 = vpop.eup %6257  ;;  %11614 = vst [vmem:[#allocation66_spill] sm:$0xff] %v9257_v0  ;;  %v9261_v33 = vpack.c.bf16 %v6248_v38, %v6256_v15 }
 0x575   : > { %3128 = vperm.xlu0 %5831, %v6240_v29   ;;  %v9259_v58 = vpop.eup %6259 }
 0x576   : > { %v6262_v51 = vpop.eup %6261  ;;  %11615 = vst [vmem:[#allocation73_spill] sm:$0xff] %v9261_v33  ;;  %v9265_v11 = vpack.c.bf16 %v6258_v40, %v9259_v58  ;;  %v9277_v33 = vpop.permute.xlu0 %3982 }
 0x577   : > { %v6264_v29 = vpop.eup %6263  ;;  %v9267_v21 = vpack.c.bf16 %v6254_v24, %v6262_v51  ;;  %11619 = vst [vmem:[#allocation33_spill] sm:$0xff] %v9277_v33 }
 0x578   : > { %3095 = vperm.xlu1 %5830, %v9139_v26   ;;  %11616 = vst [vmem:[#allocation75_spill] sm:$0xff] %v9265_v11  ;;  %v9269_v26 = vpop.eup %6265 }
 0x579   : > { %3134 = vperm.xlu0 %5831, %v6248_v38   ;;  %11617 = vst [vmem:[#allocation124_spill] sm:$0xff] %v9267_v21  ;;  %v9274_v0 = vpack.c.bf16 %v6264_v29, %v9269_v26  ;;  %v2418_v38 = vsub.s32 5, %v11563_v23 }
 0x57b   : > { %11618 = vst [vmem:[#allocation27_spill] sm:$0xff] %v9274_v0 }
 0x57c   : > { %3101 = vperm.xlu1 %5830, %v9147_v8   ;;  %v9282_v8 = vrot.slane %v8762_v57, %v2418_v38  ;;  %v11626_v38 = vld [vmem:[#allocation86_spill] sm:$0xff] }
 0x57d   : > { %3140 = vperm.xlu0 %5831, %v6254_v24  }
 0x57e   : > { %v2519_v11 = vsub.f32 %v11626_v38, %v9282_v8 }
 0x580   : > { %3107 = vperm.xlu1 %5830, %v9155_v37  }
 0x581   : > { %3146 = vperm.xlu0 %5831, %v9164_v20   ;;  %v11623_v20 = vld [vmem:[#allocation101_spill] sm:$0xff] }
 0x582   : > { %v2517_v33 = vsub.f32 %v11623_v20, %v9282_v8  ;;  %v11629_v20 = vld [vmem:[#allocation42_spill] sm:$0xff] }
 0x584   : > { %3113 = vperm.xlu1 %5830, %v9172_v27  }
 0x585   : > { %3152 = vperm.xlu0 %5831, %v9180_v16   ;;  %v2726_v16 = vmul.f32 1.442695, %v2517_v33  ;;  %v11632_v33 = vld [vmem:[#allocation130_spill] sm:$0xff] }
 0x586   : > { %v2523_v38 = vsub.f32 %v11632_v33, %v9282_v8 }
 0x587   : > { %v9284_v24 = vpop.permute.xlu1 %2954  ;;  %6267 = vpow2.f32 %v2726_v16  ;;  %v11635_v16 = vld [vmem:[#allocation59_spill] sm:$0xff] }
 0x588   : > { %11620 = vst [vmem:[#allocation114_spill] sm:$0xff] %v9284_v24  ;;  %v9286_v21 = vpop.permute.xlu0 %2951  ;;  %3119 = vperm.xlu1 %5830, %v9210_v52  }
 0x589   : > { %11621 = vst [vmem:[#allocation92_spill] sm:$0xff] %v9286_v21  ;;  %3158 = vperm.xlu0 %5831, %v9217_v19   ;;  %v2730_v19 = vmul.f32 1.442695, %v2519_v11  ;;  %v2738_v11 = vmul.f32 1.442695, %v2523_v38 }
 0x58b   : > { %v9290_v37 = vpop.permute.xlu1 %2957  ;;  %6269 = vpow2.f32 %v2730_v19 }
 0x58c   : > { %11622 = vst [vmem:[#allocation116_spill] sm:$0xff] %v9290_v37  ;;  %v9294_v0 = vpop.permute.xlu0 %2978  ;;  %3125 = vperm.xlu1 %5830, %v6242_v47   ;;  %v2521_v37 = vsub.f32 %v11629_v20, %v9282_v8  ;;  %v11638_v20 = vld [vmem:[#allocation54_spill] sm:$0xff] }
 0x58d   : > { %11624 = vst [vmem:[#allocation78_spill] sm:$0xff] %v9294_v0  ;;  %3164 = vperm.xlu0 %5831, %v6234_v63  }
 0x58e   : > { %v2734_v47 = vmul.f32 1.442695, %v2521_v37 }
 0x58f   : > { %v9296_v27 = vpop.permute.xlu1 %2960 }
 0x590   : > { %11625 = vst [vmem:[#allocation49_spill] sm:$0xff] %v9296_v27  ;;  %v9300_v21 = vpop.permute.xlu0 %2984  ;;  %3131 = vperm.xlu1 %5830, %v6256_v15   ;;  %6271 = vpow2.f32 %v2734_v47  ;;  %v11640_v47 = vld [vmem:[#allocation106_spill] sm:$0xff] }
 0x591   : > { %11627 = vst [vmem:[#allocation34_spill] sm:$0xff] %v9300_v21  ;;  %3170 = vperm.xlu0 %5831, %v6244_v48   ;;  %6273 = vpow2.f32 %v2738_v11  ;;  %v2516_v38 = vsub.f32 %v11640_v47, %v9282_v8  ;;  %v11644_v47 = vld [vmem:[#allocation81_spill] sm:$0xff] }
 0x593   : > { %v9302_v52 = vpop.permute.xlu1 %2963 }
 0x594   : > { %11628 = vst [vmem:[#allocation118_spill] sm:$0xff] %v9302_v52  ;;  %v9306_v0 = vpop.permute.xlu0 %2990  ;;  %3137 = vperm.xlu1 %5830, %v6262_v51   ;;  %v2525_v51 = vsub.f32 %v11635_v16, %v9282_v8  ;;  %v11642_v16 = vld [vmem:[#allocation140_spill] sm:$0xff] }
 0x595   : > { %11630 = vst [vmem:[#allocation96_spill] sm:$0xff] %v9306_v0  ;;  %3176 = vperm.xlu0 %5831, %v6250_v28   ;;  %v2518_v0 = vsub.f32 %v11644_v47, %v9282_v8 }
 0x596   : > { %v2742_v19 = vmul.f32 1.442695, %v2525_v51  ;;  %v2529_v51 = vsub.f32 %v11642_v16, %v9282_v8  ;;  %v11646_v16 = vld [vmem:[#allocation136_spill] sm:$0xff] }
 0x597   : > { %v9308_v63 = vpop.permute.xlu1 %2966 }
 0x598   : > { %11631 = vst [vmem:[#allocation64_spill] sm:$0xff] %v9308_v63  ;;  %v9312_v15 = vpop.permute.xlu0 %2996  ;;  %3143 = vperm.xlu1 %5830, %v9189_v56   ;;  %v2527_v56 = vsub.f32 %v11638_v20, %v9282_v8  ;;  %6275 = vpow2.f32 %v2742_v19 }
 0x599   : > { %11633 = vst [vmem:[#allocation128_spill] sm:$0xff] %v9312_v15  ;;  %3182 = vperm.xlu0 %5831, %v6258_v40   ;;  %v9326_v40 = vpop.eup %6267 }
 0x59a   : > { %v2746_v11 = vmul.f32 1.442695, %v2527_v56  ;;  %v9339_v20 = vpop.eup %6269  ;;  %v2750_v56 = vmul.f32 1.442695, %v2529_v51  ;;  %v11650_v51 = vld [vmem:[#allocation102_spill] sm:$0xff] }
 0x59b   : > { %v9315_v48 = vpop.permute.xlu1 %2969 }
 0x59c   : > { %11634 = vst [vmem:[#allocation93_spill] sm:$0xff] %v9315_v48  ;;  %v9319_v28 = vpop.permute.xlu0 %3002  ;;  %3149 = vperm.xlu1 %5830, %v9198_v22   ;;  %v2422_v22 = vsub.s32 6, %v11563_v23  ;;  %6277 = vpow2.f32 %v2746_v11 }
 0x59d   : > { %11636 = vst [vmem:[#allocation117_spill] sm:$0xff] %v9319_v28  ;;  %3188 = vperm.xlu0 %5831, %v6264_v29  }
 0x59e   : > { %v9348_v21 = vrot.slane %v8762_v57, %v2422_v22 }
 0x59f   : > { %v9322_v37 = vpop.permute.xlu1 %2972 }
 0x5a0   : > { %11637 = vst [vmem:[#allocation80_spill] sm:$0xff] %v9322_v37  ;;  %v9328_v33 = vpop.permute.xlu0 %3008  ;;  %3155 = vperm.xlu1 %5830, %v9228_v60   ;;  %v2724_v60 = vmul.f32 1.442695, %v2516_v38  ;;  %v9354_v37 = vpop.eup %6271  ;;  %v11648_v38 = vld [vmem:[#allocation41_spill] sm:$0xff] }
 0x5a1   : > { %11639 = vst [vmem:[#allocation50_spill] sm:$0xff] %v9328_v33  ;;  %3194 = vperm.xlu0 %5831, %v9326_v40   ;;  %v2520_v22 = vsub.f32 %v11648_v38, %v9282_v8 }
 0x5a2   : > { %6279 = vpow2.f32 %v2724_v60 }
 0x5a3   : > { %v9335_v29 = vpop.permute.xlu1 %2975  ;;  %6281 = vpow2.f32 %v2750_v56  ;;  %v11654_v56 = vld [vmem:[#allocation95_spill] sm:$0xff] }
 0x5a4   : > { %11641 = vst [vmem:[#allocation36_spill] sm:$0xff] %v9335_v29  ;;  %v9341_v15 = vpop.permute.xlu0 %3014  ;;  %3161 = vperm.xlu1 %5830, %v9230_v39   ;;  %v2531_v29 = vsub.f32 %v11646_v16, %v9282_v8  ;;  %v2728_v39 = vmul.f32 1.442695, %v2518_v0  ;;  %v2533_v16 = vsub.f32 %v11650_v51, %v9348_v21  ;;  %v11652_v0 = vld [vmem:[#allocation127_spill] sm:$0xff]  ;;  %v2535_v51 = vsub.f32 %v11654_v56, %v9348_v21 }
 0x5a5   : > { %11643 = vst [vmem:[#allocation120_spill] sm:$0xff] %v9341_v15  ;;  %3200 = vperm.xlu0 %5831, %v9339_v20   ;;  %v2522_v60 = vsub.f32 %v11652_v0, %v9282_v8 }
 0x5a6   : > { %v2754_v11 = vmul.f32 1.442695, %v2531_v29  ;;  %6283 = vpow2.f32 %v2728_v39  ;;  %v2758_v29 = vmul.f32 1.442695, %v2533_v16  ;;  %v11657_v39 = vld [vmem:[#allocation88_spill] sm:$0xff] }
 0x5a7   : > { %v9350_v19 = vpop.permute.xlu1 %2981  ;;  %v11659_v16 = vld [vmem:[#allocation44_spill] sm:$0xff] }
 0x5a8   : > { %11645 = vst [vmem:[#allocation109_spill] sm:$0xff] %v9350_v19  ;;  %v9356_v15 = vpop.permute.xlu0 %3020  ;;  %3167 = vperm.xlu1 %5830, %v9244_v5   ;;  %v9366_v19 = vpop.eup %6273  ;;  %v2732_v5 = vmul.f32 1.442695, %v2520_v22  ;;  %6285 = vpow2.f32 %v2754_v11  ;;  %v2524_v22 = vsub.f32 %v11657_v39, %v9282_v8  ;;  %v2762_v11 = vmul.f32 1.442695, %v2535_v51 }
 0x5a9   : > { %11647 = vst [vmem:[#allocation100_spill] sm:$0xff] %v9356_v15  ;;  %3206 = vperm.xlu0 %5831, %v9354_v37   ;;  %v2537_v56 = vsub.f32 %v11659_v16, %v9348_v21  ;;  %v11664_v16 = vld [vmem:[#allocation30_spill] sm:$0xff] }
 0x5aa   : > { %6287 = vpow2.f32 %v2732_v5  ;;  %v11662_v5 = vld [vmem:[#allocation53_spill] sm:$0xff] }
 0x5ab   : > { %v9362_v47 = vpop.permute.xlu1 %2987  ;;  %6289 = vpow2.f32 %v2758_v29  ;;  %v2766_v51 = vmul.f32 1.442695, %v2537_v56 }
 0x5ac   : > { %11649 = vst [vmem:[#allocation74_spill] sm:$0xff] %v9362_v47  ;;  %v9368_v33 = vpop.permute.xlu0 %3026  ;;  %3173 = vperm.xlu1 %5830, %v9253_v30   ;;  %v9378_v47 = vpop.eup %6275  ;;  %v2736_v30 = vmul.f32 1.442695, %v2522_v60  ;;  %v2526_v60 = vsub.f32 %v11662_v5, %v9282_v8 }
 0x5ad   : > { %11651 = vst [vmem:[#allocation35_spill] sm:$0xff] %v9368_v33  ;;  %3212 = vperm.xlu0 %5831, %v9366_v19   ;;  %11655 = vst [vmem:[#allocation119_spill] sm:$0xff] %v9378_v47 }
 0x5ae   : > { %6291 = vpow2.f32 %v2736_v30  ;;  %v11667_v30 = vld [vmem:[#allocation138_spill] sm:$0xff] }
 0x5af   : > { %v9374_v38 = vpop.permute.xlu1 %2993  ;;  %6293 = vpow2.f32 %v2762_v11 }
 0x5b0   : > { %11653 = vst [vmem:[#allocation97_spill] sm:$0xff] %v9374_v38  ;;  %v9380_v15 = vpop.permute.xlu0 %3032  ;;  %3179 = vperm.xlu1 %5830, %v9259_v58   ;;  %v9390_v38 = vpop.eup %6277  ;;  %v2740_v58 = vmul.f32 1.442695, %v2524_v22  ;;  %v2528_v22 = vsub.f32 %v11667_v30, %v9282_v8 }
 0x5b1   : > { %11656 = vst [vmem:[#allocation82_spill] sm:$0xff] %v9380_v15  ;;  %3218 = vperm.xlu0 %5831, %v9378_v47   ;;  %11660 = vst [vmem:[#allocation38_spill] sm:$0xff] %v9390_v38  ;;  %v9398_v39 = vpop.eup %6279  ;;  %v2539_v15 = vsub.f32 %v11664_v16, %v9348_v21  ;;  %v11669_v16 = vld [vmem:[#allocation77_spill] sm:$0xff] }
 0x5b2   : > { %v9404_v48 = vpop.eup %6281  ;;  %6295 = vpow2.f32 %v2740_v58  ;;  %v2541_v63 = vsub.f32 %v11669_v16, %v9348_v21  ;;  %v2748_v58 = vmul.f32 1.442695, %v2528_v22  ;;  %v11674_v16 = vld [vmem:[#allocation58_spill] sm:$0xff] }
 0x5b3   : > { %v9386_v0 = vpop.permute.xlu1 %2999  ;;  %11665 = vst [vmem:[#allocation76_spill] sm:$0xff] %v9404_v48  ;;  %v9412_v5 = vpop.eup %6283  ;;  %6297 = vpow2.f32 %v2766_v51  ;;  %v2770_v56 = vmul.f32 1.442695, %v2539_v15 }
 0x5b4   : > { %11658 = vst [vmem:[#allocation51_spill] sm:$0xff] %v9386_v0  ;;  %v9392_v33 = vpop.permute.xlu0 %3038  ;;  %3185 = vperm.xlu1 %5830, %v9269_v26   ;;  %v2744_v26 = vmul.f32 1.442695, %v2526_v60  ;;  %v11672_v60 = vld [vmem:[#allocation133_spill] sm:$0xff]  ;;  %v2774_v15 = vmul.f32 1.442695, %v2541_v63 }
 0x5b5   : > { %11661 = vst [vmem:[#allocation122_spill] sm:$0xff] %v9392_v33  ;;  %3224 = vperm.xlu0 %5831, %v9390_v38   ;;  %v9418_v52 = vpop.eup %6285  ;;  %v2530_v30 = vsub.f32 %v11672_v60, %v9282_v8  ;;  %v11676_v8 = vld [vmem:[#allocation107_spill] sm:$0xff]  ;;  %v2426_v63 = vsub.s32 7, %v11563_v23 }
 0x5b6   : > { %11670 = vst [vmem:[#allocation121_spill] sm:$0xff] %v9418_v52  ;;  %6299 = vpow2.f32 %v2744_v26  ;;  %v2532_v22 = vsub.f32 %v11676_v8, %v9348_v21 }
 0x5b7   : > { %v9400_v29 = vpop.permute.xlu1 %3005  ;;  %v9426_v27 = vpop.eup %6287  ;;  %6301 = vpow2.f32 %v2770_v56  ;;  %v2752_v26 = vmul.f32 1.442695, %v2530_v30  ;;  %v11680_v30 = vld [vmem:[#allocation83_spill] sm:$0xff] }
 0x5b8   : > { %11663 = vst [vmem:[#allocation103_spill] sm:$0xff] %v9400_v29  ;;  %v9406_v33 = vpop.permute.xlu0 %3044  ;;  %3191 = vperm.xlu1 %5830, %v9398_v39   ;;  %v9432_v28 = vpop.eup %6289  ;;  %6303 = vpow2.f32 %v2748_v58  ;;  %v2756_v58 = vmul.f32 1.442695, %v2532_v22  ;;  %v2534_v23 = vsub.f32 %v11680_v30, %v9348_v21 }
 0x5b9   : > { %11666 = vst [vmem:[#allocation37_spill] sm:$0xff] %v9406_v33  ;;  %3230 = vperm.xlu0 %5831, %v9404_v48   ;;  %6305 = vpow2.f32 %v2774_v15 }
 0x5ba   : > { %6307 = vpow2.f32 %v2752_v26  ;;  %v2760_v26 = vmul.f32 1.442695, %v2534_v23  ;;  %v11691_v23 = vld [vmem:[#allocation29_spill] sm:$0xff] }
 0x5bb   : > { %v9414_v11 = vpop.permute.xlu1 %3011  ;;  %v9440_v60 = vpop.eup %6291 }
 0x5bc   : > { %11668 = vst [vmem:[#allocation98_spill] sm:$0xff] %v9414_v11  ;;  %v9420_v33 = vpop.permute.xlu0 %3050  ;;  %3197 = vperm.xlu1 %5830, %v9412_v5   ;;  %v2543_v11 = vsub.f32 %v11674_v16, %v9348_v21  ;;  %v9447_v29 = vpop.eup %6293 }
 0x5bd   : > { %11671 = vst [vmem:[#allocation84_spill] sm:$0xff] %v9420_v33  ;;  %3236 = vperm.xlu0 %5831, %v9418_v52  }
 0x5be   : > { %v2778_v16 = vmul.f32 1.442695, %v2543_v11  ;;  %v9458_v11 = vrot.slane %v8762_v57, %v2426_v63  ;;  %v11685_v57 = vld [vmem:[#allocation43_spill] sm:$0xff] }
 0x5bf   : > { %v9428_v51 = vpop.permute.xlu1 %3017  ;;  %v9455_v8 = vpop.eup %6295  ;;  %v2536_v22 = vsub.f32 %v11685_v57, %v9348_v21  ;;  %v2538_v57 = vsub.f32 %v11691_v23, %v9348_v21 }
 0x5c0   : > { %11673 = vst [vmem:[#allocation104_spill] sm:$0xff] %v9428_v51  ;;  %v9434_v33 = vpop.permute.xlu0 %3056  ;;  %3203 = vperm.xlu1 %5830, %v9426_v27   ;;  %v11678_v51 = vld [vmem:[#allocation142_spill] sm:$0xff]  ;;  %11681 = vst [vmem:[#allocation126_spill] sm:$0xff] %v9455_v8  ;;  %6309 = vpow2.f32 %v2778_v16  ;;  %v9464_v24 = vpop.eup %6297 }
 0x5c1   : > { %11675 = vst [vmem:[#allocation79_spill] sm:$0xff] %v9434_v33  ;;  %3242 = vperm.xlu0 %5831, %v9432_v28   ;;  %v2545_v33 = vsub.f32 %v11678_v51, %v9348_v21  ;;  %6311 = vpow2.f32 %v2756_v58  ;;  %v2764_v58 = vmul.f32 1.442695, %v2536_v22  ;;  %v11697_v22 = vld [vmem:[#allocation94_spill] sm:$0xff] }
 0x5c2   : > { %v2540_v23 = vsub.f32 %v11697_v22, %v9348_v21 }
 0x5c3   : > { %v9443_v56 = vpop.permute.xlu1 %3023  ;;  %v2782_v51 = vmul.f32 1.442695, %v2545_v33  ;;  %v9472_v63 = vpop.eup %6299 }
 0x5c4   : > { %11677 = vst [vmem:[#allocation52_spill] sm:$0xff] %v9443_v56  ;;  %v9449_v0 = vpop.permute.xlu0 %3062  ;;  %3209 = vperm.xlu1 %5830, %v9440_v60   ;;  %11686 = vst [vmem:[#allocation57_spill] sm:$0xff] %v9472_v63 }
 0x5c5   : > { %11679 = vst [vmem:[#allocation40_spill] sm:$0xff] %v9449_v0  ;;  %3248 = vperm.xlu0 %5831, %v9447_v29   ;;  %v11683_v0 = vld [vmem:[#allocation139_spill] sm:$0xff]  ;;  %6313 = vpow2.f32 %v2782_v51 }
 0x5c6   : > { %v2547_v56 = vsub.f32 %v11683_v0, %v9348_v21  ;;  %v11688_v0 = vld [vmem:[#allocation108_spill] sm:$0xff]  ;;  %6315 = vpow2.f32 %v2760_v26  ;;  %v2768_v26 = vmul.f32 1.442695, %v2538_v57 }
 0x5c7   : > { %v9460_v15 = vpop.permute.xlu1 %3029  ;;  %v2549_v30 = vsub.f32 %v11688_v0, %v9458_v11  ;;  %v11694_v0 = vld [vmem:[#allocation112_spill] sm:$0xff] }
 0x5c8   : > { %11682 = vst [vmem:[#allocation39_spill] sm:$0xff] %v9460_v15  ;;  %v9466_v52 = vpop.permute.xlu0 %3068  ;;  %3215 = vperm.xlu1 %5830, %v9455_v8   ;;  %v2786_v33 = vmul.f32 1.442695, %v2547_v56  ;;  %v9478_v15 = vpop.eup %6301  ;;  %v11703_v57 = vld [vmem:[#allocation56_spill] sm:$0xff] }
 0x5c9   : > { %11684 = vst [vmem:[#allocation123_spill] sm:$0xff] %v9466_v52  ;;  %3254 = vperm.xlu0 %5831, %v9464_v24   ;;  %11689 = vst [vmem:[#allocation48_spill] sm:$0xff] %v9478_v15  ;;  %v9486_v48 = vpop.eup %6303  ;;  %v2790_v56 = vmul.f32 1.442695, %v2549_v30  ;;  %v2542_v22 = vsub.f32 %v11703_v57, %v9348_v21 }
 0x5ca   : > { %11692 = vst [vmem:[#allocation131_spill] sm:$0xff] %v9486_v48  ;;  %6317 = vpow2.f32 %v2786_v33  ;;  %v9492_v38 = vpop.eup %6305 }
 0x5cb   : > { %v9474_v16 = vpop.permute.xlu1 %3035  ;;  %11695 = vst [vmem:[#allocation62_spill] sm:$0xff] %v9492_v38  ;;  %6319 = vpow2.f32 %v2764_v58  ;;  %v2772_v58 = vmul.f32 1.442695, %v2540_v23  ;;  %v11708_v23 = vld [vmem:[#allocation141_spill] sm:$0xff] }
 0x5cc   : > { %11687 = vst [vmem:[#allocation55_spill] sm:$0xff] %v9474_v16  ;;  %v9480_v52 = vpop.permute.xlu0 %3074  ;;  %3221 = vperm.xlu1 %5830, %v9472_v63   ;;  %v2551_v16 = vsub.f32 %v11694_v0, %v9458_v11  ;;  %v9500_v63 = vpop.eup %6307  ;;  %6321 = vpow2.f32 %v2790_v56  ;;  %v11700_v0 = vld [vmem:[#allocation46_spill] sm:$0xff]  ;;  %v2544_v57 = vsub.f32 %v11708_v23, %v9348_v21 }
 0x5cd   : > { %11690 = vst [vmem:[#allocation47_spill] sm:$0xff] %v9480_v52  ;;  %3260 = vperm.xlu0 %5831, %v9478_v15   ;;  %11698 = vst [vmem:[#allocation86_spill] sm:$0xff] %v9500_v63  ;;  %v9506_v32 = vpop.eup %6309  ;;  %6323 = vpow2.f32 %v2768_v26  ;;  %v2776_v26 = vmul.f32 1.442695, %v2542_v22  ;;  %v11713_v22 = vld [vmem:[#allocation137_spill] sm:$0xff] }
 0x5ce   : > { %v2794_v30 = vmul.f32 1.442695, %v2551_v16  ;;  %11701 = vst [vmem:[#allocation130_spill] sm:$0xff] %v9506_v32  ;;  %v2546_v23 = vsub.f32 %v11713_v22, %v9348_v21  ;;  %v11717_v21 = vld [vmem:[#allocation111_spill] sm:$0xff] }
 0x5cf   : > { %v9488_v51 = vpop.permute.xlu1 %3041 }
 0x5d0   : > { %11693 = vst [vmem:[#allocation132_spill] sm:$0xff] %v9488_v51  ;;  %v9494_v52 = vpop.permute.xlu0 %3080  ;;  %3227 = vperm.xlu1 %5830, %v9486_v48   ;;  %v2553_v51 = vsub.f32 %v11700_v0, %v9458_v11  ;;  %v9514_v48 = vpop.eup %6311  ;;  %6325 = vpow2.f32 %v2794_v30  ;;  %v11705_v0 = vld [vmem:[#allocation32_spill] sm:$0xff] }
 0x5d1   : > { %11696 = vst [vmem:[#allocation101_spill] sm:$0xff] %v9494_v52  ;;  %3266 = vperm.xlu0 %5831, %v9492_v38   ;;  %6327 = vpow2.f32 %v2772_v58  ;;  %v2780_v58 = vmul.f32 1.442695, %v2544_v57  ;;  %v2548_v57 = vsub.f32 %v11717_v21, %v9458_v11 }
 0x5d2   : > { %v2798_v16 = vmul.f32 1.442695, %v2553_v51  ;;  %v9520_v38 = vpop.eup %6313 }
 0x5d3   : > { %v9502_v33 = vpop.permute.xlu1 %3047  ;;  %11706 = vst [vmem:[#allocation106_spill] sm:$0xff] %v9520_v38 }
 0x5d4   : > { %11699 = vst [vmem:[#allocation42_spill] sm:$0xff] %v9502_v33  ;;  %v9508_v52 = vpop.permute.xlu0 %3086  ;;  %3233 = vperm.xlu1 %5830, %v9500_v63   ;;  %v2555_v33 = vsub.f32 %v11705_v0, %v9458_v11  ;;  %v9528_v63 = vpop.eup %6315  ;;  %6329 = vpow2.f32 %v2798_v16  ;;  %v11710_v0 = vld [vmem:[#allocation110_spill] sm:$0xff] }
 0x5d5   : > { %11702 = vst [vmem:[#allocation59_spill] sm:$0xff] %v9508_v52  ;;  %3272 = vperm.xlu0 %5831, %v9506_v32   ;;  %6331 = vpow2.f32 %v2776_v26  ;;  %v2784_v26 = vmul.f32 1.442695, %v2546_v23  ;;  %v11722_v23 = vld [vmem:[#allocation85_spill] sm:$0xff] }
 0x5d6   : > { %v2802_v51 = vmul.f32 1.442695, %v2555_v33  ;;  %v2550_v21 = vsub.f32 %v11722_v23, %v9458_v11 }
 0x5d7   : > { %v9516_v56 = vpop.permute.xlu1 %3053  ;;  %v9534_v32 = vpop.eup %6317 }
 0x5d8   : > { %11704 = vst [vmem:[#allocation54_spill] sm:$0xff] %v9516_v56  ;;  %v9522_v52 = vpop.permute.xlu0 %3092  ;;  %3239 = vperm.xlu1 %5830, %v9514_v48   ;;  %v2557_v56 = vsub.f32 %v11710_v0, %v9458_v11  ;;  %11711 = vst [vmem:[#allocation136_spill] sm:$0xff] %v9534_v32  ;;  %6333 = vpow2.f32 %v2802_v51  ;;  %v11715_v0 = vld [vmem:[#allocation61_spill] sm:$0xff] }
 0x5d9   : > { %11707 = vst [vmem:[#allocation140_spill] sm:$0xff] %v9522_v52  ;;  %3278 = vperm.xlu0 %5831, %v9520_v38   ;;  %v9542_v38 = vpop.eup %6319  ;;  %6335 = vpow2.f32 %v2780_v58  ;;  %v2788_v58 = vmul.f32 1.442695, %v2548_v57  ;;  %v11727_v57 = vld [vmem:[#allocation45_spill] sm:$0xff] }
 0x5da   : > { %v2806_v33 = vmul.f32 1.442695, %v2557_v56  ;;  %v9548_v15 = vpop.eup %6321  ;;  %v2552_v23 = vsub.f32 %v11727_v57, %v9458_v11 }
 0x5db   : > { %v9530_v30 = vpop.permute.xlu1 %3059  ;;  %v9556_v22 = vpop.eup %6323 }
 0x5dc   : > { %11709 = vst [vmem:[#allocation81_spill] sm:$0xff] %v9530_v30  ;;  %v9536_v52 = vpop.permute.xlu0 %3098  ;;  %3245 = vperm.xlu1 %5830, %v9528_v63   ;;  %v2559_v30 = vsub.f32 %v11715_v0, %v9458_v11  ;;  %11718 = vst [vmem:[#allocation95_spill] sm:$0xff] %v9556_v22  ;;  %6337 = vpow2.f32 %v2806_v33  ;;  %v11720_v0 = vld [vmem:[#allocation145_spill] sm:$0xff] }
 0x5dd   : > { %11712 = vst [vmem:[#allocation41_spill] sm:$0xff] %v9536_v52  ;;  %3284 = vperm.xlu0 %5831, %v9534_v32   ;;  %v9562_v32 = vpop.eup %6325  ;;  %6339 = vpow2.f32 %v2784_v26  ;;  %v2792_v26 = vmul.f32 1.442695, %v2550_v21  ;;  %v11732_v21 = vld [vmem:[#allocation31_spill] sm:$0xff] }
 0x5de   : > { %v2810_v56 = vmul.f32 1.442695, %v2559_v30  ;;  %v9570_v47 = vpop.eup %6327 }
 0x5df   : > { %v9544_v16 = vpop.permute.xlu1 %3065  ;;  %11723 = vst [vmem:[#allocation53_spill] sm:$0xff] %v9570_v47 }
 0x5e0   : > { %11714 = vst [vmem:[#allocation102_spill] sm:$0xff] %v9544_v16  ;;  %v9550_v52 = vpop.permute.xlu0 %3104  ;;  %3251 = vperm.xlu1 %5830, %v9542_v38   ;;  %v2561_v16 = vsub.f32 %v11720_v0, %v9458_v11  ;;  %6341 = vpow2.f32 %v2810_v56  ;;  %v11725_v0 = vld [vmem:[#allocation99_spill] sm:$0xff] }
 0x5e1   : > { %11716 = vst [vmem:[#allocation127_spill] sm:$0xff] %v9550_v52  ;;  %3290 = vperm.xlu0 %5831, %v9548_v15   ;;  %v9576_v8 = vpop.eup %6329  ;;  %6343 = vpow2.f32 %v2788_v58  ;;  %v2796_v58 = vmul.f32 1.442695, %v2552_v23 }
 0x5e2   : > { %v2814_v30 = vmul.f32 1.442695, %v2561_v16 }
 0x5e3   : > { %v9558_v51 = vpop.permute.xlu1 %3071 }
 0x5e4   : > { %11719 = vst [vmem:[#allocation88_spill] sm:$0xff] %v9558_v51  ;;  %v9564_v52 = vpop.permute.xlu0 %3110  ;;  %3257 = vperm.xlu1 %5830, %v9556_v22   ;;  %v2563_v51 = vsub.f32 %v11725_v0, %v9458_v11  ;;  %v9584_v22 = vpop.eup %6331  ;;  %6345 = vpow2.f32 %v2814_v30 }
 0x5e5   : > { %11721 = vst [vmem:[#allocation44_spill] sm:$0xff] %v9564_v52  ;;  %3296 = vperm.xlu0 %5831, %v9562_v32   ;;  %11728 = vst [vmem:[#allocation77_spill] sm:$0xff] %v9584_v22  ;;  %v9588_v0 = vpop.eup %6333  ;;  %6347 = vpow2.f32 %v2792_v26  ;;  %v11737_v26 = vld [vmem:[#allocation90_spill] sm:$0xff] }
 0x5e6   : > { %v2818_v16 = vmul.f32 1.442695, %v2563_v51  ;;  %11730 = vst [vmem:[#allocation58_spill] sm:$0xff] %v9588_v0  ;;  %v9596_v57 = vpop.eup %6335  ;;  %v2556_v23 = vsub.f32 %v11737_v26, %v9458_v11 }
 0x5e7   : > { %v9572_v33 = vpop.permute.xlu1 %3077  ;;  %11733 = vst [vmem:[#allocation142_spill] sm:$0xff] %v9596_v57 }
 0x5e8   : > { %11724 = vst [vmem:[#allocation30_spill] sm:$0xff] %v9572_v33  ;;  %v9578_v52 = vpop.permute.xlu0 %3116  ;;  %3263 = vperm.xlu1 %5830, %v9570_v47   ;;  %6349 = vpow2.f32 %v2818_v16 }
 0x5e9   : > { %11726 = vst [vmem:[#allocation138_spill] sm:$0xff] %v9578_v52  ;;  %3302 = vperm.xlu0 %5831, %v9576_v8   ;;  %v2554_v52 = vsub.f32 %v11732_v21, %v9458_v11  ;;  %v9600_v30 = vpop.eup %6337  ;;  %6351 = vpow2.f32 %v2796_v58  ;;  %v11742_v58 = vld [vmem:[#allocation60_spill] sm:$0xff] }
 0x5ea   : > { %11735 = vst [vmem:[#allocation139_spill] sm:$0xff] %v9600_v30 }
 0x5eb   : > { %v9586_v56 = vpop.permute.xlu1 %3083 }
 0x5ec   : > { %11729 = vst [vmem:[#allocation133_spill] sm:$0xff] %v9586_v56  ;;  %v9590_v33 = vpop.permute.xlu0 %3122  ;;  %3269 = vperm.xlu1 %5830, %v9584_v22   ;;  %v9608_v56 = vpop.eup %6339 }
 0x5ed   : > { %11731 = vst [vmem:[#allocation107_spill] sm:$0xff] %v9590_v33  ;;  %3308 = vperm.xlu0 %5831, %v9588_v0   ;;  %v2800_v33 = vmul.f32 1.442695, %v2554_v52  ;;  %11738 = vst [vmem:[#allocation108_spill] sm:$0xff] %v9608_v56  ;;  %v9612_v0 = vpop.eup %6341  ;;  %v2558_v52 = vsub.f32 %v11742_v58, %v9458_v11 }
 0x5ee   : > { %11740 = vst [vmem:[#allocation112_spill] sm:$0xff] %v9612_v0 }
 0x5ef   : > { %v9598_v47 = vpop.permute.xlu1 %3089  ;;  %6353 = vpow2.f32 %v2800_v33  ;;  %v11746_v33 = vld [vmem:[#allocation144_spill] sm:$0xff] }
 0x5f0   : > { %11734 = vst [vmem:[#allocation83_spill] sm:$0xff] %v9598_v47  ;;  %v9602_v51 = vpop.permute.xlu0 %3128  ;;  %3275 = vperm.xlu1 %5830, %v9596_v57   ;;  %v9620_v47 = vpop.eup %6343 }
 0x5f1   : > { %11736 = vst [vmem:[#allocation43_spill] sm:$0xff] %v9602_v51  ;;  %3314 = vperm.xlu0 %5831, %v9600_v30   ;;  %v2804_v51 = vmul.f32 1.442695, %v2556_v23  ;;  %v9624_v30 = vpop.eup %6345  ;;  %v2560_v23 = vsub.f32 %v11746_v33, %v9458_v11 }
 0x5f2   : > { %11744 = vst [vmem:[#allocation56_spill] sm:$0xff] %v9624_v30 }
 0x5f3   : > { %v9610_v21 = vpop.permute.xlu1 %3095  ;;  %6355 = vpow2.f32 %v2804_v51  ;;  %v11750_v51 = vld [vmem:[#allocation143_spill] sm:$0xff] }
 0x5f4   : > { %11739 = vst [vmem:[#allocation29_spill] sm:$0xff] %v9610_v21  ;;  %v9614_v16 = vpop.permute.xlu0 %3134  ;;  %3281 = vperm.xlu1 %5830, %v9608_v56   ;;  %v4114_v56 = vunpack.c.l.b16 %v8986_v44 }
 0x5f5   : > { %11741 = vst [vmem:[#allocation94_spill] sm:$0xff] %v9614_v16  ;;  %3320 = vperm.xlu0 %5831, %v9612_v0   ;;  %v2808_v16 = vmul.f32 1.442695, %v2558_v52  ;;  %v9632_v0 = vpop.eup %6347  ;;  %v2562_v52 = vsub.f32 %v11750_v51, %v9458_v11 }
 0x5f6   : > { %v9636_v57 = vpop.eup %6349 }
 0x5f7   : > { %v9622_v26 = vpop.permute.xlu1 %3101  ;;  %11748 = vst [vmem:[#allocation110_spill] sm:$0xff] %v9636_v57  ;;  %6357 = vpow2.f32 %v2808_v16 }
 0x5f8   : > { %11743 = vst [vmem:[#allocation46_spill] sm:$0xff] %v9622_v26  ;;  %v9626_v21 = vpop.permute.xlu0 %3140  ;;  %3287 = vperm.xlu1 %5830, %v9620_v47  }
 0x5f9   : > { %11745 = vst [vmem:[#allocation32_spill] sm:$0xff] %v9626_v21  ;;  %3326 = vperm.xlu0 %5831, %v9624_v30   ;;  %v2812_v21 = vmul.f32 1.442695, %v2560_v23  ;;  %v9644_v30 = vpop.eup %6351  ;;  %v4115_v23 = vunpack.c.h.b16 %v8986_v44 }
 0x5fb   : > { %v9634_v58 = vpop.permute.xlu1 %3107  ;;  %6359 = vpow2.f32 %v2812_v21 }
 0x5fc   : > { %11747 = vst [vmem:[#allocation141_spill] sm:$0xff] %v9634_v58  ;;  %v9638_v26 = vpop.permute.xlu0 %3146  ;;  %3293 = vperm.xlu1 %5830, %v9632_v0   ;;  %v9652_v22 = vpop.eup %6353 }
 0x5fd   : > { %11749 = vst [vmem:[#allocation137_spill] sm:$0xff] %v9638_v26  ;;  %3332 = vperm.xlu0 %5831, %v9636_v57   ;;  %v2816_v26 = vmul.f32 1.442695, %v2562_v52 }
 0x5ff   : > { %v9646_v33 = vpop.permute.xlu1 %3113  ;;  %6361 = vpow2.f32 %v2816_v26 }
 0x600   : > { %11751 = vst [vmem:[#allocation61_spill] sm:$0xff] %v9646_v33  ;;  %v9649_v58 = vpop.permute.xlu0 %3152  ;;  %3299 = vperm.xlu1 %5830, %v9644_v30   ;;  %v9660_v51 = vpop.eup %6355  ;;  %v11756_v33 = vld [vmem:[#allocation28_spill] sm:$0xff] }
 0x601   : > { %11752 = vst [vmem:[#allocation111_spill] sm:$0xff] %v9649_v58  ;;  %4243 = vperm.xlu0 %5831, %v4114_v56   ;;  %v4116_v56 = vunpack.c.l.b16 %v11756_v33 }
 0x603   : > { %v9654_v16 = vpop.permute.xlu1 %3119 }
 0x604   : > { %11753 = vst [vmem:[#allocation145_spill] sm:$0xff] %v9654_v16  ;;  %v9657_v11 = vpop.permute.xlu0 %3158  ;;  %3305 = vperm.xlu1 %5830, %v9652_v22   ;;  %v9668_v52 = vpop.eup %6357 }
 0x605   : > { %11754 = vst [vmem:[#allocation85_spill] sm:$0xff] %v9657_v11  ;;  %4246 = vperm.xlu0 %5831, %v4115_v23   ;;  %v4117_v11 = vunpack.c.h.b16 %v11756_v33  ;;  %v4119_v33 = vunpack.c.h.b16 %v9020_v36 }
 0x607   : > { %v9662_v58 = vpop.permute.xlu1 %3125 }
 0x608   : > { %11755 = vst [vmem:[#allocation99_spill] sm:$0xff] %v9662_v58  ;;  %v9665_v21 = vpop.permute.xlu0 %3164  ;;  %3311 = vperm.xlu1 %5830, %v9660_v51   ;;  %v9676_v26 = vpop.eup %6359 }
 0x609   : > { %11757 = vst [vmem:[#allocation45_spill] sm:$0xff] %v9665_v21  ;;  %4249 = vperm.xlu0 %5831, %v4116_v56   ;;  %11760 = vst [vmem:[#allocation60_spill] sm:$0xff] %v9676_v26  ;;  %v4118_v21 = vunpack.c.l.b16 %v9020_v36  ;;  %v4121_v36 = vunpack.c.h.b16 %v9033_v1 }
 0x60b   : > { %v9670_v44 = vpop.permute.xlu1 %3131 }
 0x60c   : > { %11758 = vst [vmem:[#allocation31_spill] sm:$0xff] %v9670_v44  ;;  %v9673_v16 = vpop.permute.xlu0 %3170  ;;  %3317 = vperm.xlu1 %5830, %v9668_v52   ;;  %v9684_v56 = vpop.eup %6361 }
 0x60d   : > { %11759 = vst [vmem:[#allocation90_spill] sm:$0xff] %v9673_v16  ;;  %4252 = vperm.xlu0 %5831, %v4117_v11   ;;  %11763 = vst [vmem:[#allocation28_spill] sm:$0xff] %v9684_v56  ;;  %v4122_v11 = vunpack.c.l.b16 %v9029_v43 }
 0x60f   : > { %v9678_v23 = vpop.permute.xlu1 %3137 }
 0x610   : > { %11761 = vst [vmem:[#allocation144_spill] sm:$0xff] %v9678_v23  ;;  %v9681_v58 = vpop.permute.xlu0 %3176  ;;  %3323 = vperm.xlu1 %5830, %v9676_v26  }
 0x611   : > { %11762 = vst [vmem:[#allocation143_spill] sm:$0xff] %v9681_v58  ;;  %4255 = vperm.xlu0 %5831, %v4118_v21   ;;  %v4120_v58 = vunpack.c.l.b16 %v9033_v1  ;;  %v4127_v21 = vunpack.c.h.b16 %v9042_v54  ;;  %v4124_v1 = vunpack.c.l.b16 %v9065_v13 }
 0x613   : > { %v9686_v44 = vpop.permute.xlu1 %3143 }
 0x614   : > { %11764 = vst [vmem:[#allocation147_spill] sm:$0xff] %v9686_v44  ;;  %v9689_v16 = vpop.permute.xlu0 %3182  ;;  %3329 = vperm.xlu1 %5830, %v9684_v56  }
 0x615   : > { %11765 = vst [vmem:[#allocation148_spill] sm:$0xff] %v9689_v16  ;;  %4258 = vperm.xlu0 %5831, %v4119_v33   ;;  %v4129_v33 = vunpack.c.h.b16 %v9054_v59 }
 0x617   : > { %v9693_v23 = vpop.permute.xlu1 %3149 }
 0x618   : > { %11766 = vst [vmem:[#allocation149_spill] sm:$0xff] %v9693_v23  ;;  %v9696_v57 = vpop.permute.xlu0 %3188  ;;  %4267 = vperm.xlu1 %5830, %v4122_v11   ;;  %v4123_v23 = vunpack.c.h.b16 %v9029_v43  ;;  %v4125_v43 = vunpack.c.h.b16 %v9065_v13  ;;  %v4128_v13 = vunpack.c.l.b16 %v9054_v59  ;;  %v4132_v59 = vunpack.c.l.b16 %v9070_v17 }
 0x619   : > { %11767 = vst [vmem:[#allocation150_spill] sm:$0xff] %v9696_v57  ;;  %4261 = vperm.xlu0 %5831, %v4120_v58   ;;  %v4131_v58 = vunpack.c.h.b16 %v9061_v53 }
 0x61b   : > { %v9699_v44 = vpop.permute.xlu1 %3155 }
 0x61c   : > { %11768 = vst [vmem:[#allocation151_spill] sm:$0xff] %v9699_v44  ;;  %v9702_v16 = vpop.permute.xlu0 %3194  ;;  %4282 = vperm.xlu1 %5830, %v4127_v21   ;;  %v4133_v21 = vunpack.c.h.b16 %v9070_v17  ;;  %v4136_v17 = vunpack.c.l.b16 %v9091_v7 }
 0x61d   : > { %11769 = vst [vmem:[#allocation152_spill] sm:$0xff] %v9702_v16  ;;  %4264 = vperm.xlu0 %5831, %v4121_v36  }
 0x61f   : > { %v9705_v56 = vpop.permute.xlu1 %3161 }
 0x620   : > { %11770 = vst [vmem:[#allocation153_spill] sm:$0xff] %v9705_v56  ;;  %v9708_v26 = vpop.permute.xlu0 %3200  ;;  %4288 = vperm.xlu1 %5830, %v4129_v33  }
 0x621   : > { %11771 = vst [vmem:[#allocation154_spill] sm:$0xff] %v9708_v26  ;;  %4270 = vperm.xlu0 %5831, %v4123_v23   ;;  %v4135_v23 = vunpack.c.h.b16 %v9074_v25  ;;  %v4126_v26 = vunpack.c.l.b16 %v9042_v54  ;;  %v4130_v54 = vunpack.c.l.b16 %v9061_v53  ;;  %v4134_v53 = vunpack.c.l.b16 %v9074_v25 }
 0x622   : > { %v4138_v25 = vunpack.c.l.b16 %v9095_v42 }
 0x623   : > { %v9711_v11 = vpop.permute.xlu1 %3167 }
 0x624   : > { %11772 = vst [vmem:[#allocation155_spill] sm:$0xff] %v9711_v11  ;;  %v9714_v57 = vpop.permute.xlu0 %3206  ;;  %4294 = vperm.xlu1 %5830, %v4131_v58   ;;  %v4137_v58 = vunpack.c.h.b16 %v9091_v7  ;;  %v4140_v7 = vunpack.c.l.b16 %v9104_v62 }
 0x625   : > { %11773 = vst [vmem:[#allocation156_spill] sm:$0xff] %v9714_v57  ;;  %4273 = vperm.xlu0 %5831, %v4124_v1  }
 0x627   : > { %v9717_v36 = vpop.permute.xlu1 %3173 }
 0x628   : > { %11774 = vst [vmem:[#allocation157_spill] sm:$0xff] %v9717_v36  ;;  %v9720_v16 = vpop.permute.xlu0 %3212  ;;  %4300 = vperm.xlu1 %5830, %v4133_v21   ;;  %v4139_v21 = vunpack.c.h.b16 %v9095_v42  ;;  %v4142_v42 = vunpack.c.l.b16 %v9112_v2 }
 0x629   : > { %11775 = vst [vmem:[#allocation158_spill] sm:$0xff] %v9720_v16  ;;  %4276 = vperm.xlu0 %5831, %v4125_v43  }
 0x62b   : > { %v9723_v33 = vpop.permute.xlu1 %3179 }
 0x62c   : > { %11776 = vst [vmem:[#allocation159_spill] sm:$0xff] %v9723_v33  ;;  %v9726_v11 = vpop.permute.xlu0 %3218  ;;  %4306 = vperm.xlu1 %5830, %v4135_v23  }
 0x62d   : > { %11777 = vst [vmem:[#allocation160_spill] sm:$0xff] %v9726_v11  ;;  %4279 = vperm.xlu0 %5831, %v4126_v26   ;;  %v4141_v26 = vunpack.c.h.b16 %v9104_v62  ;;  %v4144_v62 = vunpack.c.l.b16 %v9120_v12 }
 0x62f   : > { %v9729_v1 = vpop.permute.xlu1 %3185 }
 0x630   : > { %11778 = vst [vmem:[#allocation161_spill] sm:$0xff] %v9729_v1  ;;  %v9732_v36 = vpop.permute.xlu0 %3224  ;;  %4312 = vperm.xlu1 %5830, %v4137_v58   ;;  %v4143_v58 = vunpack.c.h.b16 %v9112_v2  ;;  %v4146_v2 = vunpack.c.l.b16 %v9126_v34 }
 0x631   : > { %11779 = vst [vmem:[#allocation162_spill] sm:$0xff] %v9732_v36  ;;  %4285 = vperm.xlu0 %5831, %v4128_v13  }
 0x633   : > { %v9735_v43 = vpop.permute.xlu1 %3191 }
 0x634   : > { %11780 = vst [vmem:[#allocation163_spill] sm:$0xff] %v9735_v43  ;;  %v9738_v33 = vpop.permute.xlu0 %3230  ;;  %4318 = vperm.xlu1 %5830, %v4139_v21   ;;  %v4145_v21 = vunpack.c.h.b16 %v9120_v12  ;;  %v4148_v12 = vunpack.c.l.b16 %v9132_v41  ;;  %v11865_v43 = vld [vmem:[#allocation49_spill] sm:$0xff] }
 0x635   : > { %11781 = vst [vmem:[#allocation164_spill] sm:$0xff] %v9738_v33  ;;  %4291 = vperm.xlu0 %5831, %v4130_v54  }
 0x637   : > { %v9741_v23 = vpop.permute.xlu1 %3197 }
 0x638   : > { %11782 = vst [vmem:[#allocation165_spill] sm:$0xff] %v9741_v23  ;;  %v9744_v1 = vpop.permute.xlu0 %3236  ;;  %4324 = vperm.xlu1 %5830, %v4141_v26   ;;  %v4147_v26 = vunpack.c.h.b16 %v9126_v34  ;;  %v4150_v34 = vunpack.c.l.b16 %v9137_v49  ;;  %v11864_v23 = vld [vmem:[#allocation65_spill] sm:$0xff] }
 0x639   : > { %11783 = vst [vmem:[#allocation166_spill] sm:$0xff] %v9744_v1  ;;  %4297 = vperm.xlu0 %5831, %v4132_v59  }
 0x63b   : > { %v9747_v13 = vpop.permute.xlu1 %3203 }
 0x63c   : > { %11784 = vst [vmem:[#allocation167_spill] sm:$0xff] %v9747_v13  ;;  %v9750_v36 = vpop.permute.xlu0 %3242  ;;  %4330 = vperm.xlu1 %5830, %v4143_v58   ;;  %v4149_v58 = vunpack.c.h.b16 %v9132_v41  ;;  %v4152_v41 = vunpack.c.l.b16 %v9145_v3 }
 0x63d   : > { %11785 = vst [vmem:[#allocation168_spill] sm:$0xff] %v9750_v36  ;;  %4303 = vperm.xlu0 %5831, %v4134_v53  }
 0x63f   : > { %v9753_v54 = vpop.permute.xlu1 %3209 }
 0x640   : > { %11786 = vst [vmem:[#allocation169_spill] sm:$0xff] %v9753_v54  ;;  %v9756_v33 = vpop.permute.xlu0 %3248  ;;  %4336 = vperm.xlu1 %5830, %v4145_v21   ;;  %v4151_v21 = vunpack.c.h.b16 %v9137_v49  ;;  %v4154_v49 = vunpack.c.l.b16 %v9153_v45  ;;  %v11850_v54 = vld [vmem:[#allocation121_spill] sm:$0xff] }
 0x641   : > { %11787 = vst [vmem:[#allocation170_spill] sm:$0xff] %v9756_v33  ;;  %4309 = vperm.xlu0 %5831, %v4136_v17  }
 0x643   : > { %v9759_v59 = vpop.permute.xlu1 %3215 }
 0x644   : > { %11788 = vst [vmem:[#allocation171_spill] sm:$0xff] %v9759_v59  ;;  %v9762_v1 = vpop.permute.xlu0 %3254  ;;  %4342 = vperm.xlu1 %5830, %v4147_v26   ;;  %v4153_v26 = vunpack.c.h.b16 %v9145_v3  ;;  %v4156_v3 = vunpack.c.l.b16 %v9162_v18 }
 0x645   : > { %11789 = vst [vmem:[#allocation172_spill] sm:$0xff] %v9762_v1  ;;  %4315 = vperm.xlu0 %5831, %v4138_v25   ;;  %v11846_v1 = vld [vmem:[#allocation131_spill] sm:$0xff] }
 0x647   : > { %v9765_v53 = vpop.permute.xlu1 %3221 }
 0x648   : > { %11790 = vst [vmem:[#allocation173_spill] sm:$0xff] %v9765_v53  ;;  %v9768_v11 = vpop.permute.xlu0 %3260  ;;  %4348 = vperm.xlu1 %5830, %v4149_v58   ;;  %v4155_v58 = vunpack.c.h.b16 %v9153_v45  ;;  %v4158_v45 = vunpack.c.l.b16 %v9170_v14 }
 0x649   : > { %11791 = vst [vmem:[#allocation174_spill] sm:$0xff] %v9768_v11  ;;  %4321 = vperm.xlu0 %5831, %v4140_v7  }
 0x64b   : > { %v9771_v17 = vpop.permute.xlu1 %3227 }
 0x64c   : > { %11792 = vst [vmem:[#allocation175_spill] sm:$0xff] %v9771_v17  ;;  %v9774_v59 = vpop.permute.xlu0 %3266  ;;  %4354 = vperm.xlu1 %5830, %v4151_v21   ;;  %v4157_v21 = vunpack.c.h.b16 %v9162_v18  ;;  %v4160_v18 = vunpack.c.l.b16 %v9178_v4 }
 0x64d   : > { %11793 = vst [vmem:[#allocation176_spill] sm:$0xff] %v9774_v59  ;;  %4327 = vperm.xlu0 %5831, %v4142_v42  }
 0x64f   : > { %v9777_v25 = vpop.permute.xlu1 %3233 }
 0x650   : > { %11794 = vst [vmem:[#allocation177_spill] sm:$0xff] %v9777_v25  ;;  %v9780_v53 = vpop.permute.xlu0 %3272  ;;  %4360 = vperm.xlu1 %5830, %v4153_v26   ;;  %v4159_v26 = vunpack.c.h.b16 %v9170_v14  ;;  %v4162_v14 = vunpack.c.l.b16 %v9187_v46 }
 0x651   : > { %11795 = vst [vmem:[#allocation178_spill] sm:$0xff] %v9780_v53  ;;  %4333 = vperm.xlu0 %5831, %v4144_v62  }
 0x653   : > { %v9783_v7 = vpop.permute.xlu1 %3239 }
 0x654   : > { %11796 = vst [vmem:[#allocation179_spill] sm:$0xff] %v9783_v7  ;;  %v9786_v17 = vpop.permute.xlu0 %3278  ;;  %4366 = vperm.xlu1 %5830, %v4155_v58   ;;  %v4161_v58 = vunpack.c.h.b16 %v9178_v4  ;;  %v11871_v7 = vld [vmem:[#allocation42_spill] sm:$0xff] }
 0x655   : > { %11797 = vst [vmem:[#allocation180_spill] sm:$0xff] %v9786_v17  ;;  %4339 = vperm.xlu0 %5831, %v4146_v2  }
 0x657   : > { %v9789_v42 = vpop.permute.xlu1 %3245 }
 0x658   : > { %11798 = vst [vmem:[#allocation181_spill] sm:$0xff] %v9789_v42  ;;  %v9792_v25 = vpop.permute.xlu0 %3284  ;;  %4372 = vperm.xlu1 %5830, %v4157_v21   ;;  %v4163_v21 = vunpack.c.h.b16 %v9187_v46  ;;  %v4027_v46 = vpack.c.bf16 %v9339_v20, %v9412_v5 }
 0x659   : > { %11799 = vst [vmem:[#allocation182_spill] sm:$0xff] %v9792_v25  ;;  %4345 = vperm.xlu0 %5831, %v4148_v12  }
 0x65b   : > { %v9795_v62 = vpop.permute.xlu1 %3251 }
 0x65c   : > { %11800 = vst [vmem:[#allocation183_spill] sm:$0xff] %v9795_v62  ;;  %v9798_v53 = vpop.permute.xlu0 %3290  ;;  %4378 = vperm.xlu1 %5830, %v4159_v26   ;;  %v4165_v26 = vunpack.c.h.b16 %v9196_v50  ;;  %v11847_v62 = vld [vmem:[#allocation76_spill] sm:$0xff] }
 0x65d   : > { %11801 = vst [vmem:[#allocation184_spill] sm:$0xff] %v9798_v53  ;;  %4351 = vperm.xlu0 %5831, %v4150_v34   ;;  %v11853_v53 = vld [vmem:[#allocation114_spill] sm:$0xff] }
 0x65f   : > { %v9801_v2 = vpop.permute.xlu1 %3257 }
 0x660   : > { %11802 = vst [vmem:[#allocation185_spill] sm:$0xff] %v9801_v2  ;;  %v9804_v17 = vpop.permute.xlu0 %3296  ;;  %4384 = vperm.xlu1 %5830, %v4161_v58   ;;  %v4167_v58 = vunpack.c.h.b16 %v9204_v31  ;;  %v11843_v2 = vld [vmem:[#allocation130_spill] sm:$0xff] }
 0x661   : > { %11803 = vst [vmem:[#allocation186_spill] sm:$0xff] %v9804_v17  ;;  %4357 = vperm.xlu0 %5831, %v4152_v41  }
 0x663   : > { %v9807_v12 = vpop.permute.xlu1 %3263 }
 0x664   : > { %11804 = vst [vmem:[#allocation187_spill] sm:$0xff] %v9807_v12  ;;  %v9810_v25 = vpop.permute.xlu0 %3302  ;;  %4390 = vperm.xlu1 %5830, %v4163_v21   ;;  %v4169_v21 = vunpack.c.h.b16 %v9208_v6  ;;  %v11837_v12 = vld [vmem:[#allocation62_spill] sm:$0xff] }
 0x665   : > { %11805 = vst [vmem:[#allocation188_spill] sm:$0xff] %v9810_v25  ;;  %4363 = vperm.xlu0 %5831, %v4154_v49  }
 0x667   : > { %v9813_v34 = vpop.permute.xlu1 %3269 }
 0x668   : > { %11806 = vst [vmem:[#allocation189_spill] sm:$0xff] %v9813_v34  ;;  %v9816_v59 = vpop.permute.xlu0 %3308  ;;  %4396 = vperm.xlu1 %5830, %v4165_v26   ;;  %v4178_v26 = vunpack.c.l.b16 %v9215_v35 }
 0x669   : > { %11807 = vst [vmem:[#allocation190_spill] sm:$0xff] %v9816_v59  ;;  %4369 = vperm.xlu0 %5831, %v4156_v3  }
 0x66b   : > { %v9819_v41 = vpop.permute.xlu1 %3275 }
 0x66c   : > { %11808 = vst [vmem:[#allocation191_spill] sm:$0xff] %v9819_v41  ;;  %v9822_v11 = vpop.permute.xlu0 %3314  ;;  %4402 = vperm.xlu1 %5830, %v4167_v58   ;;  %v4180_v58 = vunpack.c.l.b16 %v9224_v61 }
 0x66d   : > { %11809 = vst [vmem:[#allocation192_spill] sm:$0xff] %v9822_v11  ;;  %4375 = vperm.xlu0 %5831, %v4158_v45   ;;  %v4026_v45 = vpack.c.bf16 %v9326_v40, %v9398_v39  ;;  %v4196_v40 = vunpack.c.l.b16 %v4027_v46 }
 0x66f   : > { %v9825_v49 = vpop.permute.xlu1 %3281 }
 0x670   : > { %11810 = vst [vmem:[#allocation193_spill] sm:$0xff] %v9825_v49  ;;  %v9828_v34 = vpop.permute.xlu0 %3320  ;;  %4408 = vperm.xlu1 %5830, %v4169_v21   ;;  %v4164_v21 = vunpack.c.l.b16 %v9196_v50  ;;  %v4195_v49 = vunpack.c.h.b16 %v4026_v45  ;;  %v4034_v50 = vpack.c.bf16 %v9432_v28, %v9514_v48  ;;  %v4042_v48 = vpack.c.bf16 %v9548_v15, %v9620_v47 }
 0x671   : > { %11811 = vst [vmem:[#allocation194_spill] sm:$0xff] %v9828_v34  ;;  %4381 = vperm.xlu0 %5831, %v4160_v18   ;;  %v4194_v34 = vunpack.c.l.b16 %v4026_v45  ;;  %v4035_v47 = vpack.c.bf16 %v9447_v29, %v9528_v63  ;;  %v4036_v29 = vpack.c.bf16 %v9464_v24, %v9542_v38 }
 0x672   : > { %v4211_v20 = vunpack.c.h.b16 %v4034_v50  ;;  %v4210_v45 = vunpack.c.l.b16 %v4034_v50  ;;  %v4227_v24 = vunpack.c.h.b16 %v4042_v48 }
 0x673   : > { %v9831_v3 = vpop.permute.xlu1 %3287  ;;  %v4212_v50 = vunpack.c.l.b16 %v4035_v47 }
 0x674   : > { %11812 = vst [vmem:[#allocation195_spill] sm:$0xff] %v9831_v3  ;;  %v9834_v41 = vpop.permute.xlu0 %3326  ;;  %4435 = vperm.xlu1 %5830, %v4178_v26   ;;  %v4166_v26 = vunpack.c.l.b16 %v9204_v31  ;;  %v4170_v31 = vunpack.c.l.b16 %v9234_v9  ;;  %v11859_v3 = vld [vmem:[#allocation103_spill] sm:$0xff] }
 0x675   : > { %11813 = vst [vmem:[#allocation196_spill] sm:$0xff] %v9834_v41  ;;  %4387 = vperm.xlu0 %5831, %v4162_v14  }
 0x677   : > { %v9839_v4 = vpop.permute.xlu1 %3293 }
 0x678   : > { %11814 = vst [vmem:[#allocation197_spill] sm:$0xff] %v9839_v4  ;;  %v9842_v18 = vpop.permute.xlu0 %3332  ;;  %4441 = vperm.xlu1 %5830, %v4180_v58   ;;  %v4168_v58 = vunpack.c.l.b16 %v9208_v6  ;;  %v4179_v6 = vunpack.c.h.b16 %v9215_v35  ;;  %v4181_v35 = vunpack.c.h.b16 %v9224_v61  ;;  %v4182_v61 = vunpack.c.l.b16 %v9239_v10  ;;  %v11854_v4 = vld [vmem:[#allocation67_spill] sm:$0xff] }
 0x679   : > { %11815 = vst [vmem:[#allocation198_spill] sm:$0xff] %v9842_v18  ;;  %4393 = vperm.xlu0 %5831, %v4164_v21  }
 0x67b   : > { %v9846_v41 = vpop.permute.xlu1 %3299 }
 0x67c   : > { %11816 = vst [vmem:[#allocation199_spill] sm:$0xff] %v9846_v41  ;;  %v9849_v14 = vpop.permute.xlu0 %4243  ;;  %4486 = vperm.xlu1 %5830, %v4195_v49   ;;  %v4197_v49 = vunpack.c.h.b16 %v4027_v46  ;;  %v4183_v46 = vunpack.c.h.b16 %v9239_v10  ;;  %v4028_v10 = vpack.c.bf16 %v9354_v37, %v9426_v27  ;;  %v4029_v27 = vpack.c.bf16 %v9366_v19, %v9440_v60  ;;  %v11845_v41 = vld [vmem:[#allocation73_spill] sm:$0xff] }
 0x67d   : > { %4399 = vperm.xlu0 %5831, %v4166_v26  }
 0x67e   : > { %v4199_v60 = vunpack.c.h.b16 %v4028_v10  ;;  %v4200_v59 = vunpack.c.l.b16 %v4029_v27 }
 0x67f   : > { %v9853_v39 = vpop.permute.xlu1 %3305 }
 0x680   : > { %11817 = vst [vmem:[#allocation200_spill] sm:$0xff] %v9853_v39  ;;  %v9856_v21 = vpop.permute.xlu0 %4246  ;;  %4489 = vperm.xlu1 %5830, %v4196_v40   ;;  %v4226_v40 = vunpack.c.l.b16 %v4042_v48 }
 0x681   : > { %4405 = vperm.xlu0 %5831, %v4168_v58  }
 0x683   : > { %v9858_v5 = vpop.permute.xlu1 %3311 }
 0x684   : > { %11818 = vst [vmem:[#allocation201_spill] sm:$0xff] %v9858_v5  ;;  %v9861_v18 = vpop.permute.xlu0 %4249  ;;  %4534 = vperm.xlu1 %5830, %v4211_v20   ;;  %v11836_v5 = vld [vmem:[#allocation53_spill] sm:$0xff] }
 0x685   : > { %4411 = vperm.xlu0 %5831, %v4170_v31   ;;  %v4213_v31 = vunpack.c.h.b16 %v4035_v47  ;;  %v4198_v47 = vunpack.c.l.b16 %v4028_v10  ;;  %v9938_v25 = vpack.c.bf16 %v11837_v12, %v11836_v5  ;;  %v11838_v10 = vld [vmem:[#allocation57_spill] sm:$0xff]  ;;  %v11855_v12 = vld [vmem:[#allocation92_spill] sm:$0xff] }
 0x686   : > { %v3337_v36 = vrot.slane %v11855_v12, %v11854_v4  ;;  %v11863_v12 = vld [vmem:[#allocation117_spill] sm:$0xff] }
 0x687   : > { %v9865_v28 = vpop.permute.xlu1 %3317 }
 0x688   : > { %11819 = vst [vmem:[#allocation202_spill] sm:$0xff] %v9865_v28  ;;  %v9868_v26 = vpop.permute.xlu0 %4252  ;;  %4492 = vperm.xlu1 %5830, %v4197_v49  }
 0x689   : > { %4438 = vperm.xlu0 %5831, %v4179_v6  }
 0x68b   : > { %v9870_v58 = vpop.permute.xlu1 %3323 }
 0x68c   : > { %11820 = vst [vmem:[#allocation203_spill] sm:$0xff] %v9870_v58  ;;  %v9872_v11 = vpop.permute.xlu0 %4255  ;;  %4579 = vperm.xlu1 %5830, %v4226_v40  }
 0x68d   : > { %4483 = vperm.xlu0 %5831, %v4194_v34   ;;  %v4184_v34 = vunpack.c.l.b16 %v9242_v55 }
 0x68f   : > { %v9877_v15 = vpop.permute.xlu1 %3329 }
 0x690   : > { %11821 = vst [vmem:[#allocation204_spill] sm:$0xff] %v9877_v15  ;;  %v9880_v20 = vpop.permute.xlu0 %4258  ;;  %4450 = vperm.xlu1 %5830, %v4183_v46   ;;  %v4214_v46 = vunpack.c.l.b16 %v4036_v29 }
 0x691   : > { %4444 = vperm.xlu0 %5831, %v4181_v35  }
 0x693   : > { %v9882_v49 = vpop.permute.xlu1 %4267 }
 0x694   : > { %11822 = vst [vmem:[#allocation205_spill] sm:$0xff] %v9882_v49  ;;  %v9884_v6 = vpop.permute.xlu0 %4261  ;;  %4540 = vperm.xlu1 %5830, %v4213_v31   ;;  %v4185_v31 = vunpack.c.h.b16 %v9242_v55  ;;  %v4171_v55 = vunpack.c.h.b16 %v9234_v9  ;;  %v11831_v9 = vld [vmem:[#allocation95_spill] sm:$0xff] }
 0x695   : > { %4531 = vperm.xlu0 %5831, %v4210_v45  }
 0x697   : > { %v9889_v63 = vpop.permute.xlu1 %4282 }
 0x698   : > { %11823 = vst [vmem:[#allocation206_spill] sm:$0xff] %v9889_v63  ;;  %v9892_v40 = vpop.permute.xlu0 %4264  ;;  %4453 = vperm.xlu1 %5830, %v4184_v34   ;;  %v4215_v34 = vunpack.c.h.b16 %v4036_v29  ;;  %v11829_v29 = vld [vmem:[#allocation126_spill] sm:$0xff]  ;;  %v11869_v63 = vld [vmem:[#allocation64_spill] sm:$0xff] }
 0x699   : > { %4447 = vperm.xlu0 %5831, %v4182_v61  }
 0x69b   : > { %v9894_v35 = vpop.permute.xlu1 %4288 }
 0x69c   : > { %11824 = vst [vmem:[#allocation207_spill] sm:$0xff] %v9894_v35  ;;  %v9896_v15 = vpop.permute.xlu0 %4270  ;;  %4543 = vperm.xlu1 %5830, %v4214_v46   ;;  %v4043_v46 = vpack.c.bf16 %v9562_v32, %v9632_v0  ;;  %v4201_v32 = vunpack.c.h.b16 %v4029_v27  ;;  %v9924_v0 = vpack.c.bf16 %v9576_v8, %v9644_v30  ;;  %v11841_v8 = vld [vmem:[#allocation66_spill] sm:$0xff]  ;;  %v11858_v30 = vld [vmem:[#allocation63_spill] sm:$0xff] }
 0x69d   : > { %11825 = vst [vmem:[#allocation208_spill] sm:$0xff] %v9896_v15  ;;  %4537 = vperm.xlu0 %5831, %v4212_v50   ;;  %v3425_v42 = vrot.slane %v11859_v3, %v11858_v30  ;;  %v11867_v35 = vld [vmem:[#allocation118_spill] sm:$0xff]  ;;  %v11868_v3 = vld [vmem:[#allocation72_spill] sm:$0xff] }
 0x69e   : > { %v4228_v48 = vunpack.c.l.b16 %v4043_v46  ;;  %v4230_v16 = vunpack.c.l.b16 %v9924_v0  ;;  %v11885_v15 = vld [vmem:[#allocation142_spill] sm:$0xff] }
 0x69f   : > { %v9899_v45 = vpop.permute.xlu1 %4294 }
 0x6a0   : > { %v9903_v38 = vpop.permute.xlu0 %4273  ;;  %4456 = vperm.xlu1 %5830, %v4185_v31  }
 0x6a1   : > { %11826 = vst [vmem:[#allocation209_spill] sm:$0xff] %v9903_v38  ;;  %4582 = vperm.xlu0 %5831, %v4227_v24   ;;  %v11830_v24 = vld [vmem:[#allocation119_spill] sm:$0xff] }
 0x6a2   : > { %v9920_v58 = vpack.c.bf16 %v11830_v24, %v11829_v29  ;;  %v11835_v29 = vld [vmem:[#allocation91_spill] sm:$0xff] }
 0x6a3   : > { %v9905_v61 = vpop.permute.xlu1 %4300 }
 0x6a4   : > { %v9909_v50 = vpop.permute.xlu0 %4276  ;;  %4546 = vperm.xlu1 %5830, %v4215_v34   ;;  %v11832_v34 = vld [vmem:[#allocation48_spill] sm:$0xff] }
 0x6a5   : > { %11827 = vst [vmem:[#allocation210_spill] sm:$0xff] %v9909_v50  ;;  %4495 = vperm.xlu0 %5831, %v4198_v47   ;;  %v9928_v47 = vpack.c.bf16 %v11832_v34, %v11831_v9  ;;  %v11839_v34 = vld [vmem:[#allocation38_spill] sm:$0xff]  ;;  %v11842_v9 = vld [vmem:[#allocation77_spill] sm:$0xff] }
 0x6a6   : > { %v9945_v39 = vpack.c.bf16 %v11839_v34, %v11838_v10  ;;  %v9957_v17 = vpack.c.bf16 %v11843_v2, %v11842_v9  ;;  %v9969_v2 = vpack.c.bf16 %v11847_v62, %v11846_v1  ;;  %v11849_v9 = vld [vmem:[#allocation86_spill] sm:$0xff]  ;;  %v11852_v34 = vld [vmem:[#allocation68_spill] sm:$0xff]  ;;  %v3351_v62 = vrot.slane %v11865_v43, %v11864_v23  ;;  %v11883_v50 = vld [vmem:[#allocation113_spill] sm:$0xff] }
 0x6a7   : > { %v9914_v37 = vpop.permute.xlu1 %4306  ;;  %v4217_v27 = vunpack.c.h.b16 %v9928_v47  ;;  %v3341_v24 = vrot.slane %v11853_v53, %v11852_v34  ;;  %v11862_v53 = vld [vmem:[#allocation116_spill] sm:$0xff]  ;;  %v3420_v57 = vrot.slane %v11863_v12, %v11852_v34  ;;  %v11866_v12 = vld [vmem:[#allocation71_spill] sm:$0xff] }
 0x6a8   : > { %v9916_v31 = vpop.permute.xlu0 %4279  ;;  %4414 = vperm.xlu1 %5830, %v4171_v55   ;;  %v11834_v55 = vld [vmem:[#allocation105_spill] sm:$0xff]  ;;  %11844 = vst [vmem:[#allocation95_spill] sm:$0xff] %v9957_v17  ;;  %11848 = vst [vmem:[#allocation48_spill] sm:$0xff] %v9969_v2  ;;  %v3346_v13 = vrot.slane %v11862_v53, %v11858_v30  ;;  %v3356_v44 = vrot.slane %v11867_v35, %v11866_v12  ;;  %v3495_v53 = vrot.slane %v11871_v7, %v11854_v4  ;;  %v11878_v7 = vld [vmem:[#allocation80_spill] sm:$0xff] }
 0x6a9   : > { %11828 = vst [vmem:[#allocation211_spill] sm:$0xff] %v9916_v31  ;;  %4585 = vperm.xlu0 %5831, %v4228_v48   ;;  %v4187_v48 = vunpack.c.h.b16 %v11834_v55  ;;  %v3342_v56 = vsel %vm1712_vm3, %v3341_v24, %v3337_v36  ;;  %v11873_v35 = vld [vmem:[#allocation69_spill] sm:$0xff] }
 0x6aa   : > { %v3347_v36 = vsel %vm1719_vm4, %v3346_v13, %v3342_v56  ;;  %v11874_v24 = vld [vmem:[#allocation93_spill] sm:$0xff]  ;;  %v11880_v13 = vld [vmem:[#allocation108_spill] sm:$0xff] }
 0x6ab   : > { %v9930_v19 = vpop.permute.xlu1 %4312 }
 0x6ac   : > { %v9932_v28 = vpop.permute.xlu0 %4285  ;;  %4504 = vperm.xlu1 %5830, %v4201_v32   ;;  %v4231_v32 = vunpack.c.h.b16 %v9924_v0 }
 0x6ad   : > { %11833 = vst [vmem:[#allocation126_spill] sm:$0xff] %v9932_v28  ;;  %4498 = vperm.xlu0 %5831, %v4199_v60   ;;  %v4229_v60 = vunpack.c.h.b16 %v4043_v46  ;;  %v11857_v46 = vld [vmem:[#allocation75_spill] sm:$0xff]  ;;  %v3361_v28 = vrot.slane %v11869_v63, %v11868_v3  ;;  %v11876_v63 = vld [vmem:[#allocation54_spill] sm:$0xff] }
 0x6af   : > { %v9951_v5 = vpop.permute.xlu1 %4318 }
 0x6b0   : > { %11840 = vst [vmem:[#allocation119_spill] sm:$0xff] %v9951_v5  ;;  %v9959_v10 = vpop.permute.xlu0 %4291  ;;  %4594 = vperm.xlu1 %5830, %v4231_v32   ;;  %v9973_v32 = vpack.c.bf16 %v11850_v54, %v11849_v9  ;;  %v3504_v54 = vrot.slane %v11876_v63, %v11858_v30  ;;  %v11884_v63 = vld [vmem:[#allocation36_spill] sm:$0xff]  ;;  %v11951_v5 = vld [vmem:[#allocation133_spill] sm:$0xff] }
 0x6b1   : > { %4588 = vperm.xlu0 %5831, %v4229_v60   ;;  %v11856_v60 = vld [vmem:[#allocation51_spill] sm:$0xff]  ;;  %v3376_v38 = vrot.slane %v11884_v63, %v11883_v50 }
 0x6b2   : > { %11851 = vst [vmem:[#allocation105_spill] sm:$0xff] %v9973_v32  ;;  %v3416_v33 = vrot.slane %v11856_v60, %v11854_v4 }
 0x6b3   : > { %v9984_v1 = vpop.permute.xlu1 %4324 }
 0x6b4   : > { %11860 = vst [vmem:[#allocation91_spill] sm:$0xff] %v9984_v1  ;;  %v9993_v60 = vpop.permute.xlu0 %4297  ;;  %4462 = vperm.xlu1 %5830, %v4187_v48   ;;  %v3421_v48 = vsel %vm1712_vm3, %v3420_v57, %v3416_v33  ;;  %v3366_v57 = vrot.slane %v11874_v24, %v11873_v35  ;;  %v11875_v33 = vld [vmem:[#allocation50_spill] sm:$0xff]  ;;  %v11881_v24 = vld [vmem:[#allocation136_spill] sm:$0xff] }
 0x6b5   : > { %4501 = vperm.xlu0 %5831, %v4200_v59   ;;  %v3426_v43 = vsel %vm1719_vm4, %v3425_v42, %v3421_v48  ;;  %v11870_v59 = vld [vmem:[#allocation98_spill] sm:$0xff]  ;;  %v3430_v0 = vrot.slane %v11875_v33, %v11864_v23  ;;  %v3352_v48 = vsel %vm1726_vm5, %v3351_v62, %v3347_v36  ;;  %v10032_v1 = vpack.c.bf16 %v11881_v24, %v11880_v13 }
 0x6b6   : > { %v3435_v9 = vrot.slane %v11870_v59, %v11866_v12  ;;  %v11877_v59 = vld [vmem:[#allocation70_spill] sm:$0xff]  ;;  %v3357_v33 = vsel %vm1733_vm6, %v3356_v44, %v3352_v48  ;;  %v11891_v48 = vld [vmem:[#allocation120_spill] sm:$0xff] }
 0x6b7   : > { %v10014_v2 = vpop.permute.xlu1 %4330  ;;  %v3371_v31 = vrot.slane %v11878_v7, %v11877_v59  ;;  %11882 = vst [vmem:[#allocation62_spill] sm:$0xff] %v10032_v1  ;;  %v11886_v62 = vld [vmem:[#allocation106_spill] sm:$0xff]  ;;  %v3362_v7 = vsel %vm1740_vm7, %v3361_v28, %v3357_v33 }
 0x6b8   : > { %11872 = vst [vmem:[#allocation53_spill] sm:$0xff] %v10014_v2  ;;  %v10023_v42 = vpop.permute.xlu0 %4303  ;;  %4552 = vperm.xlu1 %5830, %v4217_v27   ;;  %v11879_v2 = vld [vmem:[#allocation84_spill] sm:$0xff]  ;;  %v3431_v27 = vsel %vm1726_vm5, %v3430_v0, %v3426_v43  ;;  %v10040_v36 = vpack.c.bf16 %v11886_v62, %v11885_v15  ;;  %v3367_v44 = vsel %vm11890_vm11, %v3366_v57, %v3362_v7  ;;  %v11892_v15 = vld [vmem:[#allocation81_spill] sm:$0xff]  ;;  %v11896_v57 = vunpack.c.l.b16 %v11834_v55 }
 0x6b9   : > { %v3499_v56 = vrot.slane %v11879_v2, %v11852_v34  ;;  %4591 = vperm.xlu0 %5831, %v4230_v16   ;;  %v3436_v2 = vsel %vm1733_vm6, %v3435_v9, %v3431_v27  ;;  %v11888_v16 = vld [vmem:[#allocation104_spill] sm:$0xff]  ;;  %v3440_v43 = vrot.slane %v11891_v48, %v11868_v3  ;;  %v3514_v63 = vrot.slane %v11892_v15, %v11866_v12  ;;  %v11900_v48 = vld [vmem:[#allocation109_spill] sm:$0xff] }
 0x6ba   : > { %11887 = vst [vmem:[#allocation57_spill] sm:$0xff] %v10040_v36  ;;  %v3445_v17 = vrot.slane %v11888_v16, %v11873_v35  ;;  %v11893_v9 = vunpack.c.h.b16 %v11835_v29  ;;  %v3372_v33 = vsel %vm11894_vm2, %v3371_v31, %v3367_v44  ;;  %vm11897_vm11 = vcmask 589312   ;;  %v11898_v16 = vld [vmem:[#allocation58_spill] sm:$0xff]  ;;  %v11899_v44 = vld [vmem:[#allocation87_spill] sm:$0xff]  ;;  %v11945_v36 = vld [vmem:[#allocation97_spill] sm:$0xff] }
 0x6bb   : > { %v3500_v13 = vsel %vm1712_vm3, %v3499_v56, %v3495_v53  ;;  %v10047_v24 = vpop.permute.xlu1 %4336  ;;  %v11895_v53 = vld [vmem:[#allocation79_spill] sm:$0xff]  ;;  %v3377_v62 = vsel %vm11897_vm11, %v3376_v38, %v3372_v33  ;;  %v3441_v7 = vsel %vm1740_vm7, %v3440_v43, %v3436_v2  ;;  %v3386_v15 = vrot.slane %v11900_v48, %v11899_v44  ;;  %v11904_v2 = vld [vmem:[#allocation78_spill] sm:$0xff] }
 0x6bc   : > { %11889 = vst [vmem:[#allocation38_spill] sm:$0xff] %v10047_v24  ;;  %v3505_v0 = vsel %vm1719_vm4, %v3504_v54, %v3500_v13  ;;  %v10055_v28 = vpop.permute.xlu0 %4309  ;;  %4420 = vperm.xlu1 %5830, %v11893_v9   ;;  %v3509_v56 = vrot.slane %v11895_v53, %v11864_v23  ;;  %v10070_v13 = vpack.c.bf16 %v11898_v16, %v9652_v22  ;;  %vm11901_vm2 = vcmask 458112   ;;  %v11902_v9 = vld [vmem:[#allocation52_spill] sm:$0xff]  ;;  %v11903_v38 = vld [vmem:[#allocation115_spill] sm:$0xff]  ;;  %v11906_v31 = vld [vmem:[#allocation102_spill] sm:$0xff] }
 0x6bd   : > { %4459 = vperm.xlu0 %5831, %v11896_v57   ;;  %v3446_v55 = vsel %vm11901_vm2, %v3445_v17, %v3441_v7  ;;  %v3455_v53 = vrot.slane %v11902_v9, %v11883_v50  ;;  %v3381_v43 = vrot.slane %v11904_v2, %v11903_v38  ;;  %v11905_v22 = vld [vmem:[#allocation100_spill] sm:$0xff]  ;;  %v3524_v48 = vrot.slane %v11906_v31, %v11873_v35 }
 0x6be   : > { %v3510_v57 = vsel %vm1726_vm5, %v3509_v56, %v3505_v0  ;;  %v3450_v33 = vrot.slane %v11905_v22, %v11877_v59  ;;  %v11907_v17 = vunpack.c.h.b16 %v9920_v58  ;;  %v11908_v0 = vld [vmem:[#allocation40_spill] sm:$0xff]  ;;  %v11909_v7 = vunpack.c.l.b16 %v9928_v47 }
 0x6bf   : > { %v10079_v54 = vpop.permute.xlu1 %4342  ;;  %v3515_v16 = vsel %vm1733_vm6, %v3514_v63, %v3510_v57  ;;  %v3519_v56 = vrot.slane %v11908_v0, %v11868_v3  ;;  %vm11911_vm11 = vcmask 654912   ;;  %vm11912_vm2 = vcmask 523712  }
 0x6c0   : > { %v10088_v27 = vpop.permute.xlu0 %4315  ;;  %4510 = vperm.xlu1 %5830, %v11907_v17   ;;  %v3382_v57 = vsel %vm11911_vm11, %v3381_v43, %v3377_v62  ;;  %v3451_v31 = vsel %vm11912_vm2, %v3450_v33, %v3446_v55  ;;  %v4233_v1 = vunpack.c.h.b16 %v10070_v13  ;;  %v11913_v17 = vld [vmem:[#allocation139_spill] sm:$0xff]  ;;  %v11917_v62 = vld [vmem:[#allocation134_spill] sm:$0xff]  ;;  %vm11920_vm11 = vcmask 458112  }
 0x6c1   : > { %4549 = vperm.xlu0 %5831, %v11909_v7   ;;  %v10104_v32 = vpack.c.bf16 %v11913_v17, %v9660_v51  ;;  %v3387_v0 = vsel %vm11914_vm8, %v3386_v15, %v3382_v57  ;;  %v3456_v47 = vsel %vm11915_vm9, %v3455_v53, %v3451_v31  ;;  %v11916_v7 = vld [vmem:[#allocation39_spill] sm:$0xff]  ;;  %v3520_v22 = vsel %vm1740_vm7, %v3519_v56, %v3515_v16  ;;  %v11918_v43 = vld [vmem:[#allocation74_spill] sm:$0xff]  ;;  %v11921_v17 = vld [vmem:[#allocation88_spill] sm:$0xff] }
 0x6c2   : > { %v3465_v2 = vrot.slane %v11916_v7, %v11899_v44  ;;  %v3396_v55 = vrot.slane %v11918_v43, %v11917_v62  ;;  %v11919_v33 = vld [vmem:[#allocation35_spill] sm:$0xff]  ;;  %v3525_v51 = vsel %vm11920_vm11, %v3524_v48, %v3520_v22  ;;  %v3534_v15 = vrot.slane %v11921_v17, %v11883_v50  ;;  %v11923_v53 = vld [vmem:[#allocation89_spill] sm:$0xff]  ;;  %v11924_v31 = vld [vmem:[#allocation34_spill] sm:$0xff] }
 0x6c3   : > { %v10111_v63 = vpop.permute.xlu1 %4348  ;;  %v3460_v9 = vrot.slane %v11919_v33, %v11903_v38  ;;  %v3391_v7 = vrot.slane %v11924_v31, %v11923_v53  ;;  %v11925_v16 = vld [vmem:[#allocation123_spill] sm:$0xff]  ;;  %v11926_v24 = vunpack.c.l.b16 %v11835_v29  ;;  %v11927_v43 = vld [vmem:[#allocation112_spill] sm:$0xff]  ;;  %vm11929_vm8 = vcmask 654912   ;;  %v11934_v31 = vld [vmem:[#allocation30_spill] sm:$0xff] }
 0x6c4   : > { %v10120_v57 = vpop.permute.xlu0 %4321  ;;  %4600 = vperm.xlu1 %5830, %v4233_v1   ;;  %v3529_v56 = vrot.slane %v11925_v16, %v11877_v59  ;;  %v10130_v33 = vpack.c.bf16 %v11927_v43, %v9668_v52  ;;  %v4232_v17 = vunpack.c.l.b16 %v10070_v13  ;;  %vm11930_vm9 = vcmask 720512   ;;  %v11931_v29 = vld [vmem:[#allocation55_spill] sm:$0xff] }
 0x6c5   : > { %11922 = vst [vmem:[#allocation66_spill] sm:$0xff] %v10120_v57  ;;  %4417 = vperm.xlu0 %5831, %v11926_v24   ;;  %v3461_v22 = vsel %vm11929_vm8, %v3460_v9, %v3456_v47  ;;  %v3392_v49 = vsel %vm1782_vm13, %v3391_v7, %v3387_v0  ;;  %v3475_v24 = vrot.slane %v11931_v29, %v11917_v62  ;;  %v11932_v9 = vld [vmem:[#allocation82_spill] sm:$0xff]  ;;  %vm11933_vm11 = vcmask 589312   ;;  %v11937_v7 = vld [vmem:[#allocation135_spill] sm:$0xff] }
 0x6c6   : > { %11928 = vst [vmem:[#allocation77_spill] sm:$0xff] %v10130_v33  ;;  %v3466_v16 = vsel %vm11930_vm9, %v3465_v2, %v3461_v22  ;;  %v3530_v52 = vsel %vm11912_vm2, %v3529_v56, %v3525_v51  ;;  %v3397_v48 = vsel %vm1789_vm14, %v3396_v55, %v3392_v49  ;;  %v3470_v13 = vrot.slane %v11932_v9, %v11923_v53  ;;  %v11938_v22 = vld [vmem:[#allocation96_spill] sm:$0xff]  ;;  %v11939_v56 = vld [vmem:[#allocation47_spill] sm:$0xff]  ;;  %v11947_v57 = vld [vmem:[#allocation110_spill] sm:$0xff] }
 0x6c7   : > { %v10142_v43 = vpop.permute.xlu1 %4354  ;;  %v3535_v47 = vsel %vm11933_vm11, %v3534_v15, %v3530_v52  ;;  %v3544_v1 = vrot.slane %v11934_v31, %v11899_v44  ;;  %v11936_v2 = vunpack.c.h.b16 %v11841_v8  ;;  %v3401_v51 = vrot.slane %v11938_v22, %v11937_v7  ;;  %v11941_v15 = vld [vmem:[#allocation60_spill] sm:$0xff]  ;;  %v11944_v31 = vld [vmem:[#allocation125_spill] sm:$0xff] }
 0x6c8   : > { %v10150_v0 = vpop.permute.xlu0 %4327  ;;  %v3539_v29 = vrot.slane %v11939_v56, %v11903_v38  ;;  %v11940_v49 = vunpack.c.l.b16 %v9920_v58  ;;  %v11942_v52 = vld [vmem:[#allocation56_spill] sm:$0xff]  ;;  %vm11977_vm2 = vcmask 458112   ;;  %vm11980_vm11 = vcmask 523712  }
 0x6c9   : > { %11935 = vst [vmem:[#allocation130_spill] sm:$0xff] %v10150_v0  ;;  %4468 = vperm.xlu1 %5830, %v11936_v2   ;;  %v10163_v9 = vpack.c.bf16 %v11942_v52, %v11941_v15  ;;  %v3406_v0 = vrot.slane %v11945_v36, %v11944_v31  ;;  %v3471_v2 = vsel %vm1782_vm13, %v3470_v13, %v3466_v16  ;;  %v11946_v22 = vld [vmem:[#allocation28_spill] sm:$0xff]  ;;  %v11949_v15 = vld [vmem:[#allocation29_spill] sm:$0xff] }
 0x6ca   : > { %4507 = vperm.xlu0 %5831, %v11940_v49   ;;  %v10171_v44 = vpack.c.bf16 %v11947_v57, %v11946_v22  ;;  %v3402_v58 = vsel %vm1796_vm15, %v3401_v51, %v3397_v48  ;;  %v3476_v56 = vsel %vm1789_vm14, %v3475_v24, %v3471_v2  ;;  %v3540_v49 = vsel %vm11929_vm8, %v3539_v29, %v3535_v47  ;;  %v11950_v36 = vld [vmem:[#allocation132_spill] sm:$0xff]  ;;  %v11952_v22 = vld [vmem:[#allocation46_spill] sm:$0xff]  ;;  %v11956_v2 = vld [vmem:[#allocation101_spill] sm:$0xff] }
 0x6cb   : > { %11943 = vst [vmem:[#allocation73_spill] sm:$0xff] %v10163_v9  ;;  %v3574_v52 = vrot.slane %v11949_v15, %v11854_v4  ;;  %v10178_v55 = vpop.permute.xlu1 %4360  ;;  %v3485_v16 = vrot.slane %v11950_v36, %v11944_v31  ;;  %v3545_v13 = vsel %vm11930_vm9, %v3544_v1, %v3540_v49  ;;  %v3554_v57 = vrot.slane %v11951_v5, %v11917_v62  ;;  %v11955_v47 = vld [vmem:[#allocation122_spill] sm:$0xff]  ;;  %v11957_v36 = vld [vmem:[#allocation41_spill] sm:$0xff]  ;;  %vm11985_vm9 = vmmov %vm11977_vm2 }
 0x6cc   : > { %11948 = vst [vmem:[#allocation131_spill] sm:$0xff] %v10171_v44  ;;  %v3583_v48 = vrot.slane %v11952_v22, %v11858_v30  ;;  %v10187_v51 = vpop.permute.xlu0 %4333  ;;  %v11954_v24 = vunpack.c.h.b16 %v9938_v25  ;;  %v3480_v29 = vrot.slane %v11955_v47, %v11937_v7  ;;  %v3549_v15 = vrot.slane %v11956_v2, %v11923_v53  ;;  %v11958_v49 = vld [vmem:[#allocation129_spill] sm:$0xff]  ;;  %v11959_v22 = vld [vmem:[#allocation128_spill] sm:$0xff] }
 0x6cd   : > { %11953 = vst [vmem:[#allocation76_spill] sm:$0xff] %v10187_v51  ;;  %v3578_v1 = vrot.slane %v11957_v36, %v11852_v34  ;;  %v4708_v5 = vrot.slane %v9959_v10, %v11854_v4  ;;  %v10202_v33 = vsel %vm1803_vm0, %v3406_v0, %v3402_v58  ;;  %v4712_v10 = vrot.slane %v9899_v45, %v11852_v34  ;;  %v11960_v44 = vld [vmem:[#allocation37_spill] sm:$0xff] }
 0x6ce   : > { %4558 = vperm.xlu1 %5830, %v11954_v24   ;;  %4597 = vperm.xlu0 %5831, %v4232_v17   ;;  %v4717_v24 = vrot.slane %v9993_v60, %v11858_v30  ;;  %v3481_v2 = vsel %vm1796_vm15, %v3480_v29, %v3476_v56  ;;  %v3550_v51 = vsel %vm1782_vm13, %v3549_v15, %v3545_v13  ;;  %v11961_v56 = vunpack.c.h.b16 %v11845_v41 }
 0x6cf   : > { %v3579_v36 = vsel %vm1712_vm3, %v3578_v1, %v3574_v52  ;;  %v10212_v17 = vpop.permute.xlu1 %4366  ;;  %v3490_v0 = vrot.slane %v11960_v44, %v11958_v49  ;;  %v3486_v58 = vsel %vm1803_vm0, %v3485_v16, %v3481_v2  ;;  %v3555_v60 = vsel %vm1789_vm14, %v3554_v57, %v3550_v51  ;;  %v11962_v52 = vld [vmem:[#allocation141_spill] sm:$0xff]  ;;  %v11964_v57 = vld [vmem:[#allocation59_spill] sm:$0xff] }
 0x6d0   : > { %v3584_v47 = vsel %vm1719_vm4, %v3583_v48, %v3579_v36  ;;  %v4340_v9 = vpop.permute.xlu0 %4339  ;;  %v3593_v13 = vrot.slane %v11962_v52, %v11866_v12  ;;  %v4713_v45 = vsel %vm1712_vm3, %v4712_v10, %v4708_v5  ;;  %v4791_v29 = vrot.slane %v10079_v54, %v11852_v34  ;;  %v11965_v51 = vld [vmem:[#allocation127_spill] sm:$0xff]  ;;  %v11966_v54 = vld [vmem:[#allocation44_spill] sm:$0xff] }
 0x6d1   : > { %v4787_v44 = vrot.slane %v4340_v9, %v11854_v4  ;;  %v11963_v16 = vunpack.c.l.b16 %v11841_v8  ;;  %v3559_v48 = vrot.slane %v11964_v57, %v11937_v7  ;;  %v3588_v15 = vrot.slane %v11965_v51, %v11864_v23 }
 0x6d2   : > { %4426 = vperm.xlu1 %5830, %v11961_v56   ;;  %v4718_v1 = vsel %vm1719_vm4, %v4717_v24, %v4713_v45  ;;  %v4727_v2 = vrot.slane %v10023_v42, %v11866_v12  ;;  %v10237_v5 = vsel %vm1810_vm1, %v3490_v0, %v3486_v58  ;;  %v3598_v9 = vrot.slane %v11966_v54, %v11868_v3  ;;  %v11967_v56 = vld [vmem:[#allocation138_spill] sm:$0xff]  ;;  %v11968_v24 = vld [vmem:[#allocation107_spill] sm:$0xff] }
 0x6d3   : > { %4465 = vperm.xlu0 %5831, %v11963_v16   ;;  %v4722_v8 = vrot.slane %v9905_v61, %v11864_v23  ;;  %v4792_v36 = vsel %vm1712_vm3, %v4791_v29, %v4787_v44  ;;  %v10244_v10 = vpop.permute.xlu1 %4372  ;;  %v3608_v52 = vrot.slane %v11967_v56, %v11877_v59  ;;  %v3618_v45 = vrot.slane %v11968_v24, %v11903_v38  ;;  %v11970_v61 = vld [vmem:[#allocation83_spill] sm:$0xff] }
 0x6d4   : > { %v10251_v42 = vsel %vm1796_vm15, %v3559_v48, %v3555_v60  ;;  %v3589_v0 = vsel %vm1726_vm5, %v3588_v15, %v3584_v47  ;;  %v4346_v58 = vpop.permute.xlu0 %4345  ;;  %v11969_v16 = vunpack.c.h.b16 %v9945_v39  ;;  %v11971_v54 = vunpack.c.l.b16 %v9938_v25  ;;  %v11972_v60 = vld [vmem:[#allocation43_spill] sm:$0xff] }
 0x6d5   : > { %v3594_v44 = vsel %vm1733_vm6, %v3593_v13, %v3589_v0  ;;  %v4723_v57 = vsel %vm1726_vm5, %v4722_v8, %v4718_v1  ;;  %v4796_v51 = vrot.slane %v4346_v58, %v11858_v30  ;;  %v3628_v48 = vrot.slane %v11972_v60, %v11923_v53  ;;  %v11973_v13 = vld [vmem:[#allocation137_spill] sm:$0xff]  ;;  %v12033_v60 = vld [vmem:[#allocation94_spill] sm:$0xff] }
 0x6d6   : > { %4516 = vperm.xlu1 %5830, %v11969_v16   ;;  %v4728_v47 = vsel %vm1733_vm6, %v4727_v2, %v4723_v57  ;;  %v4737_v15 = vrot.slane %v10055_v28, %v11873_v35  ;;  %v4801_v16 = vrot.slane %v10111_v63, %v11864_v23  ;;  %v3657_v0 = vrot.slane %v11973_v13, %v11852_v34  ;;  %v11974_v28 = vld [vmem:[#allocation61_spill] sm:$0xff] }
 0x6d7   : > { %4555 = vperm.xlu0 %5831, %v11971_v54   ;;  %v4633_v1 = vrot.slane %v9856_v21, %v11852_v34  ;;  %v4732_v25 = vrot.slane %v9914_v37, %v11868_v3  ;;  %v4797_v8 = vsel %vm1719_vm4, %v4796_v51, %v4792_v36  ;;  %v10277_v58 = vpop.permute.xlu1 %4378  ;;  %v3599_v2 = vsel %vm1740_vm7, %v3598_v9, %v3594_v44 }
 0x6d8   : > { %v3603_v57 = vrot.slane %v11974_v28, %v11873_v35  ;;  %v4638_v63 = vrot.slane %v9861_v18, %v11858_v30  ;;  %v4802_v54 = vsel %vm1726_vm5, %v4801_v16, %v4797_v8  ;;  %v4352_v29 = vpop.permute.xlu0 %4351  ;;  %v11975_v21 = vunpack.c.h.b16 %v10104_v32 }
 0x6d9   : > { %v4629_v37 = vrot.slane %v9849_v14, %v11854_v4  ;;  %v4643_v36 = vrot.slane %v9868_v26, %v11864_v23  ;;  %v4733_v9 = vsel %vm1740_vm7, %v4732_v25, %v4728_v47  ;;  %v4806_v44 = vrot.slane %v4352_v29, %v11866_v12 }
 0x6da   : > { %4606 = vperm.xlu1 %5830, %v11975_v21   ;;  %v11976_v51 = vunpack.c.l.b16 %v11845_v41  ;;  %v4648_v18 = vrot.slane %v9872_v11, %v11866_v12  ;;  %v4738_v16 = vsel %vm11977_vm2, %v4737_v15, %v4733_v9  ;;  %v4747_v8 = vrot.slane %v10088_v27, %v11883_v50  ;;  %v11978_v11 = vld [vmem:[#allocation111_spill] sm:$0xff] }
 0x6db   : > { %v4811_v14 = vrot.slane %v10142_v43, %v11868_v3  ;;  %v4634_v26 = vsel %vm1712_vm3, %v4633_v1, %v4629_v37  ;;  %v4653_v47 = vrot.slane %v9880_v20, %v11868_v3  ;;  %v4742_v41 = vrot.slane %v9930_v19, %v11877_v59  ;;  %v10308_v25 = vpop.permute.xlu1 %4384 }
 0x6dc   : > { %4423 = vperm.xlu0 %5831, %v11976_v51   ;;  %v4807_v29 = vsel %vm1733_vm6, %v4806_v44, %v4802_v54  ;;  %v3667_v15 = vrot.slane %v11978_v11, %v11864_v23  ;;  %v4639_v27 = vsel %vm1719_vm4, %v4638_v63, %v4634_v26  ;;  %v4658_v43 = vrot.slane %v9884_v6, %v11873_v35  ;;  %v4358_v28 = vpop.permute.xlu0 %4357  ;;  %v11983_v44 = vld [vmem:[#allocation87_spill] sm:$0xff]  ;;  %v11984_v51 = vld [vmem:[#allocation66_spill] sm:$0xff] }
 0x6dd   : > { %v4812_v1 = vsel %vm1740_vm7, %v4811_v14, %v4807_v29  ;;  %v11979_v20 = vunpack.c.h.b16 %v11857_v46  ;;  %v4644_v19 = vsel %vm1726_vm5, %v4643_v36, %v4639_v27  ;;  %v4663_v54 = vrot.slane %v9892_v40, %v11877_v59  ;;  %v11988_v27 = vld [vmem:[#allocation205_spill] sm:$0xff] }
 0x6de   : > { %v4743_v21 = vsel %vm11980_vm11, %v4742_v41, %v4738_v16  ;;  %v4816_v37 = vrot.slane %v4358_v28, %v11873_v35  ;;  %v11981_v63 = vunpack.c.l.b16 %v9945_v39  ;;  %v4649_v6 = vsel %vm1733_vm6, %v4648_v18, %v4644_v19  ;;  %v11986_v16 = vld [vmem:[#allocation119_spill] sm:$0xff]  ;;  %v11987_v18 = vld [vmem:[#allocation145_spill] sm:$0xff]  ;;  %vm11989_vm11 = vmmov %vm11977_vm2 }
 0x6df   : > { %4474 = vperm.xlu1 %5830, %v11979_v20   ;;  %vm11982_vm8 = vcmask 589312   ;;  %v4757_v14 = vrot.slane %v11984_v51, %v11983_v44  ;;  %v4821_v36 = vrot.slane %v10178_v55, %v11877_v59  ;;  %v3604_v26 = vsel %vm11985_vm9, %v3603_v57, %v3599_v2  ;;  %v10336_v29 = vpop.permute.xlu1 %4390  ;;  %v11991_v57 = vld [vmem:[#allocation95_spill] sm:$0xff] }
 0x6e0   : > { %4513 = vperm.xlu0 %5831, %v11981_v63   ;;  %v4748_v9 = vsel %vm11982_vm8, %v4747_v8, %v4743_v21  ;;  %v4654_v40 = vsel %vm1740_vm7, %v4653_v47, %v4649_v6  ;;  %v4752_v41 = vrot.slane %v11986_v16, %v11903_v38  ;;  %v4817_v39 = vsel %vm11977_vm2, %v4816_v37, %v4812_v1  ;;  %v4364_v2 = vpop.permute.xlu0 %4363  ;;  %v11994_v1 = vld [vmem:[#allocation208_spill] sm:$0xff] }
 0x6e1   : > { %v3613_v8 = vrot.slane %v11987_v18, %v11883_v50  ;;  %v4668_v28 = vrot.slane %v11988_v27, %v11883_v50  ;;  %v4659_v20 = vsel %vm11989_vm11, %v4658_v43, %v4654_v40  ;;  %vm11990_vm8 = vcmask 523712   ;;  %v11997_v43 = vld [vmem:[#allocation209_spill] sm:$0xff]  ;;  %v11999_v40 = vld [vmem:[#allocation130_spill] sm:$0xff] }
 0x6e2   : > { %v4822_v55 = vsel %vm11990_vm8, %v4821_v36, %v4817_v39  ;;  %v11992_v47 = vunpack.c.h.b16 %v11991_v57  ;;  %vm11993_vm9 = vmmov %vm11990_vm8  ;;  %v4673_v21 = vrot.slane %v11994_v1, %v11903_v38  ;;  %vm11995_vm2 = vcmask 654912   ;;  %v12001_v39 = vld [vmem:[#allocation91_spill] sm:$0xff] }
 0x6e3   : > { %v4664_v19 = vsel %vm11993_vm9, %v4663_v54, %v4659_v20  ;;  %v4753_v37 = vsel %vm11995_vm2, %v4752_v41, %v4748_v9  ;;  %v4826_v63 = vrot.slane %v4364_v2, %v11883_v50  ;;  %v11996_v6 = vunpack.c.l.b16 %v10104_v32  ;;  %v12000_v41 = vld [vmem:[#allocation210_spill] sm:$0xff] }
 0x6e4   : > { %4564 = vperm.xlu1 %5830, %v11992_v47   ;;  %v4678_v51 = vrot.slane %v11997_v43, %v11983_v44  ;;  %vm11998_vm11 = vcmask 720512   ;;  %v4767_v16 = vrot.slane %v11999_v40, %v11917_v62  ;;  %v4831_v54 = vrot.slane %v10212_v17, %v11903_v38  ;;  %v12005_v17 = vld [vmem:[#allocation211_spill] sm:$0xff]  ;;  %v12013_v40 = vld [vmem:[#allocation76_spill] sm:$0xff] }
 0x6e5   : > { %4603 = vperm.xlu0 %5831, %v11996_v6   ;;  %v4758_v36 = vsel %vm11998_vm11, %v4757_v14, %v4753_v37  ;;  %v3609_v9 = vsel %vm11990_vm8, %v3608_v52, %v3604_v26  ;;  %v4683_v32 = vrot.slane %v12000_v41, %v11923_v53  ;;  %v4762_v18 = vrot.slane %v12001_v39, %v11923_v53  ;;  %v10369_v14 = vpop.permute.xlu1 %4396  ;;  %v4370_v52 = vpop.permute.xlu0 %4369  ;;  %v12007_v26 = vld [vmem:[#allocation124_spill] sm:$0xff]  ;;  %v12009_v37 = vld [vmem:[#allocation99_spill] sm:$0xff]  ;;  %vm12010_vm8 = vmmov %vm12006_vm10 }
 0x6e6   : > { %vm12002_vm9 = vcmask 589312   ;;  %v4688_v47 = vrot.slane %v12005_v17, %v11917_v62  ;;  %v12008_v1 = vunpack.c.h.b16 %v12007_v26  ;;  %v3623_v6 = vrot.slane %v12009_v37, %v11983_v44  ;;  %v12014_v41 = vld [vmem:[#allocation147_spill] sm:$0xff]  ;;  %v12015_v39 = vld [vmem:[#allocation53_spill] sm:$0xff]  ;;  %v12018_v17 = vld [vmem:[#allocation126_spill] sm:$0xff] }
 0x6e7   : > { %v4827_v27 = vsel %vm12002_vm9, %v4826_v63, %v4822_v55  ;;  %vm12003_vm2 = vmmov %vm12002_vm9  ;;  %v4763_v63 = vsel %vm1782_vm13, %v4762_v18, %v4758_v36  ;;  %vm12012_vm9 = vcmask 720512   ;;  %v4772_v18 = vrot.slane %v12015_v39, %v11937_v7  ;;  %v12019_v37 = vld [vmem:[#allocation48_spill] sm:$0xff] }
 0x6e8   : > { %v3614_v20 = vsel %vm12003_vm2, %v3613_v8, %v3609_v9  ;;  %vm12004_vm11 = vmmov %vm12003_vm2  ;;  %v4832_v56 = vsel %vm12006_vm10, %v4831_v54, %v4827_v27  ;;  %4432 = vperm.xlu1 %5830, %v12008_v1   ;;  %v4836_v8 = vrot.slane %v4370_v52, %v11983_v44  ;;  %v4768_v43 = vsel %vm1789_vm14, %v4767_v16, %v4763_v63 }
 0x6e9   : > { %v4669_v2 = vsel %vm12004_vm11, %v4668_v28, %v4664_v19  ;;  %v12011_v28 = vunpack.c.l.b16 %v11857_v46  ;;  %v4777_v54 = vrot.slane %v12013_v40, %v11944_v31  ;;  %v4841_v9 = vrot.slane %v10244_v10, %v11923_v53  ;;  %vm12016_vm10 = vmmov %vm12012_vm9  ;;  %v10397_v27 = vpop.permute.xlu1 %4402  ;;  %v4376_v1 = vpop.permute.xlu0 %4375  ;;  %v12025_v40 = vld [vmem:[#allocation31_spill] sm:$0xff] }
 0x6ea   : > { %v4674_v55 = vsel %vm12010_vm8, %v4673_v21, %v4669_v2  ;;  %v3653_v21 = vrot.slane %v12014_v41, %v11854_v4  ;;  %v4837_v46 = vsel %vm12016_vm10, %v4836_v8, %v4832_v56  ;;  %v4698_v10 = vrot.slane %v12018_v17, %v11944_v31  ;;  %vm12021_vm2 = vmmov %vm12010_vm8 }
 0x6eb   : > { %4471 = vperm.xlu0 %5831, %v12011_v28   ;;  %v4679_v19 = vsel %vm12012_vm9, %v4678_v51, %v4674_v55  ;;  %v12017_v51 = vld [vmem:[#allocation149_spill] sm:$0xff]  ;;  %v4842_v52 = vsel %vm1782_vm13, %v4841_v9, %v4837_v46  ;;  %v3619_v56 = vsel %vm12021_vm2, %v3618_v45, %v3614_v20  ;;  %v12022_v55 = vld [vmem:[#allocation206_spill] sm:$0xff]  ;;  %v4773_v8 = vsel %vm1796_vm15, %v4772_v18, %v4768_v43  ;;  %vm12024_vm11 = vmmov %vm12012_vm9 }
 0x6ec   : > { %v4684_v36 = vsel %vm1782_vm13, %v4683_v32, %v4679_v19  ;;  %v3662_v16 = vrot.slane %v12017_v51, %v11858_v30  ;;  %v12020_v32 = vunpack.c.h.b16 %v12019_v37  ;;  %v4693_v63 = vrot.slane %v12022_v55, %v11937_v7 }
 0x6ed   : > { %v4689_v2 = vsel %vm1789_vm14, %v4688_v47, %v4684_v36  ;;  %v4846_v47 = vrot.slane %v4376_v1, %v11917_v62  ;;  %v12023_v28 = vunpack.c.l.b16 %v11991_v57  ;;  %v3624_v19 = vsel %vm12024_vm11, %v3623_v6, %v3619_v56  ;;  %v12026_v57 = vld [vmem:[#allocation38_spill] sm:$0xff]  ;;  %v10431_v36 = vpop.permute.xlu1 %4408  ;;  %v4382_v46 = vpop.permute.xlu0 %4381 }
 0x6ee   : > { %4522 = vperm.xlu1 %5830, %v12020_v32   ;;  %v3633_v9 = vrot.slane %v12025_v40, %v11917_v62  ;;  %v4778_v41 = vsel %vm1803_vm0, %v4777_v54, %v4773_v8  ;;  %v4851_v24 = vrot.slane %v10277_v58, %v11937_v7  ;;  %v3658_v45 = vsel %vm1712_vm3, %v3657_v0, %v3653_v21  ;;  %v12027_v54 = vld [vmem:[#allocation151_spill] sm:$0xff]  ;;  %v12028_v0 = vld [vmem:[#allocation77_spill] sm:$0xff] }
 0x6ef   : > { %4561 = vperm.xlu0 %5831, %v12023_v28   ;;  %v4694_v20 = vsel %vm1796_vm15, %v4693_v63, %v4689_v2  ;;  %v4782_v43 = vrot.slane %v12026_v57, %v11958_v49  ;;  %v4847_v6 = vsel %vm1789_vm14, %v4846_v47, %v4842_v52  ;;  %v3663_v39 = vsel %vm1719_vm4, %v3662_v16, %v3658_v45  ;;  %v12030_v2 = vld [vmem:[#allocation207_spill] sm:$0xff]  ;;  %v12034_v63 = vld [vmem:[#allocation144_spill] sm:$0xff] }
 0x6f0   : > { %v3672_v18 = vrot.slane %v12027_v54, %v11866_v12  ;;  %v4699_v58 = vsel %vm1803_vm0, %v4698_v10, %v4694_v20  ;;  %v4852_v13 = vsel %vm1796_vm15, %v4851_v24, %v4847_v6  ;;  %v12029_v21 = vunpack.c.h.b16 %v12028_v0  ;;  %v12037_v24 = vld [vmem:[#allocation105_spill] sm:$0xff] }
 0x6f1   : > { %v3629_v51 = vsel %vm1782_vm13, %v3628_v48, %v3624_v19  ;;  %v4703_v17 = vrot.slane %v12030_v2, %v11958_v49  ;;  %v4783_v16 = vsel %vm1810_vm1, %v4782_v43, %v4778_v41  ;;  %v4856_v52 = vrot.slane %v4382_v46, %v11944_v31  ;;  %v10468_v47 = vpop.permute.xlu1 %4435  ;;  %v12035_v19 = vld [vmem:[#allocation153_spill] sm:$0xff]  ;;  %v4388_v41 = vpop.permute.xlu0 %4387 }
 0x6f2   : > { %4612 = vperm.xlu1 %5830, %v12029_v21   ;;  %v12031_v10 = vunpack.c.l.b16 %v12007_v26  ;;  %v12032_v1 = vrot.slane %v11970_v61, %v11944_v31  ;;  %v3638_v56 = vrot.slane %v12033_v60, %v11937_v7  ;;  %v3634_v48 = vsel %vm1789_vm14, %v3633_v9, %v3629_v51 }
 0x6f3   : > { %v4861_v55 = vrot.slane %v10308_v25, %v11958_v49  ;;  %v3643_v8 = vrot.slane %v12034_v63, %v11944_v31  ;;  %v3668_v26 = vsel %vm1726_vm5, %v3667_v15, %v3663_v39  ;;  %v4704_v61 = vsel %vm1810_vm1, %v4703_v17, %v4699_v58  ;;  %v12039_v15 = vld [vmem:[#allocation85_spill] sm:$0xff] }
 0x6f4   : > { %4429 = vperm.xlu0 %5831, %v12031_v10   ;;  %v3565_v32 = vsel %vm1803_vm0, %v12032_v1, %v10251_v42  ;;  %v4857_v42 = vsel %vm1803_vm0, %v4856_v52, %v4852_v13  ;;  %v3673_v28 = vsel %vm1733_vm6, %v3672_v18, %v3668_v26  ;;  %v3682_v40 = vrot.slane %v12035_v19, %v11873_v35  ;;  %v12042_v18 = vld [vmem:[#allocation140_spill] sm:$0xff]  ;;  %v12043_v13 = vld [vmem:[#allocation73_spill] sm:$0xff]  ;;  %v12047_v10 = vld [vmem:[#allocation155_spill] sm:$0xff] }
 0x6f5   : > { %vm12036_vm8 = vcmask 1041409   ;;  %v4862_v9 = vsel %vm1810_vm1, %v4861_v55, %v4857_v42  ;;  %v12038_v11 = vunpack.c.l.b16 %v12037_v24  ;;  %v3677_v45 = vrot.slane %v12039_v15, %v11868_v3  ;;  %v12050_v55 = vld [vmem:[#allocation45_spill] sm:$0xff]  ;;  %v12053_v42 = vld [vmem:[#allocation90_spill] sm:$0xff]  ;;  %v12054_v19 = vld [vmem:[#allocation143_spill] sm:$0xff] }
 0x6f6   : > { %v5258_v25 = vsel %vm12036_vm8, %v4783_v16, %v4704_v61  ;;  %v4870_v20 = vrot.slane %v10336_v29, %v11852_v34  ;;  %v4866_v43 = vrot.slane %v4388_v41, %v11854_v4  ;;  %v12040_v6 = vunpack.c.l.b16 %v12019_v37  ;;  %v12044_v29 = vld [vmem:[#allocation131_spill] sm:$0xff]  ;;  %vm12045_vm9 = vmmov %vm12036_vm8  ;;  %v12056_v15 = vld [vmem:[#allocation152_spill] sm:$0xff] }
 0x6f7   : > { %4525 = vperm.xlu1 %5830, %v12038_v11   ;;  %v10482_v57 = vsel %vm2367_vm12, %v4862_v9, %v5258_v25  ;;  %v12041_v39 = vrot.slane %v11959_v22, %v11958_v49  ;;  %v3569_v58 = vrot.slane %v12042_v18, %v11958_v49  ;;  %v4239_v46 = vunpack.c.h.b16 %v12043_v13  ;;  %v10503_v22 = vpop.permute.xlu1 %4441  ;;  %v12055_v25 = vld [vmem:[#allocation165_spill] sm:$0xff] }
 0x6f8   : > { %4519 = vperm.xlu0 %5831, %v12040_v6   ;;  %v4240_v21 = vunpack.c.l.b16 %v12044_v29  ;;  %v3639_v37 = vsel %vm1796_vm15, %v3638_v56, %v3634_v48  ;;  %v3678_v2 = vsel %vm1740_vm7, %v3677_v45, %v3673_v28  ;;  %v4871_v17 = vsel %vm1712_vm3, %v4870_v20, %v4866_v43  ;;  %v12049_v56 = vld [vmem:[#allocation32_spill] sm:$0xff] }
 0x6f9   : > { %v3412_v54 = vsel %vm1810_vm1, %v12041_v39, %v10202_v33  ;;  %v10506_v33 = vsel %vm1810_vm1, %v3569_v58, %v3565_v32  ;;  %v3644_v16 = vsel %vm1803_vm0, %v3643_v8, %v3639_v37  ;;  %vm12046_vm10 = vcmask 458112   ;;  %v12051_v32 = vld [vmem:[#allocation163_spill] sm:$0xff]  ;;  %v12058_v6 = vld [vmem:[#allocation148_spill] sm:$0xff] }
 0x6fa   : > { %v10498_v51 = vsel %vm12045_vm9, %v10237_v5, %v3412_v54  ;;  %v3683_v52 = vsel %vm12046_vm10, %v3682_v40, %v3678_v2  ;;  %v3692_v1 = vrot.slane %v12047_v10, %v11883_v50  ;;  %v4394_v5 = vpop.permute.xlu0 %4393  ;;  %v12048_v60 = vunpack.c.l.b16 %v12043_v13  ;;  %v12059_v54 = vld [vmem:[#allocation154_spill] sm:$0xff] }
 0x6fb   : > { %v3648_v48 = vrot.slane %v12049_v56, %v11958_v49  ;;  %v3687_v63 = vrot.slane %v12050_v55, %v11877_v59  ;;  %v3732_v26 = vrot.slane %v12051_v32, %v11854_v4  ;;  %v4875_v8 = vrot.slane %v4394_v5, %v11858_v30  ;;  %v10538_v43 = vpop.permute.xlu1 %4486  ;;  %v12061_v2 = vld [vmem:[#allocation62_spill] sm:$0xff] }
 0x6fc   : > { %4615 = vperm.xlu1 %5830, %v12048_v60   ;;  %v12052_v61 = vunpack.c.l.b16 %v12028_v0  ;;  %v3697_v28 = vrot.slane %v12053_v42, %v11903_v38  ;;  %v3707_v40 = vrot.slane %v12054_v19, %v11923_v53  ;;  %v3741_v9 = vrot.slane %v12055_v25, %v11858_v30 }
 0x6fd   : > { %v4880_v41 = vrot.slane %v10369_v14, %v11864_v23  ;;  %v10532_v11 = vsel %vm1810_vm1, %v3648_v48, %v3644_v16  ;;  %v3736_v45 = vrot.slane %v12056_v15, %v11852_v34  ;;  %vm12057_vm2 = vcmask 523712   ;;  %v12065_v48 = vld [vmem:[#allocation27_spill] sm:$0xff] }
 0x6fe   : > { %4609 = vperm.xlu0 %5831, %v12052_v61   ;;  %v3688_v0 = vsel %vm12057_vm2, %v3687_v63, %v3683_v52  ;;  %v4876_v20 = vsel %vm1719_vm4, %v4875_v8, %v4871_v17  ;;  %v3717_v39 = vrot.slane %v12058_v6, %v11937_v7  ;;  %v3746_v18 = vrot.slane %v12059_v54, %v11864_v23  ;;  %v4400_v37 = vpop.permute.xlu0 %4399  ;;  %v12063_v52 = vld [vmem:[#allocation156_spill] sm:$0xff]  ;;  %v12064_v17 = vld [vmem:[#allocation157_spill] sm:$0xff]  ;;  %v12067_v63 = vld [vmem:[#allocation167_spill] sm:$0xff] }
 0x6ff   : > { %vm12060_vm11 = vcmask 589312   ;;  %v4881_v58 = vsel %vm1726_vm5, %v4880_v41, %v4876_v20  ;;  %v12062_v16 = vunpack.c.l.b16 %v12061_v2  ;;  %v3756_v10 = vrot.slane %v12063_v52, %v11868_v3  ;;  %v12068_v8 = vld [vmem:[#allocation179_spill] sm:$0xff]  ;;  %v12073_v54 = vld [vmem:[#allocation168_spill] sm:$0xff] }
 0x700   : > { %v3693_v14 = vsel %vm12060_vm11, %v3692_v1, %v3688_v0  ;;  %v3702_v5 = vrot.slane %v12064_v17, %v11983_v44  ;;  %v3737_v60 = vsel %vm1712_vm3, %v3736_v45, %v3732_v26  ;;  %v4885_v56 = vrot.slane %v4400_v37, %v11866_v12  ;;  %v12070_v26 = vld [vmem:[#allocation181_spill] sm:$0xff]  ;;  %v12071_v41 = vld [vmem:[#allocation195_spill] sm:$0xff]  ;;  %v12072_v0 = vld [vmem:[#allocation158_spill] sm:$0xff] }
 0x701   : > { %4573 = vperm.xlu1 %5830, %v12062_v16   ;;  %v12066_v55 = vunpack.c.l.b16 %v12065_v48  ;;  %v3742_v1 = vsel %vm1719_vm4, %v3741_v9, %v3737_v60  ;;  %v3751_v32 = vrot.slane %v12067_v63, %v11866_v12  ;;  %v3811_v61 = vrot.slane %v12068_v8, %v11854_v4  ;;  %v10569_v9 = vpop.permute.xlu1 %4489  ;;  %v12077_v60 = vld [vmem:[#allocation184_spill] sm:$0xff]  ;;  %v12078_v63 = vld [vmem:[#allocation57_spill] sm:$0xff]  ;;  %vm12087_vm11 = vmmov %vm12046_vm10 }
 0x702   : > { %v4890_v42 = vrot.slane %v10397_v27, %v11868_v3  ;;  %vm12069_vm8 = vcmask 654912   ;;  %v3820_v25 = vrot.slane %v12070_v26, %v11858_v30  ;;  %v3890_v15 = vrot.slane %v12071_v41, %v11854_v4  ;;  %v12074_v27 = vld [vmem:[#allocation197_spill] sm:$0xff] }
 0x703   : > { %4477 = vperm.xlu0 %5831, %v12066_v55   ;;  %v3698_v19 = vsel %vm12069_vm8, %v3697_v28, %v3693_v14  ;;  %v4886_v45 = vsel %vm1733_vm6, %v4885_v56, %v4881_v58  ;;  %v3766_v20 = vrot.slane %v12072_v0, %v11877_v59  ;;  %v3815_v37 = vrot.slane %v12073_v54, %v11852_v34  ;;  %v4406_v14 = vpop.permute.xlu0 %4405 }
 0x704   : > { %v3899_v16 = vrot.slane %v12074_v27, %v11858_v30  ;;  %v4891_v28 = vsel %vm1740_vm7, %v4890_v42, %v4886_v45  ;;  %v12075_v52 = vunpack.c.h.b16 %v12061_v2  ;;  %vm12076_vm9 = vcmask 720512   ;;  %v12080_v42 = vld [vmem:[#allocation169_spill] sm:$0xff] }
 0x705   : > { %v3703_v17 = vsel %vm12076_vm9, %v3702_v5, %v3698_v19  ;;  %v3747_v58 = vsel %vm1726_vm5, %v3746_v18, %v3742_v1  ;;  %v3894_v56 = vrot.slane %v12077_v60, %v11852_v34  ;;  %v4895_v55 = vrot.slane %v4406_v14, %v11873_v35  ;;  %v12081_v1 = vld [vmem:[#allocation183_spill] sm:$0xff]  ;;  %v10598_v54 = vpop.permute.xlu1 %4534  ;;  %vm12094_vm9 = vmmov %vm12057_vm2 }
 0x706   : > { %4576 = vperm.xlu1 %5830, %v12075_v52   ;;  %v12079_v8 = vunpack.c.l.b16 %v12078_v63  ;;  %v3752_v26 = vsel %vm1733_vm6, %v3751_v32, %v3747_v58  ;;  %v3761_v41 = vrot.slane %v12080_v42, %v11873_v35  ;;  %v3816_v2 = vsel %vm1712_vm3, %v3815_v37, %v3811_v61  ;;  %v12082_v32 = vld [vmem:[#allocation170_spill] sm:$0xff]  ;;  %v12083_v61 = vld [vmem:[#allocation199_spill] sm:$0xff] }
 0x707   : > { %v4900_v5 = vrot.slane %v10431_v36, %v11877_v59  ;;  %v3821_v18 = vsel %vm1719_vm4, %v3820_v25, %v3816_v2  ;;  %v3830_v19 = vrot.slane %v12081_v1, %v11866_v12  ;;  %v3895_v45 = vsel %vm1712_vm3, %v3894_v56, %v3890_v15  ;;  %v4412_v25 = vpop.permute.xlu0 %4411  ;;  %v12084_v15 = vld [vmem:[#allocation186_spill] sm:$0xff]  ;;  %v12088_v42 = vld [vmem:[#allocation171_spill] sm:$0xff] }
 0x708   : > { %4567 = vperm.xlu0 %5831, %v12079_v8   ;;  %v4896_v0 = vsel %vm12046_vm10, %v4895_v55, %v4891_v28  ;;  %v3825_v27 = vrot.slane %v12082_v32, %v11864_v23  ;;  %v3900_v14 = vsel %vm1719_vm4, %v3899_v16, %v3895_v45  ;;  %v3909_v37 = vrot.slane %v12083_v61, %v11866_v12  ;;  %v12086_v16 = vld [vmem:[#allocation159_spill] sm:$0xff]  ;;  %v12091_v45 = vld [vmem:[#allocation160_spill] sm:$0xff] }
 0x709   : > { %v4901_v36 = vsel %vm12057_vm2, %v4900_v5, %v4896_v0  ;;  %v3708_v52 = vsel %vm1782_vm13, %v3707_v40, %v3703_v17  ;;  %v3757_v58 = vsel %vm1740_vm7, %v3756_v10, %v3752_v26  ;;  %v3904_v28 = vrot.slane %v12084_v15, %v11864_v23  ;;  %v12089_v17 = vld [vmem:[#allocation185_spill] sm:$0xff]  ;;  %v4493_v1 = vpop.permute.xlu1 %4492  ;;  %vm12098_vm2 = vmmov %vm12087_vm11 }
 0x70a   : > { %v4905_v60 = vrot.slane %v4412_v25, %v11883_v50  ;;  %v12085_v56 = vunpack.c.h.b16 %v12065_v48  ;;  %v3712_v55 = vrot.slane %v12086_v16, %v11917_v62  ;;  %v3762_v8 = vsel %vm12087_vm11, %v3761_v41, %v3757_v58  ;;  %v12092_v41 = vld [vmem:[#allocation172_spill] sm:$0xff]  ;;  %vm12101_vm11 = vmmov %vm12098_vm2 }
 0x70b   : > { %v3771_v2 = vrot.slane %v12088_v42, %v11883_v50  ;;  %v3826_v40 = vsel %vm1726_vm5, %v3825_v27, %v3821_v18  ;;  %v3840_v26 = vrot.slane %v12089_v17, %v11873_v35  ;;  %v3905_v5 = vsel %vm1726_vm5, %v3904_v28, %v3900_v14  ;;  %v12093_v18 = vld [vmem:[#allocation200_spill] sm:$0xff]  ;;  %v4439_v27 = vpop.permute.xlu0 %4438 }
 0x70c   : > { %4480 = vperm.xlu0 %5831, %v12085_v56   ;;  %v3831_v10 = vsel %vm1733_vm6, %v3830_v19, %v3826_v40  ;;  %vm12090_vm8 = vcmask 589312   ;;  %v3776_v0 = vrot.slane %v12091_v45, %v11903_v38  ;;  %v3835_v32 = vrot.slane %v12092_v41, %v11868_v3  ;;  %v12095_v14 = vld [vmem:[#allocation188_spill] sm:$0xff]  ;;  %v12103_v45 = vld [vmem:[#allocation190_spill] sm:$0xff] }
 0x70d   : > { %v10624_v48 = vsel %vm12090_vm8, %v4905_v60, %v4901_v36  ;;  %v3910_v61 = vsel %vm1733_vm6, %v3909_v37, %v3905_v5  ;;  %v3919_v19 = vrot.slane %v12093_v18, %v11873_v35  ;;  %v3767_v25 = vsel %vm12094_vm9, %v3766_v20, %v3762_v8  ;;  %vm12097_vm10 = vmmov %vm12090_vm8  ;;  %v12099_v8 = vld [vmem:[#allocation187_spill] sm:$0xff] }
 0x70e   : > { %v3914_v58 = vrot.slane %v12095_v14, %v11868_v3  ;;  %v4945_v36 = vrot.slane %v10468_v47, %v11854_v4  ;;  %v4949_v15 = vrot.slane %v4439_v27, %v11852_v34  ;;  %v12096_v28 = vunpack.c.h.b16 %v12078_v63  ;;  %v10651_v63 = vpop.permute.xlu1 %4579  ;;  %v12106_v27 = vld [vmem:[#allocation173_spill] sm:$0xff] }
 0x70f   : > { %v3713_v60 = vsel %vm1789_vm14, %v3712_v55, %v3708_v52  ;;  %v3772_v37 = vsel %vm12097_vm10, %v3771_v2, %v3767_v25  ;;  %v3836_v56 = vsel %vm1740_vm7, %v3835_v32, %v3831_v10  ;;  %v4954_v20 = vrot.slane %v10503_v22, %v11858_v30  ;;  %v12100_v52 = vld [vmem:[#allocation174_spill] sm:$0xff]  ;;  %v12102_v10 = vld [vmem:[#allocation201_spill] sm:$0xff]  ;;  %v4484_v22 = vpop.permute.xlu0 %4483 }
 0x710   : > { %4570 = vperm.xlu0 %5831, %v12096_v28   ;;  %v3841_v16 = vsel %vm12098_vm2, %v3840_v26, %v3836_v56  ;;  %v3850_v42 = vrot.slane %v12099_v8, %v11883_v50  ;;  %v3915_v47 = vsel %vm1740_vm7, %v3914_v58, %v3910_v61  ;;  %v4950_v40 = vsel %vm1712_vm3, %v4949_v15, %v4945_v36  ;;  %vm12107_vm2 = vmmov %vm12094_vm9 }
 0x711   : > { %v3845_v55 = vrot.slane %v12100_v52, %v11877_v59  ;;  %v3920_v2 = vsel %vm12101_vm11, %v3919_v19, %v3915_v47  ;;  %v3929_v17 = vrot.slane %v12102_v10, %v11883_v50  ;;  %v4955_v26 = vsel %vm1719_vm4, %v4954_v20, %v4950_v40  ;;  %vm12109_vm11 = vmmov %vm12097_vm10  ;;  %v12111_v20 = vld [vmem:[#allocation176_spill] sm:$0xff]  ;;  %v12113_v40 = vld [vmem:[#allocation161_spill] sm:$0xff] }
 0x712   : > { %v3718_v5 = vsel %vm1796_vm15, %v3717_v39, %v3713_v60  ;;  %v3924_v41 = vrot.slane %v12103_v45, %v11877_v59  ;;  %v5028_v32 = vrot.slane %v10538_v43, %v11852_v34  ;;  %v5024_v61 = vrot.slane %v4484_v22, %v11854_v4  ;;  %v12110_v60 = vld [vmem:[#allocation202_spill] sm:$0xff] }
 0x713   : > { %v12104_v18 = vunpack.c.h.b16 %v12037_v24  ;;  %vm12105_vm8 = vcmask 654912   ;;  %v3781_v25 = vrot.slane %v12106_v27, %v11983_v44  ;;  %v3846_v6 = vsel %vm12094_vm9, %v3845_v55, %v3841_v16  ;;  %v10680_v24 = vpop.permute.xlu1 %4450  ;;  %v4445_v56 = vpop.permute.xlu0 %4444  ;;  %v12114_v55 = vld [vmem:[#allocation162_spill] sm:$0xff]  ;;  %v12121_v27 = vld [vmem:[#allocation191_spill] sm:$0xff] }
 0x714   : > { %v3777_v19 = vsel %vm12105_vm8, %v3776_v0, %v3772_v37  ;;  %v5033_v39 = vrot.slane %v10569_v9, %v11858_v30  ;;  %v3851_v14 = vsel %vm12097_vm10, %v3850_v42, %v3846_v6  ;;  %v3925_v58 = vsel %vm12107_vm2, %v3924_v41, %v3920_v2  ;;  %v12108_v0 = vld [vmem:[#allocation189_spill] sm:$0xff] }
 0x715   : > { %4528 = vperm.xlu0 %5831, %v12104_v18   ;;  %v5038_v43 = vrot.slane %v4493_v1, %v11864_v23  ;;  %v5029_v36 = vsel %vm1712_vm3, %v5028_v32, %v5024_v61  ;;  %v3860_v15 = vrot.slane %v12108_v0, %v11983_v44  ;;  %v3930_v28 = vsel %vm12109_vm11, %v3929_v17, %v3925_v58  ;;  %v12112_v1 = vld [vmem:[#allocation192_spill] sm:$0xff]  ;;  %v12116_v17 = vld [vmem:[#allocation175_spill] sm:$0xff]  ;;  %v12119_v32 = vld [vmem:[#allocation178_spill] sm:$0xff] }
 0x716   : > { %v3939_v37 = vrot.slane %v12110_v60, %v11983_v44  ;;  %v5034_v9 = vsel %vm1719_vm4, %v5033_v39, %v5029_v36  ;;  %v3855_v16 = vrot.slane %v12111_v20, %v11903_v38  ;;  %v3934_v8 = vrot.slane %v12112_v1, %v11903_v38  ;;  %v6364_v36 = vld [vmem:[%s6911_s22 + $0x38] sm:$0xff]   ;;  %v12124_v0 = vld [vmem:[#allocation150_spill] sm:$0xff] }
 0x717   : > { %v4959_v42 = vrot.slane %v4445_v56, %v11864_v23  ;;  %v10696_v47 = vsel %vm1726_vm5, %v5038_v43, %v5034_v9  ;;  %v3722_v52 = vrot.slane %v12113_v40, %v11944_v31  ;;  %v3786_v2 = vrot.slane %v12114_v55, %v11923_v53  ;;  %v10708_v41 = vpop.permute.xlu1 %4540  ;;  %v4532_v6 = vpop.permute.xlu0 %4531  ;;  %v12126_v56 = vld [vmem:[#allocation177_spill] sm:$0xff] }
 0x718   : > { %vm12115_vm8 = vcmask 720512   ;;  %v3791_v22 = vrot.slane %v12116_v17, %v11917_v62  ;;  %vm12117_vm9 = vcmask 654912   ;;  %v3865_v61 = vrot.slane %v12119_v32, %v11923_v53  ;;  %v12128_v40 = vld [vmem:[#allocation193_spill] sm:$0xff] }
 0x719   : > { %4618 = vperm.xlu0 %5831, %v4239_v46   ;;  %v3782_v10 = vsel %vm12115_vm8, %v3781_v25, %v3777_v19  ;;  %v3856_v45 = vsel %vm12117_vm9, %v3855_v16, %v3851_v14  ;;  %vm12118_vm10 = vmmov %vm12117_vm9  ;;  %v4960_v46 = vsel %vm1726_vm5, %v4959_v42, %v4955_v26  ;;  %v3870_v19 = vrot.slane %v12121_v27, %v11917_v62  ;;  %v12123_v14 = vld [vmem:[#allocation203_spill] sm:$0xff] }
 0x71a   : > { %v3935_v13 = vsel %vm12118_vm10, %v3934_v8, %v3930_v28  ;;  %vm12120_vm2 = vmmov %vm12115_vm8  ;;  %v6662_v39 = vmov 0.0   ;;  %v3949_v58 = vrot.slane %v12123_v14, %v11917_v62  ;;  %v5107_v26 = vrot.slane %v10598_v54, %v11852_v34 }
 0x71b   : > { %v3861_v18 = vsel %vm12120_vm2, %v3860_v15, %v3856_v45  ;;  %vm12122_vm11 = vmmov %vm12120_vm2  ;;  %5663 = vmatprep.subr.bf16.mxu1 %v6662_v39  ;;  %v5103_v43 = vrot.slane %v4532_v6, %v11854_v4  ;;  %v3727_v15 = vrot.slane %v12124_v0, %v11958_v49  ;;  %v3723_v28 = vsel %vm1803_vm0, %v3722_v52, %v3718_v5  ;;  %v4454_v1 = vpop.permute.xlu1 %4453  ;;  %v12127_v5 = vld [vmem:[#allocation164_spill] sm:$0xff]  ;;  %v12132_v0 = vld [vmem:[#allocation166_spill] sm:$0xff] }
 0x71c   : > { %v3940_v25 = vsel %vm12122_vm11, %v3939_v37, %v3935_v13  ;;  %5664 = vmatpush3.bf16.msra.mxu1 %v6364_v36  ;;  %v3787_v60 = vsel %vm1782_vm13, %v3786_v2, %v3782_v10  ;;  %v12125_v37 = vld [vmem:[#allocation194_spill] sm:$0xff]  ;;  %v3866_v20 = vsel %vm1782_vm13, %v3865_v61, %v3861_v18  ;;  %v3796_v8 = vrot.slane %v12127_v5, %v11937_v7  ;;  %v4448_v2 = vpop.permute.xlu0 %4447  ;;  %v12129_v10 = vld [vmem:[#allocation180_spill] sm:$0xff] }
 0x71d   : > { %4621 = vperm.xlu0 %5831, %v4240_v21   ;;  %v3944_v9 = vrot.slane %v12125_v37, %v11923_v53  ;;  %5665 = vmatprep.subr.bf16.mxu1 %v6662_v39  ;;  %v3792_v54 = vsel %vm1789_vm14, %v3791_v22, %v3787_v60  ;;  %v3801_v21 = vrot.slane %v12126_v56, %v11944_v31  ;;  %v12130_v45 = vld [vmem:[#allocation204_spill] sm:$0xff]  ;;  %v6365_v61 = vld [vmem:[%s6911_s22 + $0x30] sm:$0xff]   ;;  %vm12134_vm8 = vcmask 458112  }
 0x71e   : > { %v5108_v16 = vsel %vm1712_vm3, %v5107_v26, %v5103_v43  ;;  %v3871_v42 = vsel %vm1789_vm14, %v3870_v19, %v3866_v20  ;;  %v3880_v52 = vrot.slane %v12128_v40, %v11944_v31  ;;  %v3875_v17 = vrot.slane %v12129_v10, %v11937_v7  ;;  %v12131_v19 = vld [vmem:[#allocation196_spill] sm:$0xff]  ;;  %v6366_v20 = vld [vmem:[%s6911_s22 + $0x28] sm:$0xff]   ;;  %v12135_v5 = vld [vmem:[#allocation198_spill] sm:$0xff] }
 0x71f   : > { %v3945_v55 = vsel %vm1782_vm13, %v3944_v9, %v3940_v25  ;;  %v3959_v13 = vrot.slane %v12130_v45, %v11944_v31  ;;  %v4964_v32 = vrot.slane %v4448_v2, %v11866_v12  ;;  %v3728_v18 = vsel %vm1810_vm1, %v3727_v15, %v3723_v28  ;;  %v4544_v36 = vpop.permute.xlu1 %4543  ;;  %v12133_v9 = vld [vmem:[#allocation182_spill] sm:$0xff] }
 0x720   : > { %v3950_v22 = vsel %vm1789_vm14, %v3949_v58, %v3945_v55  ;;  %5666 = vmatpush3.bf16.msra.mxu1 %v6365_v61  ;;  %v3797_v27 = vsel %vm1796_vm15, %v3796_v8, %v3792_v54  ;;  %v3954_v25 = vrot.slane %v12131_v19, %v11937_v7  ;;  %v4969_v6 = vrot.slane %v10680_v24, %v11868_v3  ;;  %v4538_v24 = vpop.permute.xlu0 %4537 }
 0x721   : > { %5667 = vmatprep.subr.bf16.mxu1 %v6662_v39  ;;  %v3802_v14 = vsel %vm1803_vm0, %v3801_v21, %v3797_v27  ;;  %v3876_v58 = vsel %vm1796_vm15, %v3875_v17, %v3871_v42  ;;  %v4974_v26 = vrot.slane %v4454_v1, %v11873_v35  ;;  %v4965_v43 = vsel %vm1733_vm6, %v4964_v32, %v4960_v46 }
 0x722   : > { %v3806_v15 = vrot.slane %v12132_v0, %v11958_v49  ;;  %v3881_v28 = vsel %vm1803_vm0, %v3880_v52, %v3876_v58  ;;  %v4970_v60 = vsel %vm1740_vm7, %v4969_v6, %v4965_v43  ;;  %v3955_v37 = vsel %vm1796_vm15, %v3954_v25, %v3950_v22 }
 0x723   : > { %v3885_v54 = vrot.slane %v12133_v9, %v11958_v49  ;;  %v5112_v56 = vrot.slane %v4538_v24, %v11858_v30  ;;  %v4975_v21 = vsel %vm12134_vm8, %v4974_v26, %v4970_v60  ;;  %v3960_v46 = vsel %vm1803_vm0, %v3959_v13, %v3955_v37  ;;  %v4457_v2 = vpop.permute.xlu1 %4456 }
 0x724   : > { %5668 = vmatpush3.bf16.msra.mxu1 %v6366_v20  ;;  %v3967_v1 = vsel %vm2367_vm12, %v10506_v33, %v10498_v51  ;;  %v3964_v8 = vrot.slane %v12135_v5, %v11958_v49  ;;  %v5117_v42 = vrot.slane %v10708_v41, %v11864_v23  ;;  %v3807_v40 = vsel %vm1810_vm1, %v3806_v15, %v3802_v14  ;;  %v4583_v41 = vpop.permute.xlu0 %4582  ;;  %v6368_v14 = vld [vmem:[%s6911_s22 + $0x18] sm:$0xff]   ;;  %v6371_v20 = vld [vmem:[%s6911_s22] sm:$0xff]  }
 0x725   : > { %5669 = vmatprep.subr.bf16.mxu1 %v6662_v39  ;;  %v5122_v52 = vrot.slane %v4544_v36, %v11866_v12  ;;  %v5113_v55 = vsel %vm1719_vm4, %v5112_v56, %v5108_v16  ;;  %v3886_v10 = vsel %vm1810_vm1, %v3885_v54, %v3881_v28  ;;  %vm12136_vm12 = vcmask 1043459   ;;  %v6369_v28 = vld [vmem:[%s6911_s22 + $0x10] sm:$0xff]   ;;  %v6370_v54 = vld [vmem:[%s6911_s22 + $0x8] sm:$0xff]  }
 0x726   : > { %v3968_v51 = vsel %vm12136_vm12, %v10532_v11, %v3967_v1  ;;  %v5118_v33 = vsel %vm1726_vm5, %v5117_v42, %v5113_v55  ;;  %v4979_v17 = vrot.slane %v4457_v2, %v11877_v59  ;;  %v3965_v22 = vsel %vm1810_vm1, %v3964_v8, %v3960_v46  ;;  %v6367_v11 = vld [vmem:[%s6911_s22 + $0x20] sm:$0xff]  }
 0x727   : > { %vm12137_vm9 = vcmask 1044484   ;;  %v5182_v13 = vrot.slane %v10651_v63, %v11854_v4  ;;  %v5186_v16 = vrot.slane %v4583_v41, %v11852_v34  ;;  %v5123_v32 = vsel %vm1733_vm6, %v5122_v52, %v5118_v33  ;;  %v4547_v25 = vpop.permute.xlu1 %4546 }
 0x728   : > { %v3969_v45 = vsel %vm12137_vm9, %v3728_v18, %v3968_v51  ;;  %vm12138_vm10 = vcmask 1045509   ;;  %5670 = vmatpush3.bf16.msra.mxu1 %v6367_v11  ;;  %vm12139_vm2 = vcmask 523712   ;;  %vm12140_vm11 = vcmask 1046534   ;;  %v4496_v63 = vpop.permute.xlu0 %4495 }
 0x729   : > { %v3970_v61 = vsel %vm12138_vm10, %v3807_v40, %v3969_v45  ;;  %v4980_v27 = vsel %vm12139_vm2, %v4979_v17, %v4975_v21  ;;  %5671 = vmatprep.subr.bf16.mxu1 %v6662_v39  ;;  %v5187_v18 = vsel %vm1712_vm3, %v5186_v16, %v5182_v13  ;;  %vm12141_vm8 = vcmask 1047559   ;;  %vm12144_vm9 = vmmov %vm12139_vm2 }
 0x72a   : > { %v3971_v19 = vsel %vm12140_vm11, %v3886_v10, %v3970_v61  ;;  %v5127_v34 = vrot.slane %v4547_v25, %v11868_v3  ;;  %v5043_v6 = vrot.slane %v4496_v63, %v11866_v12  ;;  %vm12142_vm3 = vcmask 654912  }
 0x72b   : > { %v3972_v4 = vsel %vm12141_vm8, %v3965_v22, %v3971_v19  ;;  %v4415_v43 = vpop.permute.xlu1 %4414  ;;  %v4241_v5 = vunpack.c.h.b16 %v12044_v29  ;;  %vm12143_vm12 = vcmask 458112   ;;  %vm12146_vm10 = vmmov %vm12142_vm3  ;;  %vm12151_vm8 = vcmask 1043459  }
 0x72c   : > { %3974 = vadd.xlane.f32.xlu1 %v3972_v4  ;;  %5672 = vmatpush3.bf16.msra.mxu1 %v6368_v14  ;;  %v5128_v58 = vsel %vm1740_vm7, %v5127_v34, %v5123_v32  ;;  %v5044_v26 = vsel %vm1733_vm6, %v5043_v6, %v10696_v47  ;;  %v4910_v36 = vrot.slane %v4415_v43, %v11903_v38  ;;  %v4586_v0 = vpop.permute.xlu0 %4585 }
 0x72d   : > { %5673 = vmatprep.subr.bf16.mxu1 %v6662_v39  ;;  %v5191_v15 = vrot.slane %v4586_v0, %v11858_v30 }
 0x72e   : > { %v4911_v60 = vsel %vm12142_vm3, %v4910_v36, %v10624_v48 }
 0x72f   : > { %v5192_v24 = vsel %vm1719_vm4, %v5191_v15, %v5187_v18  ;;  %v4505_v37 = vpop.permute.xlu1 %4504  ;;  %vm6663_vm4 = vmmov 0  }
 0x730   : > { %5674 = vmatpush3.bf16.msra.mxu1 %v6369_v28  ;;  %v4499_v9 = vpop.permute.xlu0 %4498  ;;  %5679 = vmatprep.mubr.msk.bf16.mxu1 %vm6663_vm4, %v6662_v39  ;;  %v5058_v40 = vrot.slane %v4505_v37, %v11877_v59 }
 0x731   : > { %5675 = vmatprep.subr.bf16.mxu1 %v6662_v39  ;;  %v5048_v47 = vrot.slane %v4499_v9, %v11868_v3 }
 0x733   : > { %v5049_v30 = vsel %vm1740_vm7, %v5048_v47, %v5044_v26  ;;  %v4595_v56 = vpop.permute.xlu1 %4594 }
 0x734   : > { %5676 = vmatpush3.bf16.msra.mxu1 %v6370_v54  ;;  %v4589_v21 = vpop.permute.xlu0 %4588  ;;  %v5206_v51 = vrot.slane %v4595_v56, %v11868_v3 }
 0x735   : > { %5677 = vmatprep.subr.bf16.mxu1 %v6662_v39  ;;  %v5196_v46 = vrot.slane %v4589_v21, %v11864_v23 }
 0x737   : > { %v5197_v48 = vsel %vm1726_vm5, %v5196_v46, %v5192_v24  ;;  %v4463_v1 = vpop.permute.xlu1 %4462  ;;  %vm12145_vm5 = vcmask 589312  }
 0x738   : > { %5678 = vmatpush3.bf16.msra.mxu1 %v6371_v20  ;;  %v4502_v8 = vpop.permute.xlu0 %4501  ;;  %v4989_v22 = vrot.slane %v4463_v1, %v11903_v38  ;;  %vm12150_vm11 = vmmov %vm12145_vm5 }
 0x739   : > { %v5053_v42 = vrot.slane %v4502_v8, %v11873_v35  ;;  %vm12153_vm4 = vmmov %vm12145_vm5 }
 0x73b   : > { %v5054_v52 = vsel %vm12143_vm12, %v5053_v42, %v5049_v30  ;;  %v4553_v55 = vpop.permute.xlu1 %4552 }
 0x73c   : > { %v4592_v23 = vpop.permute.xlu0 %4591  ;;  %v5059_v2 = vsel %vm12144_vm9, %v5058_v40, %v5054_v52  ;;  %v5137_v32 = vrot.slane %v4553_v55, %v11877_v59 }
 0x73d   : > { %4624 = vperm.xlu1 %5830, %v4241_v5   ;;  %v5201_v10 = vrot.slane %v4592_v23, %v11866_v12 }
 0x73f   : > { %v5202_v29 = vsel %vm1733_vm6, %v5201_v10, %v5197_v48  ;;  %v4421_v33 = vpop.permute.xlu1 %4420  ;;  %vm12147_vm6 = vmmov %vm12143_vm12 }
 0x740   : > { %v4460_v17 = vpop.permute.xlu0 %4459  ;;  %v10832_v41 = vsel %vm1740_vm7, %v5206_v51, %v5202_v29  ;;  %vm12148_vm7 = vmmov %vm12139_vm2  ;;  %vm12149_vm2 = vcmask 720512  }
 0x741   : > { %v4984_v39 = vrot.slane %v4460_v17, %v11883_v50  ;;  %vm12152_vm3 = vmmov %vm12149_vm2 }
 0x742   : > { %vm12154_vm12 = vmmov %vm12146_vm10 }
 0x743   : > { %v4985_v45 = vsel %vm12145_vm5, %v4984_v39, %v4980_v27  ;;  %v10837_v13 = vpop.permute.xlu1 %4510  ;;  %v4920_v27 = vrot.slane %v4421_v33, %v11923_v53  ;;  %vm12155_vm9 = vmmov %vm12149_vm2 }
 0x744   : > { %v4550_v16 = vpop.permute.xlu0 %4549  ;;  %v4990_v12 = vsel %vm12146_vm10, %v4989_v22, %v4985_v45  ;;  %vm12156_vm5 = vmmov %vm12146_vm10 }
 0x745   : > { %v5132_v3 = vrot.slane %v4550_v16, %v11873_v35  ;;  %vm12157_vm10 = vmmov %vm12149_vm2 }
 0x747   : > { %v5133_v61 = vsel %vm12147_vm6, %v5132_v3, %v5128_v58  ;;  %v10843_v11 = vpop.permute.xlu1 %4600  ;;  %vm12158_vm6 = vcmask 1044484  }
 0x748   : > { %v4418_v19 = vpop.permute.xlu0 %4417  ;;  %v5138_v18 = vsel %vm12148_vm7, %v5137_v32, %v5133_v61  ;;  %vm12159_vm7 = vcmask 1045509  }
 0x749   : > { %v4915_v25 = vrot.slane %v4418_v19, %v11983_v44 }
 0x74b   : > { %v4916_v4 = vsel %vm12149_vm2, %v4915_v25, %v4911_v60  ;;  %v4469_v34 = vpop.permute.xlu1 %4468  ;;  %vm12160_vm2 = vcmask 1046534  }
 0x74c   : > { %v4508_v63 = vpop.permute.xlu0 %4507  ;;  %v4921_v6 = vsel %vm1782_vm13, %v4920_v27, %v4916_v4  ;;  %v4999_v16 = vrot.slane %v4469_v34, %v11923_v53 }
 0x74d   : > { %v5063_v14 = vrot.slane %v4508_v63, %v11883_v50 }
 0x74f   : > { %v5064_v26 = vsel %vm12150_vm11, %v5063_v14, %v5059_v2  ;;  %v4559_v58 = vpop.permute.xlu1 %4558  ;;  %vm12161_vm11 = vcmask 458112  }
 0x750   : > { %v10852_v43 = vpop.permute.xlu0 %4597  ;;  %v5147_v34 = vrot.slane %v4559_v58, %v11903_v38 }
 0x753   : > { %v4427_v36 = vpop.permute.xlu1 %4426 }
 0x754   : > { %v4466_v0 = vpop.permute.xlu0 %4465  ;;  %v4930_v1 = vrot.slane %v4427_v36, %v11937_v7 }
 0x755   : > { %v4994_v33 = vrot.slane %v4466_v0, %v11983_v44 }
 0x757   : > { %v4517_v15 = vpop.permute.xlu1 %4516  ;;  %v4995_v39 = vsel %vm12152_vm3, %v4994_v33, %v4990_v12  ;;  %vm12163_vm3 = vmmov %vm12153_vm4 }
 0x758   : > { %v4556_v28 = vpop.permute.xlu0 %4555  ;;  %v5000_v19 = vsel %vm1782_vm13, %v4999_v16, %v4995_v39  ;;  %v5078_v0 = vrot.slane %v4517_v15, %v11923_v53 }
 0x759   : > { %v5142_v22 = vrot.slane %v4556_v28, %v11883_v50 }
 0x75b   : > { %v10854_v24 = vpop.permute.xlu1 %4606  ;;  %v5143_v25 = vsel %vm12153_vm4, %v5142_v22, %v5138_v18  ;;  %vm12164_vm4 = vmmov %vm12156_vm5 }
 0x75c   : > { %v4424_v37 = vpop.permute.xlu0 %4423  ;;  %v5148_v18 = vsel %vm12156_vm5, %v5147_v34, %v5143_v25 }
 0x75d   : > { %v4925_v21 = vrot.slane %v4424_v37, %v11917_v62 }
 0x75f   : > { %v4475_v9 = vpop.permute.xlu1 %4474  ;;  %v4926_v48 = vsel %vm1789_vm14, %v4925_v21, %v4921_v6 }
 0x760   : > { %v4514_v60 = vpop.permute.xlu0 %4513  ;;  %v4931_v40 = vsel %vm1796_vm15, %v4930_v1, %v4926_v48  ;;  %v5009_v63 = vrot.slane %v4475_v9, %v11937_v7 }
 0x761   : > { %v5073_v32 = vrot.slane %v4514_v60, %v11983_v44 }
 0x763   : > { %v4565_v47 = vpop.permute.xlu1 %4564 }
 0x764   : > { %v10856_v54 = vpop.permute.xlu0 %4603 }
 0x767   : > { %v4433_v30 = vpop.permute.xlu1 %4432 }
 0x768   : > { %v4472_v56 = vpop.permute.xlu0 %4471  ;;  %v4940_v42 = vrot.slane %v4433_v30, %v11958_v49  ;;  %v5157_v30 = vrot.slane %v4565_v47, %v11923_v53 }
 0x769   : > { %v5004_v45 = vrot.slane %v4472_v56, %v11917_v62 }
 0x76b   : > { %v4523_v20 = vpop.permute.xlu1 %4522  ;;  %v5005_v12 = vsel %vm1789_vm14, %v5004_v45, %v5000_v19  ;;  %v5216_v19 = vrot.slane %v10843_v11, %v11877_v59  ;;  %v12166_v11 = vld [vmem:[#allocation146_spill] sm:$0xff] }
 0x76c   : > { %v4562_v46 = vpop.permute.xlu0 %4561  ;;  %v5010_v37 = vsel %vm1796_vm15, %v5009_v63, %v5005_v12  ;;  %v5088_v1 = vrot.slane %v4523_v20, %v11937_v7 }
 0x76d   : > { %v5152_v27 = vrot.slane %v4562_v46, %v11983_v44 }
 0x76f   : > { %v10864_v52 = vpop.permute.xlu1 %4612  ;;  %v5153_v58 = vsel %vm12157_vm10, %v5152_v27, %v5148_v18 }
 0x770   : > { %v4430_v5 = vpop.permute.xlu0 %4429 }
 0x771   : > { %v4935_v8 = vrot.slane %v4430_v5, %v11944_v31  ;;  %v5158_v5 = vsel %vm1782_vm13, %v5157_v30, %v5153_v58 }
 0x773   : > { %v4936_v55 = vsel %vm1803_vm0, %v4935_v8, %v4931_v40  ;;  %v4526_v29 = vpop.permute.xlu1 %4525 }
 0x774   : > { %v4941_v23 = vsel %vm1810_vm1, %v4940_v42, %v4936_v55  ;;  %v4520_v2 = vpop.permute.xlu0 %4519 }
 0x775   : > { %v5260_v10 = vsel %vm12151_vm8, %v4941_v23, %v10482_v57  ;;  %v5068_v57 = vrot.slane %v10837_v13, %v11903_v38  ;;  %v5083_v13 = vrot.slane %v4520_v2, %v11917_v62  ;;  %v5093_v2 = vrot.slane %v4526_v29, %v11944_v31 }
 0x776   : > { %v5211_v29 = vrot.slane %v10852_v43, %v11873_v35  ;;  %vm12162_vm8 = vcmask 523712   ;;  %v5226_v35 = vrot.slane %v10854_v24, %v11903_v38  ;;  %v2820_v43 = vld [vmem:[#allocation4] sm:$0xff] }
 0x777   : > { %v10877_v3 = vpop.permute.xlu1 %4615  ;;  %v5069_v6 = vsel %vm12154_vm12, %v5068_v57, %v5064_v26  ;;  %v5221_v57 = vrot.slane %v10856_v54, %v11883_v50  ;;  %vm12165_vm12 = vmmov %vm12155_vm9  ;;  %v5236_v50 = vrot.slane %v10864_v52, %v11923_v53  ;;  %v2821_v54 = vmul.f32 %v12166_v11, %v2820_v43 }
 0x778   : > { %v5074_v14 = vsel %vm12155_vm9, %v5073_v32, %v5069_v6  ;;  %v5241_v38 = vrot.slane %v10877_v3, %v11917_v62  ;;  %vm12167_vm9 = vcmask 7168   ;;  %v12169_v3 = vld [vmem:[#allocation33_spill] sm:$0xff] }
 0x779   : > { %v10870_v51 = vpop.permute.xlu0 %4609  ;;  %v5079_v56 = vsel %vm1782_vm13, %v5078_v0, %v5074_v14 }
 0x77a   : > { %v5084_v15 = vsel %vm1789_vm14, %v5083_v13, %v5079_v56 }
 0x77b   : > { %v5089_v40 = vsel %vm1796_vm15, %v5088_v1, %v5084_v15 }
 0x77c   : > { %v4574_v28 = vpop.permute.xlu1 %4573  ;;  %v5094_v39 = vsel %vm1803_vm0, %v5093_v2, %v5089_v40 }
 0x77d   : > { %v5172_v47 = vrot.slane %v4574_v28, %v11944_v31 }
 0x77e   : > { %v4478_v17 = vpop.permute.xlu0 %4477 }
 0x77f   : > { %v5014_v4 = vrot.slane %v4478_v17, %v11944_v31 }
 0x781   : > { %v5015_v9 = vsel %vm1803_vm0, %v5014_v4, %v5010_v37  ;;  %v4577_v55 = vpop.permute.xlu1 %4576  ;;  %v5231_v4 = vrot.slane %v10870_v51, %v11983_v44 }
 0x782   : > { %v5177_v17 = vrot.slane %v4577_v55, %v11958_v49 }
 0x783   : > { %v4568_v61 = vpop.permute.xlu0 %4567 }
 0x784   : > { %v5162_v26 = vrot.slane %v4568_v61, %v11917_v62  ;;  %v5212_v61 = vsel %vm12161_vm11, %v5211_v29, %v10832_v41  ;;  %v3979_v62 = vld [vmem:[#allocation5] sm:$0xff] }
 0x785   : > { %v5217_v25 = vsel %vm12162_vm8, %v5216_v19, %v5212_v61 }
 0x786   : > { %v5163_v42 = vsel %vm1789_vm14, %v5162_v26, %v5158_v5  ;;  %v5222_v27 = vsel %vm12163_vm3, %v5221_v57, %v5217_v25 }
 0x787   : > { %v4481_v36 = vpop.permute.xlu0 %4480  ;;  %v5227_v41 = vsel %vm12164_vm4, %v5226_v35, %v5222_v27 }
 0x788   : > { %v5019_v60 = vrot.slane %v4481_v36, %v11958_v49  ;;  %v5232_v34 = vsel %vm12165_vm12, %v5231_v4, %v5227_v41 }
 0x789   : > { %v5237_v6 = vsel %vm1782_vm13, %v5236_v50, %v5232_v34  ;;  %vm12168_vm13 = vcmask 1047559  }
 0x78a   : > { %v5020_v21 = vsel %vm1810_vm1, %v5019_v60, %v5015_v9  ;;  %v5242_v51 = vsel %vm1789_vm14, %v5241_v38, %v5237_v6 }
 0x78b   : > { %v5261_v46 = vsel %vm12158_vm6, %v5020_v21, %v5260_v10  ;;  %v4571_v48 = vpop.permute.xlu0 %4570 }
 0x78c   : > { %v5167_v8 = vrot.slane %v4571_v48, %v11937_v7 }
 0x78e   : > { %v5168_v23 = vsel %vm1796_vm15, %v5167_v8, %v5163_v42 }
 0x78f   : > { %v5173_v10 = vsel %vm1803_vm0, %v5172_v47, %v5168_v23 }
 0x790   : > { %v4529_v33 = vpop.permute.xlu0 %4528  ;;  %v5178_v16 = vsel %vm1810_vm1, %v5177_v17, %v5173_v10 }
 0x791   : > { %v5098_v20 = vrot.slane %v4529_v33, %v11958_v49 }
 0x793   : > { %v5099_v22 = vsel %vm1810_vm1, %v5098_v20, %v5094_v39 }
 0x794   : > { %v5262_v45 = vsel %vm12159_vm7, %v5099_v22, %v5261_v46  ;;  %v4619_v12 = vpop.permute.xlu0 %4618 }
 0x795   : > { %v5263_v32 = vsel %vm12160_vm2, %v5178_v16, %v5262_v45  ;;  %v5246_v14 = vrot.slane %v4619_v12, %v11937_v7 }
 0x797   : > { %v5247_v53 = vsel %vm1796_vm15, %v5246_v14, %v5242_v51 }
 0x798   : > { %v4622_v59 = vpop.permute.xlu0 %4621 }
 0x799   : > { %v5251_v24 = vrot.slane %v4622_v59, %v11944_v31  ;;  %v3985_v31 = vmul.f32 %v12169_v3, %v3979_v62 }
 0x79b   : > { %v5252_v36 = vsel %vm1803_vm0, %v5251_v24, %v5247_v53 }
 0x7b5   : > { %v3975_v63 = vpop.xlane.xlu1 %3974 }
 0x7b6   : > { %v3976_v44 = vadd.f32 %v3975_v63, %v2821_v54 }
 0x7b8   : > { %3978 = vst.msk [vmem:[#allocation4] sm:$0xff] %vm12167_vm9, %v3976_v44 }
 0x7b9   : > { %v4625_v13 = vpop.permute.xlu1 %4624 }
 0x7ba   : > { %v5256_v52 = vrot.slane %v4625_v13, %v11958_v49 }
 0x7bc   : > { %v5257_v0 = vsel %vm1810_vm1, %v5256_v52, %v5252_v36 }
 0x7bd   : > { %v5264_v7 = vsel %vm12168_vm13, %v5257_v0, %v5263_v32 }
 0x7be   : > { %v5265_v18 = vpack.c.b16 %v5264_v7, %v5264_v7 }
 0x7c0   : > { %5680 = vmatmul.mubr.bf16.vlgmr.msra.gmra.mxu1 %v5265_v18 }
 0x880   : > { %v5301_v28 = vpop.f32.mrf.mxu1 }
 0x881   : > { %v5307_v37 = vadd.f32 %v5301_v28, %v3985_v31 }
 0x882   : > { %v5681_v60 = vpop.f32.mrf.mxu1  ;;  %5313 = sbr.rel (%p5580_p7) target bundleno = 2331 (0x91b), region = 68 }
 0x883   : > { %5308 = vst [vmem:[#allocation5] sm:$0xff] %v5307_v37 }
 0x884   : > { %v5304_v58 = vpop.f32.mrf.mxu1 }
 0x886   : > { %v5682_v9 = vpop.f32.mrf.mxu1 }
 0x887   : > { %v5319_v49 = vld [vmem:[#allocation3] sm:$0xff]  ;;  %v5314_v26 = vld [vmem:[#allocation4] sm:$0xff]  ;;  %v6664_v30 = vmov 0  }
 0x888   : > { %6372 = vset.pattern.permute.xlu0 %v6664_v30  ;;  %6373 = vrcp.f32 %v5314_v26  ;;  %v5317_v21 = vld [vmem:[%s6940_s25] sm:$0xff]  ;;  %v5318_v15 = vld [vmem:[%s6940_s25 + $0x8] sm:$0xff] }
 0x889   : > { %5322 = vperm.xlu0 %6372, %v5319_v49  }
 0x88a   : > { %v5340_v42 = vld [vmem:[#allocation5] sm:$0xff] }
 0x895   : > { %v6374_v56 = vpop.eup %6373 }
 0x896   : > { %5333 = vperm.xlu0 %6372, %v6374_v56  }
 0x904   : > { %v5323_v46 = vpop.permute.xlu0 %5322 }
 0x905   : > { %v5325_v48 = vsub.f32 %v5317_v21, %v5323_v46  ;;  %v5326_v1 = vsub.f32 %v5318_v15, %v5323_v46 }
 0x907   : > { %v5327_v5 = vmul.f32 1.442695, %v5325_v48  ;;  %v5329_v8 = vmul.f32 1.442695, %v5326_v1 }
 0x909   : > { %6375 = vpow2.f32 %v5327_v5 }
 0x90a   : > { %6377 = vpow2.f32 %v5329_v8 }
 0x911   : > { %v5334_v40 = vpop.permute.xlu0 %5333 }
 0x912   : > { %v5341_v47 = vmul.f32 %v5340_v42, %v5334_v40 }
 0x914   : > { %5342 = vst [vmem:[%s6938_s18] sm:$0xff] %v5341_v47 }
 0x916   : > { %v6376_v55 = vpop.eup %6375 }
 0x917   : > { %v6378_v23 = vpop.eup %6377  ;;  %v5336_v2 = vmul.f32 %v6376_v55, %v5334_v40 }
 0x918   : > { %v5337_v33 = vmul.f32 %v6378_v23, %v5334_v40 }
 0x919   : > { %5338 = vst [vmem:[%s6940_s25] sm:$0xff] %v5336_v2 }
 0x91a   : > { %5339 = vst [vmem:[%s6940_s25 + $0x8] sm:$0xff] %v5337_v33 }
 0x91b PF: > { %s12170_s8 = sld [smem:[#allocation24_spill]]  ;;  %s5362_s9 = sshll.u32 %s6938_s18, 4  ;;  %s5363_s9 = int_to_ptr.vmem [resolvable:$true] %s5362_s9 }
 0x91c   : > { %s12171_s6 = sld [smem:[#allocation217_spill]]  ;;  %s5344_s19 = scalar_lea.sflag [#allocation9], %s6919_s7 }
 0x91d   : > { %s6487_s20 = scalar_lea.vmem %s5363_s9, 128  ;;  %s6665_s24 = smov [#allocation15]  }
 0x91e   : > { %p6488_p8 = scmp.ne.s32.totalorder %s5363_s9, %s6487_s20  ;;  %s6491_s2 = sshll.u32 %s6665_s24, 4  ;;  %s6492_s2 = int_to_ptr.vmem [resolvable:$false] %s6491_s2 }
 0x91f   : > { %s6493_s0 = scalar_lea.vmem %s6492_s2, 256  ;;  %p6494_p11 = scmp.lt.s32.totalorder %s5363_s9, %s6492_s2 }
 0x920   : > { %p6489_p13 = pnand %p6488_p8, %p6885_p12  ;;  %p6495_p3 = scmp.lt.s32.totalorder %s6493_s0, %s6487_s20 }
 0x921   : > { %s5583_s22 = sshll.u32 %s12170_s8, 7 }
 0x922   : > { %s5360_s13 = scalar_lea.hbm %s12171_s6, %s5583_s22  ;;  %p6490_p2 = pneg %p6489_p13 }
 0x923   : > { %p6496_p10 = por %p6495_p3, %p6494_p11 }
 0x925   : > { %p6497_p9 = pnand %p6496_p10, %p6490_p2 }
 0x927   : > { %6500 = shalt.err (!%p6497_p9)
}
 0x928   : > { %s6501_s15 = scalar_lea.hbm %s5360_s13, 128  ;;  %s6505_s22 = scalar_lea.hbm %s12171_s6, 256 }
 0x929   : > { %p6502_p1 = scmp.ne.s32.totalorder %s5360_s13, %s6501_s15  ;;  %p6506_p0 = scmp.lt.s32.totalorder %s5360_s13, %s12171_s6 }
 0x92a   : > { %p6507_p4 = scmp.lt.s32.totalorder %s6505_s22, %s6501_s15 }
 0x92b   : > { %p6503_p5 = pnand %p6502_p1, %p6885_p12 }
 0x92c   : > { %p6508_p7 = por %p6507_p4, %p6506_p0 }
 0x92d   : > { %p6504_p6 = pneg %p6503_p5 }
 0x92f   : > { %p6509_p8 = pnand %p6508_p7, %p6504_p6 }
 0x931   : > { %6512 = shalt.err (!%p6509_p8)
}
 0x932   : > { %5695 = dma.vmem_to_hbm [thread:$0]  (%p6885_p12), %s5363_s9, 128, %s5360_s13, %s5344_s19  }
 0x933   : > { %s5588_s20 = sshll.u32 %s12170_s8, 8  ;;  %s5376_s24 = sshll.u32 %s6940_s25, 4  ;;  %s5377_s24 = int_to_ptr.vmem [resolvable:$true] %s5376_s24 }
 0x934   : > { %s12172_s18 = sld [smem:[#allocation218_spill]]  ;;  %s5349_s4 = scalar_lea.sflag [#allocation17], %s6919_s7 }
 0x935   : > { %s6513_s14 = scalar_lea.vmem %s5377_s24, 256  ;;  %s6666_s15 = smov [#allocation16]  }
 0x936   : > { %p6514_p13 = scmp.ne.s32.totalorder %s5377_s24, %s6513_s14  ;;  %s6517_s22 = sshll.u32 %s6666_s15, 4  ;;  %s6518_s22 = int_to_ptr.vmem [resolvable:$false] %s6517_s22 }
 0x937   : > { %s6519_s1 = scalar_lea.vmem %s6518_s22, 512  ;;  %p6520_p3 = scmp.lt.s32.totalorder %s5377_s24, %s6518_s22 }
 0x938   : > { %p6515_p2 = pnand %p6514_p13, %p6885_p12  ;;  %p6521_p10 = scmp.lt.s32.totalorder %s6519_s1, %s6513_s14 }
 0x93a   : > { %s5374_s23 = scalar_lea.hbm %s12172_s18, %s5588_s20  ;;  %p6516_p11 = pneg %p6515_p2 }
 0x93b   : > { %p6522_p9 = por %p6521_p10, %p6520_p3 }
 0x93d   : > { %p6523_p1 = pnand %p6522_p9, %p6516_p11 }
 0x93f   : > { %6526 = shalt.err (!%p6523_p1)
}
 0x940   : > { %s6527_s25 = scalar_lea.hbm %s5374_s23, 256  ;;  %s6531_s13 = scalar_lea.hbm %s12172_s18, 512 }
 0x941   : > { %p6528_p5 = scmp.ne.s32.totalorder %s5374_s23, %s6527_s25  ;;  %p6532_p4 = scmp.lt.s32.totalorder %s5374_s23, %s12172_s18 }
 0x942   : > { %p6533_p7 = scmp.lt.s32.totalorder %s6531_s13, %s6527_s25 }
 0x943   : > { %p6529_p6 = pnand %p6528_p5, %p6885_p12 }
 0x944   : > { %p6534_p8 = por %p6533_p7, %p6532_p4 }
 0x945   : > { %p6530_p0 = pneg %p6529_p6 }
 0x947   : > { %p6535_p13 = pnand %p6534_p8, %p6530_p0 }
 0x949   : > { %6538 = shalt.err (!%p6535_p13)
}
 0x94a   : > { %5696 = dma.vmem_to_hbm [thread:$0]  (%p6885_p12), %s5377_s24, 256, %s5374_s23, %s5349_s4  }
 0x94b PF: > { %p5725_p2 = scmp.ge.s32.totalorder %s6649_s12, 2  ;;  %s5388_s1 = sand.u32 1, %s6609_s26  }
 0x94c   : > { %p12173_p11 = scmp.ne.s32.totalorder %s11281_s29, 0  ;;  %s5389_s20 = scalar_lea.sflag [#allocation9], %s5388_s1 }
 0x94e   : > { %p5714_p3 = pnand %p5725_p2, %p12173_p11 }
 0x950   : > { %p5715_p10 = pneg %p5714_p3 }
 0x952   : > { %6600 = dma.done.wait (%p5715_p10), %s5389_s20, 128  }
 0x953   : > { %6602 = vsyncadd (%p5715_p10), %s5389_s20, 4294967168  ;;  %s5398_s2 = scalar_lea.sflag [#allocation17], %s5388_s1 }
 0x954   : > { %6604 = dma.done.wait (%p5715_p10), %s5398_s2, 256  }
 0x955   : > { %6606 = vsyncadd (%p5715_p10), %s5398_s2, 4294967040  ;;  %s32_s12 = sadd.s32 1, %s6649_s12   ;;  %s12174_s3 = sld [smem:[#allocation25_spill]] }
 0x956   : > { %p29_p9 = scmp.ge.s32.totalorder %s32_s12, 6   ;;  %s12175_s24 = sld [smem:[#allocation26_spill]] }
 0x957   : > { %s12176_s26 = smov %s6613_s27  ;;  %s12177_s27 = smov %s6617_s28 }
 0x958   : > { %s12178_s28 = smov %s6868_s21  ;;  %s12179_s29 = smov %s6625_s30 }
 0x959   : > { %s12180_s30 = smov %s6629_s5  ;;  %s12181_s5 = smov %s6843_s17 }
 0x95a   : > { %s12182_s8 = smov %s6641_s10  ;;  %s12183_s9 = smov %s6645_s11 }
 0x95b   : > { %s12184_s10 = smov %s12174_s3  ;;  %31 = sbr.rel (!%p29_p9) target bundleno = 23 (0x17), region = 136 }
 0x95c   : > { %s12185_s11 = smov %s12175_s24 }
 0x960   :  { %5403 = vsyncpa [#allocation8], 1 }
 0x961   :  { %5405 = vsyncpa [#allocation8 + $0x1], 1 }
 0x962   :  { %5406 = vsyncpa [#allocation11], 1 }
 0x963   :  { %5408 = vsyncpa [#allocation11 + $0x1], 1 }
 0x964   :  { %5409 = vsyncpa [#allocation14], 1 }
 0x965   :  { %5410 = vsyncpa [#allocation9], 1 }
 0x966   :  { %5412 = vsyncpa [#allocation9 + $0x1], 1 }
 0x967   :  { %5413 = vsyncpa [#allocation17], 1 }
 0x968   :  { %5415 = vsyncpa [#allocation17 + $0x1], 1 }

</bundles_post_ra>
